<compile_context>
chip_gen: v6e
topology: v6e:2x2x1
jax: 0.10.0
libtpu: 0.0.40
codegen_flags: <defaults>
</compile_context>

<pallas_src>
import math

import jax
import jax.numpy as jnp
from jax.experimental import pallas as pl
from jax.experimental.pallas import tpu as pltpu


def _pick_tile(n, cap, mult=1):
    """Largest divisor of n that is <= cap and (a multiple of mult or == n)."""
    for d in range(min(cap, n), 0, -1):
        if n % d == 0 and (d % mult == 0 or d == n):
            return d
    return n


# ----------------------------------------------------------------------------
# Fused Conv2d(3x3, stride 2, pad 1) + batch stats + BatchNorm + ReLU
# (conv bias dropped: it cancels exactly under train-mode BatchNorm)
# ----------------------------------------------------------------------------
def _make_conv_bn_relu_kernel(nT, inv_n, eps):
    def kernel(xc_ref, w_ref, g_ref, b_ref, y_ref, st_ref):
        # xc_ref: [TR, K]          bf16 im2col tile (K = 9*Cin)
        # w_ref : [K, Cout]        bf16 reshaped conv weight
        # g_ref : [1, Cout]        BN gamma (f32)
        # b_ref : [1, Cout]        BN beta  (f32)
        # y_ref : [nT, TR, Cout]   resident output block (whole layer, f32)
        # st_ref: [2, Cout]        VMEM scratch: [sum; sum of squares]
        i = pl.program_id(0)

        @pl.when(i == 0)
        def _init():
            st_ref[...] = jnp.zeros_like(st_ref)

        # Conv tile as a single MXU matmul: rows = output pixels, K = 9*Cin.
        z = jnp.dot(xc_ref[...], w_ref[...],
                    preferred_element_type=jnp.float32)          # [TR, Cout]
        y_ref[i] = z                      # stage pre-BN z in the resident block
        s1 = jnp.sum(z, axis=0, keepdims=True)
        s2 = jnp.sum(z * z, axis=0, keepdims=True)
        st_ref[...] += jnp.concatenate([s1, s2], axis=0)

        # Last grid step: finalize batch stats, apply BN + ReLU in place.
        @pl.when(i == nT - 1)
        def _finalize():
            mean = st_ref[0:1, :] * inv_n
            var = jnp.maximum(st_ref[1:2, :] * inv_n - mean * mean, 0.0)
            scale = jax.lax.rsqrt(var + eps) * g_ref[...]
            shift = b_ref[...] - mean * scale

            @pl.loop(0, nT)
            def _apply(j):
                y_ref[j] = jnp.maximum(y_ref[j] * scale + shift, 0.0)

    return kernel


def conv_bn_relu(x, w, gamma, beta, *, eps=1e-5, row_tile_cap=256,
                 input_tile_bytes=2 << 20):
    """x: [B, H, W, Cin] (NHWC, f32); w: [Cout, Cin, 3, 3] (PyTorch layout).

    Returns ReLU(BatchNorm(Conv2d(x))) as [B, Ho, Wo, Cout] with train-mode
    (batch-statistics, biased variance, eps=1e-5) BatchNorm semantics.
    """
    B, H, W, Cin = x.shape
    Cout = w.shape[0]
    Ho = (H - 1) // 2 + 1
    Wo = (W - 1) // 2 + 1
    R = B * Ho * Wo                      # total output pixels (no padding)
    K = 9 * Cin

    # XLA glue: 3x3 / stride-2 / pad-1 im2col of the tiny activation,
    # pre-cast to bf16 (the matmul operands are bf16 anyway; halves the DMA).
    xp = jnp.pad(x, ((0, 0), (1, 1), (1, 1), (0, 0)))
    taps = [xp[:, kh:kh + 2 * Ho - 1:2, kw:kw + 2 * Wo - 1:2, :]
            for kh in range(3) for kw in range(3)]
    xc = jnp.stack(taps, axis=3).reshape(R, K).astype(jnp.bfloat16)
    # Weight as [kh*3*Cin + kw*Cin + cin, cout], bf16 operand (f32 accumulate).
    wk = jnp.transpose(w, (2, 3, 1, 0)).reshape(K, Cout).astype(jnp.bfloat16)

    # Row tile: byte-budgeted double-buffered input block, capped to keep the
    # staged [TR, Cout] tile within comfortable vreg pressure.
    cap = min(row_tile_cap, max(8, input_tile_bytes // (2 * K * 2)))
    TR = _pick_tile(R, cap, mult=8)
    nT = R // TR

    y = pl.pallas_call(
        _make_conv_bn_relu_kernel(nT, 1.0 / float(R), eps),
        grid=(nT,),
        in_specs=[
            pl.BlockSpec((TR, K), lambda i: (i, 0)),
            pl.BlockSpec((K, Cout), lambda i: (0, 0)),
            pl.BlockSpec((1, Cout), lambda i: (0, 0)),
            pl.BlockSpec((1, Cout), lambda i: (0, 0)),
        ],
        out_specs=pl.BlockSpec((nT, TR, Cout), lambda i: (0, 0, 0)),
        out_shape=jax.ShapeDtypeStruct((nT, TR, Cout), jnp.float32),
        scratch_shapes=[pltpu.VMEM((2, Cout), jnp.float32)],
        # Resident output + stats accumulation across the grid -> sequential.
        compiler_params=pltpu.CompilerParams(
            dimension_semantics=("arbitrary",)),
    )(xc, wk, gamma.reshape(1, Cout), beta.reshape(1, Cout))

    return y.reshape(B, Ho, Wo, Cout)


# ----------------------------------------------------------------------------
# GRU (single layer, batch_first, h0 = 0); returns the final hidden state.
# ----------------------------------------------------------------------------
def _make_gru_kernel(Tc, B, H):
    def kernel(x_ref, wih_ref, bih_ref, whh_ref, bhh_ref, h_ref, gi_ref):
        # x_ref  : [Tc, B, D]  bf16 input chunk (time-major)
        # wih_ref: [D, 3H]     bf16 W_ih^T (gate order r|z|n)
        # bih_ref: [1, 3H]     f32 b_ih
        # whh_ref: [H, 3H]     bf16 W_hh^T
        # bhh_ref: [1, 3H]     f32 b_hh
        # h_ref  : [B, H]      resident output block == hidden-state carry
        # gi_ref : [Tc, B, 3H] VMEM scratch: chunk input projection
        @pl.when(pl.program_id(0) == 0)
        def _init():
            h_ref[...] = jnp.zeros_like(h_ref)

        # Time-invariant input projection for this chunk: one bf16 MXU matmul.
        xc = x_ref[...].reshape(Tc * B, -1)
        gi = jnp.dot(xc, wih_ref[...], preferred_element_type=jnp.float32)
        gi_ref[...] = (gi + bih_ref[...]).reshape(Tc, B, 3 * H)

        def step(t, h):
            g = gi_ref[t]                                         # [B, 3H]
            gh = jnp.dot(h.astype(jnp.bfloat16), whh_ref[...],
                         preferred_element_type=jnp.float32) + bhh_ref[...]
            r = jax.nn.sigmoid(g[:, :H] + gh[:, :H])
            z = jax.nn.sigmoid(g[:, H:2 * H] + gh[:, H:2 * H])
            n = jnp.tanh(g[:, 2 * H:] + r * gh[:, 2 * H:])
            return (1.0 - z) * n + z * h

        h_ref[...] = jax.lax.fori_loop(0, Tc, step, h_ref[...])

    return kernel


def gru_last_hidden(x_seq, w_ih, w_hh, b_ih, b_hh):
    """x_seq: [B, T, D]; w_ih: [3H, D]; w_hh: [3H, H]; biases: [3H] -> [B, H]."""
    B, T, D = x_seq.shape
    H = w_hh.shape[1]
    Tc = _pick_tile(T, 128)

    x_t = jnp.transpose(x_seq, (1, 0, 2)).astype(jnp.bfloat16)    # [T, B, D]

    return pl.pallas_call(
        _make_gru_kernel(Tc, B, H),
        grid=(T // Tc,),
        in_specs=[
            pl.BlockSpec((Tc, B, D), lambda c: (c, 0, 0)),
            pl.BlockSpec((D, 3 * H), lambda c: (0, 0)),
            pl.BlockSpec((1, 3 * H), lambda c: (0, 0)),
            pl.BlockSpec((H, 3 * H), lambda c: (0, 0)),
            pl.BlockSpec((1, 3 * H), lambda c: (0, 0)),
        ],
        out_specs=pl.BlockSpec((B, H), lambda c: (0, 0)),
        out_shape=jax.ShapeDtypeStruct((B, H), jnp.float32),
        scratch_shapes=[pltpu.VMEM((Tc, B, 3 * H), jnp.float32)],
        compiler_params=pltpu.CompilerParams(dimension_semantics=("arbitrary",)),
    )(x_t,
      w_ih.T.astype(jnp.bfloat16),
      b_ih.reshape(1, 3 * H).astype(jnp.float32),
      w_hh.T.astype(jnp.bfloat16),
      b_hh.reshape(1, 3 * H).astype(jnp.float32))


# ----------------------------------------------------------------------------
# Full ReferenceEncoder forward.
# ----------------------------------------------------------------------------
FILTERS = [1, 32, 32, 64, 64, 128, 128]


def calculate_post_conv_height(height, kernel_size, stride, pad, n_convs):
    for _ in range(n_convs):
        height = (height - kernel_size + 2 * pad) // stride + 1
    return height


def reference_encoder_forward(inputs, params, num_mel):
    B = inputs.shape[0]
    # PyTorch: inputs.view(B, 1, -1, num_mel) (NCHW); here NHWC [B, T, M, 1].
    x = inputs.reshape(B, -1, num_mel)[..., None].astype(jnp.float32)
    for (w, _bias, gamma, beta) in params["convs"]:
        # _bias unused: under train-mode BatchNorm the conv bias cancels
        # exactly in (z - mean(z)), so it is dropped from the kernel.
        x = conv_bn_relu(x, w, gamma, beta)
    B_, Tp, Wp, C = x.shape
    # PyTorch flattens (C, W') per timestep: transpose then reshape.
    x_seq = jnp.transpose(x, (0, 1, 3, 2)).reshape(B_, Tp, C * Wp)
    w_ih, w_hh, b_ih, b_hh = params["gru"]
    return gru_last_hidden(x_seq, w_ih, w_hh, b_ih, b_hh)   # [B, embedding_dim]


def init_params(key, num_mel, embedding_dim):
    convs = []
    for i in range(len(FILTERS) - 1):
        cin, cout = FILTERS[i], FILTERS[i + 1]
        key, k1, k2 = jax.random.split(key, 3)
        bound = 1.0 / math.sqrt(cin * 9)
        w = jax.random.uniform(k1, (cout, cin, 3, 3), jnp.float32, -bound, bound)
        b = jax.random.uniform(k2, (cout,), jnp.float32, -bound, bound)
        gamma = jnp.ones((cout,), jnp.float32)
        beta = jnp.zeros((cout,), jnp.float32)
        convs.append((w, b, gamma, beta))

    post_h = calculate_post_conv_height(num_mel, 3, 2, 1, len(FILTERS) - 1)
    D = FILTERS[-1] * post_h
    H = embedding_dim
    key, k1, k2, k3, k4 = jax.random.split(key, 5)
    bound = 1.0 / math.sqrt(H)
    w_ih = jax.random.uniform(k1, (3 * H, D), jnp.float32, -bound, bound)
    w_hh = jax.random.uniform(k2, (3 * H, H), jnp.float32, -bound, bound)
    b_ih = jax.random.uniform(k3, (3 * H,), jnp.float32, -bound, bound)
    b_hh = jax.random.uniform(k4, (3 * H,), jnp.float32, -bound, bound)
    return {"convs": convs, "gru": (w_ih, w_hh, b_ih, b_hh)}


if __name__ == "__main__":
    # Mel spectrogram [B, num_frames, num_mel]; 64 mels survive 6 stride-2 convs.
    B, T, NUM_MEL, EMB = 2, 128, 64, 32
    key = jax.random.PRNGKey(0)
    key, pkey, xkey = jax.random.split(key, 3)
    params = init_params(pkey, NUM_MEL, EMB)
    inputs = jax.random.normal(xkey, (B, T, NUM_MEL), dtype=jnp.float32)

    fwd = jax.jit(reference_encoder_forward, static_argnums=2)
    out = jax.block_until_ready(fwd(inputs, params, NUM_MEL))
    assert out.shape == (B, EMB), out.shape
    assert bool(jnp.all(jnp.isfinite(out)))
    print("KERNEL_OK")
</pallas_src>

<mosaic_0001>
module attributes {stable_mosaic.version = 11 : i64} {
  func.func @kernel(%arg0: i32, %arg1: memref<256x9xbf16, #tpu.memory_space<vmem>>, %arg2: memref<9x32xbf16, #tpu.memory_space<vmem>>, %arg3: memref<1x32xf32, #tpu.memory_space<vmem>>, %arg4: memref<1x32xf32, #tpu.memory_space<vmem>>, %arg5: memref<16x256x32xf32, #tpu.memory_space<vmem>>, %arg6: memref<2x32xf32, #tpu.memory_space<vmem>>) attributes {dimension_semantics = [#tpu.dimension_semantics<arbitrary>], iteration_bounds = array<i64: 16>, scalar_prefetch = 0 : i64, scratch_operands = 1 : i64, tpu.core_type = #tpu.core_type<tc>, window_params = [{transform_indices = @transform_0, window_bounds = array<i64: 256, 9>}, {pipeline_mode = #tpu.pipeline_mode<synchronous>, transform_indices = @transform_1, window_bounds = array<i64: 9, 32>}, {pipeline_mode = #tpu.pipeline_mode<synchronous>, transform_indices = @transform_2, window_bounds = array<i64: 1, 32>}, {pipeline_mode = #tpu.pipeline_mode<synchronous>, transform_indices = @transform_3, window_bounds = array<i64: 1, 32>}, {pipeline_mode = #tpu.pipeline_mode<synchronous>, transform_indices = @transform_4, window_bounds = array<i64: 16, 256, 32>}]} {
    %c0_i32 = arith.constant 0 : i32
    %0 = arith.cmpi eq, %arg0, %c0_i32 : i32
    %1 = arith.extui %0 : i1 to i32
    %c0_i32_0 = arith.constant 0 : i32
    %2 = arith.cmpi ne, %1, %c0_i32_0 : i32
    scf.if %2 {
      %cst_13 = arith.constant 0.000000e+00 : f32
      %22 = vector.broadcast %cst_13 : f32 to vector<2x32xf32>
      %c0_14 = arith.constant 0 : index
      %c0_15 = arith.constant 0 : index
      %23 = vector.load %arg6[%c0_14, %c0_15] : memref<2x32xf32, #tpu.memory_space<vmem>>, vector<2x32xf32>
      tpu.vector_store %arg6[%c0_14, %c0_15], %22 {strides = array<i32>} : memref<2x32xf32, #tpu.memory_space<vmem>>, vector<2x32xf32>,
    } else {
    }
    %c0 = arith.constant 0 : index
    %c0_1 = arith.constant 0 : index
    %3 = vector.load %arg1[%c0, %c0_1] : memref<256x9xbf16, #tpu.memory_space<vmem>>, vector<256x9xbf16>
    %c0_2 = arith.constant 0 : index
    %c0_3 = arith.constant 0 : index
    %4 = vector.load %arg2[%c0_2, %c0_3] : memref<9x32xbf16, #tpu.memory_space<vmem>>, vector<9x32xbf16>
    %cst = arith.constant dense<0.000000e+00> : vector<256x32xf32>
    %5 = tpu.matmul %3, %4, %cst {dimension_numbers = #tpu.dot_dimension_numbers<[1], [0], [0], [1], [0, 0, 1, 1], [], []>} : vector<256x9xbf16>, vector<9x32xbf16>, vector<256x32xf32> -> vector<256x32xf32>
    %6 = arith.index_cast %arg0 : i32 to index
    %c0_4 = arith.constant 0 : index
    %c0_5 = arith.constant 0 : index
    %7 = vector.load %arg5[%6, %c0_4, %c0_5] : memref<16x256x32xf32, #tpu.memory_space<vmem>>, vector<1x256x32xf32>
    %8 = vector.shape_cast %7 : vector<1x256x32xf32> to vector<256x32xf32>
    %9 = vector.shape_cast %5 : vector<256x32xf32> to vector<1x256x32xf32>
    tpu.vector_store %arg5[%6, %c0_4, %c0_5], %9 {strides = array<i32>} : memref<16x256x32xf32, #tpu.memory_space<vmem>>, vector<1x256x32xf32>,
    %cst_6 = arith.constant dense<0.000000e+00> : vector<32xf32>
    %10 = vector.multi_reduction <add>, %5, %cst_6 [0] : vector<256x32xf32> to vector<32xf32>
    %11 = vector.shape_cast %10 : vector<32xf32> to vector<1x32xf32>
    %12 = arith.mulf %5, %5 : vector<256x32xf32>
    %cst_7 = arith.constant dense<0.000000e+00> : vector<32xf32>
    %13 = vector.multi_reduction <add>, %12, %cst_7 [0] : vector<256x32xf32> to vector<32xf32>
    %14 = vector.shape_cast %13 : vector<32xf32> to vector<1x32xf32>
    %c0_8 = arith.constant 0 : index
    %c0_9 = arith.constant 0 : index
    %15 = vector.load %arg6[%c0_8, %c0_9] : memref<2x32xf32, #tpu.memory_space<vmem>>, vector<2x32xf32>
    %16 = tpu.concatenate %11, %14 in 0 : vector<1x32xf32>, vector<1x32xf32> -> vector<2x32xf32>
    %17 = arith.addf %15, %16 : vector<2x32xf32>
    %c0_10 = arith.constant 0 : index
    %c0_11 = arith.constant 0 : index
    %18 = vector.load %arg6[%c0_10, %c0_11] : memref<2x32xf32, #tpu.memory_space<vmem>>, vector<2x32xf32>
    tpu.vector_store %arg6[%c0_10, %c0_11], %17 {strides = array<i32>} : memref<2x32xf32, #tpu.memory_space<vmem>>, vector<2x32xf32>,
    %c15_i32 = arith.constant 15 : i32
    %19 = arith.cmpi eq, %arg0, %c15_i32 : i32
    %20 = arith.extui %19 : i1 to i32
    %c0_i32_12 = arith.constant 0 : i32
    %21 = arith.cmpi ne, %20, %c0_i32_12 : i32
    scf.if %21 {
      %c0_13 = arith.constant 0 : index
      %c0_14 = arith.constant 0 : index
      %22 = vector.load %arg6[%c0_13, %c0_14] : memref<2x32xf32, #tpu.memory_space<vmem>>, vector<1x32xf32>
      %cst_15 = arith.constant 2.44140625E-4 : f32
      %23 = vector.broadcast %cst_15 : f32 to vector<1x32xf32>
      %24 = arith.mulf %22, %23 : vector<1x32xf32>
      %c1 = arith.constant 1 : index
      %c0_16 = arith.constant 0 : index
      %25 = vector.load %arg6[%c1, %c0_16] : memref<2x32xf32, #tpu.memory_space<vmem>>, vector<1x32xf32>
      %cst_17 = arith.constant 2.44140625E-4 : f32
      %26 = vector.broadcast %cst_17 : f32 to vector<1x32xf32>
      %27 = arith.mulf %25, %26 : vector<1x32xf32>
      %28 = arith.mulf %24, %24 : vector<1x32xf32>
      %29 = arith.subf %27, %28 : vector<1x32xf32>
      %cst_18 = arith.constant 0.000000e+00 : f32
      %30 = vector.broadcast %cst_18 : f32 to vector<1x32xf32>
      %31 = arith.maximumf %29, %30 : vector<1x32xf32>
      %cst_19 = arith.constant 9.99999974E-6 : f32
      %32 = vector.broadcast %cst_19 : f32 to vector<1x32xf32>
      %33 = arith.addf %31, %32 : vector<1x32xf32>
      %34 = math.rsqrt %33 : vector<1x32xf32>
      %c0_20 = arith.constant 0 : index
      %c0_21 = arith.constant 0 : index
      %35 = vector.load %arg3[%c0_20, %c0_21] : memref<1x32xf32, #tpu.memory_space<vmem>>, vector<1x32xf32>
      %36 = arith.mulf %34, %35 : vector<1x32xf32>
      %c0_22 = arith.constant 0 : index
      %c0_23 = arith.constant 0 : index
      %37 = vector.load %arg4[%c0_22, %c0_23] : memref<1x32xf32, #tpu.memory_space<vmem>>, vector<1x32xf32>
      %38 = arith.mulf %24, %36 : vector<1x32xf32>
      %39 = arith.subf %37, %38 : vector<1x32xf32>
      %c0_i32_24 = arith.constant 0 : i32
      %c16_i32 = arith.constant 16 : i32
      %40 = arith.addi %c0_i32_24, %c16_i32 : i32
      %c1_i32 = arith.constant 1 : i32
      scf.for %arg7 = %c0_i32_24 to %40 step %c1_i32  : i32 {
        %c1_i32_26 = arith.constant 1 : i32
        %41 = arith.muli %arg7, %c1_i32_26 : i32
        %c0_i32_27 = arith.constant 0 : i32
        %42 = arith.addi %c0_i32_27, %41 : i32
        %43 = arith.index_cast %42 : i32 to index
        %c0_28 = arith.constant 0 : index
        %c0_29 = arith.constant 0 : index
        %44 = vector.load %arg5[%43, %c0_28, %c0_29] : memref<16x256x32xf32, #tpu.memory_space<vmem>>, vector<1x256x32xf32>
        %45 = vector.shape_cast %44 : vector<1x256x32xf32> to vector<256x32xf32>
        %46 = vector.broadcast %36 : vector<1x32xf32> to vector<256x32xf32>
        %47 = arith.mulf %45, %46 : vector<256x32xf32>
        %48 = vector.broadcast %39 : vector<1x32xf32> to vector<256x32xf32>
        %49 = arith.addf %47, %48 : vector<256x32xf32>
        %cst_30 = arith.constant 0.000000e+00 : f32
        %50 = vector.broadcast %cst_30 : f32 to vector<256x32xf32>
        %51 = arith.maximumf %49, %50 : vector<256x32xf32>
        %52 = arith.index_cast %42 : i32 to index
        %c0_31 = arith.constant 0 : index
        %c0_32 = arith.constant 0 : index
        %53 = vector.load %arg5[%52, %c0_31, %c0_32] : memref<16x256x32xf32, #tpu.memory_space<vmem>>, vector<1x256x32xf32>
        %54 = vector.shape_cast %53 : vector<1x256x32xf32> to vector<256x32xf32>
        %55 = vector.shape_cast %51 : vector<256x32xf32> to vector<1x256x32xf32>
        tpu.vector_store %arg5[%52, %c0_31, %c0_32], %55 {strides = array<i32>} : memref<16x256x32xf32, #tpu.memory_space<vmem>>, vector<1x256x32xf32>,
      }
      %c16_i32_25 = arith.constant 16 : i32
    } else {
    }
    return
  }
  func.func @transform_0(%arg0: i32) -> (i32, i32) {
    %c0_i32 = arith.constant 0 : i32
    %c0_i32_0 = arith.constant 0 : i32
    return %arg0, %c0_i32 : i32, i32
  }
  func.func @transform_1(%arg0: i32) -> (i32, i32) {
    %c0_i32 = arith.constant 0 : i32
    %c0_i32_0 = arith.constant 0 : i32
    %c0_i32_1 = arith.constant 0 : i32
    return %c0_i32, %c0_i32_0 : i32, i32
  }
  func.func @transform_2(%arg0: i32) -> (i32, i32) {
    %c0_i32 = arith.constant 0 : i32
    %c0_i32_0 = arith.constant 0 : i32
    %c0_i32_1 = arith.constant 0 : i32
    return %c0_i32, %c0_i32_0 : i32, i32
  }
  func.func @transform_3(%arg0: i32) -> (i32, i32) {
    %c0_i32 = arith.constant 0 : i32
    %c0_i32_0 = arith.constant 0 : i32
    %c0_i32_1 = arith.constant 0 : i32
    return %c0_i32, %c0_i32_0 : i32, i32
  }
  func.func @transform_4(%arg0: i32) -> (i32, i32, i32) {
    %c0_i32 = arith.constant 0 : i32
    %c0_i32_0 = arith.constant 0 : i32
    %c0_i32_1 = arith.constant 0 : i32
    %c0_i32_2 = arith.constant 0 : i32
    return %c0_i32, %c0_i32_0, %c0_i32_1 : i32, i32, i32
  }
}

module attributes {stable_mosaic.version = 11 : i64} {
  func.func @kernel(%arg0: i32, %arg1: memref<256x288xbf16, #tpu.memory_space<vmem>>, %arg2: memref<288x32xbf16, #tpu.memory_space<vmem>>, %arg3: memref<1x32xf32, #tpu.memory_space<vmem>>, %arg4: memref<1x32xf32, #tpu.memory_space<vmem>>, %arg5: memref<4x256x32xf32, #tpu.memory_space<vmem>>, %arg6: memref<2x32xf32, #tpu.memory_space<vmem>>) attributes {dimension_semantics = [#tpu.dimension_semantics<arbitrary>], iteration_bounds = array<i64: 4>, scalar_prefetch = 0 : i64, scratch_operands = 1 : i64, tpu.core_type = #tpu.core_type<tc>, window_params = [{transform_indices = @transform_0, window_bounds = array<i64: 256, 288>}, {pipeline_mode = #tpu.pipeline_mode<synchronous>, transform_indices = @transform_1, window_bounds = array<i64: 288, 32>}, {pipeline_mode = #tpu.pipeline_mode<synchronous>, transform_indices = @transform_2, window_bounds = array<i64: 1, 32>}, {pipeline_mode = #tpu.pipeline_mode<synchronous>, transform_indices = @transform_3, window_bounds = array<i64: 1, 32>}, {pipeline_mode = #tpu.pipeline_mode<synchronous>, transform_indices = @transform_4, window_bounds = array<i64: 4, 256, 32>}]} {
    %c0_i32 = arith.constant 0 : i32
    %0 = arith.cmpi eq, %arg0, %c0_i32 : i32
    %1 = arith.extui %0 : i1 to i32
    %c0_i32_0 = arith.constant 0 : i32
    %2 = arith.cmpi ne, %1, %c0_i32_0 : i32
    scf.if %2 {
      %cst_13 = arith.constant 0.000000e+00 : f32
      %22 = vector.broadcast %cst_13 : f32 to vector<2x32xf32>
      %c0_14 = arith.constant 0 : index
      %c0_15 = arith.constant 0 : index
      %23 = vector.load %arg6[%c0_14, %c0_15] : memref<2x32xf32, #tpu.memory_space<vmem>>, vector<2x32xf32>
      tpu.vector_store %arg6[%c0_14, %c0_15], %22 {strides = array<i32>} : memref<2x32xf32, #tpu.memory_space<vmem>>, vector<2x32xf32>,
    } else {
    }
    %c0 = arith.constant 0 : index
    %c0_1 = arith.constant 0 : index
    %3 = vector.load %arg1[%c0, %c0_1] : memref<256x288xbf16, #tpu.memory_space<vmem>>, vector<256x288xbf16>
    %c0_2 = arith.constant 0 : index
    %c0_3 = arith.constant 0 : index
    %4 = vector.load %arg2[%c0_2, %c0_3] : memref<288x32xbf16, #tpu.memory_space<vmem>>, vector<288x32xbf16>
    %cst = arith.constant dense<0.000000e+00> : vector<256x32xf32>
    %5 = tpu.matmul %3, %4, %cst {dimension_numbers = #tpu.dot_dimension_numbers<[1], [0], [0], [1], [0, 0, 1, 1], [], []>} : vector<256x288xbf16>, vector<288x32xbf16>, vector<256x32xf32> -> vector<256x32xf32>
    %6 = arith.index_cast %arg0 : i32 to index
    %c0_4 = arith.constant 0 : index
    %c0_5 = arith.constant 0 : index
    %7 = vector.load %arg5[%6, %c0_4, %c0_5] : memref<4x256x32xf32, #tpu.memory_space<vmem>>, vector<1x256x32xf32>
    %8 = vector.shape_cast %7 : vector<1x256x32xf32> to vector<256x32xf32>
    %9 = vector.shape_cast %5 : vector<256x32xf32> to vector<1x256x32xf32>
    tpu.vector_store %arg5[%6, %c0_4, %c0_5], %9 {strides = array<i32>} : memref<4x256x32xf32, #tpu.memory_space<vmem>>, vector<1x256x32xf32>,
    %cst_6 = arith.constant dense<0.000000e+00> : vector<32xf32>
    %10 = vector.multi_reduction <add>, %5, %cst_6 [0] : vector<256x32xf32> to vector<32xf32>
    %11 = vector.shape_cast %10 : vector<32xf32> to vector<1x32xf32>
    %12 = arith.mulf %5, %5 : vector<256x32xf32>
    %cst_7 = arith.constant dense<0.000000e+00> : vector<32xf32>
    %13 = vector.multi_reduction <add>, %12, %cst_7 [0] : vector<256x32xf32> to vector<32xf32>
    %14 = vector.shape_cast %13 : vector<32xf32> to vector<1x32xf32>
    %c0_8 = arith.constant 0 : index
    %c0_9 = arith.constant 0 : index
    %15 = vector.load %arg6[%c0_8, %c0_9] : memref<2x32xf32, #tpu.memory_space<vmem>>, vector<2x32xf32>
    %16 = tpu.concatenate %11, %14 in 0 : vector<1x32xf32>, vector<1x32xf32> -> vector<2x32xf32>
    %17 = arith.addf %15, %16 : vector<2x32xf32>
    %c0_10 = arith.constant 0 : index
    %c0_11 = arith.constant 0 : index
    %18 = vector.load %arg6[%c0_10, %c0_11] : memref<2x32xf32, #tpu.memory_space<vmem>>, vector<2x32xf32>
    tpu.vector_store %arg6[%c0_10, %c0_11], %17 {strides = array<i32>} : memref<2x32xf32, #tpu.memory_space<vmem>>, vector<2x32xf32>,
    %c3_i32 = arith.constant 3 : i32
    %19 = arith.cmpi eq, %arg0, %c3_i32 : i32
    %20 = arith.extui %19 : i1 to i32
    %c0_i32_12 = arith.constant 0 : i32
    %21 = arith.cmpi ne, %20, %c0_i32_12 : i32
    scf.if %21 {
      %c0_13 = arith.constant 0 : index
      %c0_14 = arith.constant 0 : index
      %22 = vector.load %arg6[%c0_13, %c0_14] : memref<2x32xf32, #tpu.memory_space<vmem>>, vector<1x32xf32>
      %cst_15 = arith.constant 9.765625E-4 : f32
      %23 = vector.broadcast %cst_15 : f32 to vector<1x32xf32>
      %24 = arith.mulf %22, %23 : vector<1x32xf32>
      %c1 = arith.constant 1 : index
      %c0_16 = arith.constant 0 : index
      %25 = vector.load %arg6[%c1, %c0_16] : memref<2x32xf32, #tpu.memory_space<vmem>>, vector<1x32xf32>
      %cst_17 = arith.constant 9.765625E-4 : f32
      %26 = vector.broadcast %cst_17 : f32 to vector<1x32xf32>
      %27 = arith.mulf %25, %26 : vector<1x32xf32>
      %28 = arith.mulf %24, %24 : vector<1x32xf32>
      %29 = arith.subf %27, %28 : vector<1x32xf32>
      %cst_18 = arith.constant 0.000000e+00 : f32
      %30 = vector.broadcast %cst_18 : f32 to vector<1x32xf32>
      %31 = arith.maximumf %29, %30 : vector<1x32xf32>
      %cst_19 = arith.constant 9.99999974E-6 : f32
      %32 = vector.broadcast %cst_19 : f32 to vector<1x32xf32>
      %33 = arith.addf %31, %32 : vector<1x32xf32>
      %34 = math.rsqrt %33 : vector<1x32xf32>
      %c0_20 = arith.constant 0 : index
      %c0_21 = arith.constant 0 : index
      %35 = vector.load %arg3[%c0_20, %c0_21] : memref<1x32xf32, #tpu.memory_space<vmem>>, vector<1x32xf32>
      %36 = arith.mulf %34, %35 : vector<1x32xf32>
      %c0_22 = arith.constant 0 : index
      %c0_23 = arith.constant 0 : index
      %37 = vector.load %arg4[%c0_22, %c0_23] : memref<1x32xf32, #tpu.memory_space<vmem>>, vector<1x32xf32>
      %38 = arith.mulf %24, %36 : vector<1x32xf32>
      %39 = arith.subf %37, %38 : vector<1x32xf32>
      %c0_i32_24 = arith.constant 0 : i32
      %c4_i32 = arith.constant 4 : i32
      %40 = arith.addi %c0_i32_24, %c4_i32 : i32
      %c1_i32 = arith.constant 1 : i32
      scf.for %arg7 = %c0_i32_24 to %40 step %c1_i32  : i32 {
        %c1_i32_26 = arith.constant 1 : i32
        %41 = arith.muli %arg7, %c1_i32_26 : i32
        %c0_i32_27 = arith.constant 0 : i32
        %42 = arith.addi %c0_i32_27, %41 : i32
        %43 = arith.index_cast %42 : i32 to index
        %c0_28 = arith.constant 0 : index
        %c0_29 = arith.constant 0 : index
        %44 = vector.load %arg5[%43, %c0_28, %c0_29] : memref<4x256x32xf32, #tpu.memory_space<vmem>>, vector<1x256x32xf32>
        %45 = vector.shape_cast %44 : vector<1x256x32xf32> to vector<256x32xf32>
        %46 = vector.broadcast %36 : vector<1x32xf32> to vector<256x32xf32>
        %47 = arith.mulf %45, %46 : vector<256x32xf32>
        %48 = vector.broadcast %39 : vector<1x32xf32> to vector<256x32xf32>
        %49 = arith.addf %47, %48 : vector<256x32xf32>
        %cst_30 = arith.constant 0.000000e+00 : f32
        %50 = vector.broadcast %cst_30 : f32 to vector<256x32xf32>
        %51 = arith.maximumf %49, %50 : vector<256x32xf32>
        %52 = arith.index_cast %42 : i32 to index
        %c0_31 = arith.constant 0 : index
        %c0_32 = arith.constant 0 : index
        %53 = vector.load %arg5[%52, %c0_31, %c0_32] : memref<4x256x32xf32, #tpu.memory_space<vmem>>, vector<1x256x32xf32>
        %54 = vector.shape_cast %53 : vector<1x256x32xf32> to vector<256x32xf32>
        %55 = vector.shape_cast %51 : vector<256x32xf32> to vector<1x256x32xf32>
        tpu.vector_store %arg5[%52, %c0_31, %c0_32], %55 {strides = array<i32>} : memref<4x256x32xf32, #tpu.memory_space<vmem>>, vector<1x256x32xf32>,
      }
      %c4_i32_25 = arith.constant 4 : i32
    } else {
    }
    return
  }
  func.func @transform_0(%arg0: i32) -> (i32, i32) {
    %c0_i32 = arith.constant 0 : i32
    %c0_i32_0 = arith.constant 0 : i32
    return %arg0, %c0_i32 : i32, i32
  }
  func.func @transform_1(%arg0: i32) -> (i32, i32) {
    %c0_i32 = arith.constant 0 : i32
    %c0_i32_0 = arith.constant 0 : i32
    %c0_i32_1 = arith.constant 0 : i32
    return %c0_i32, %c0_i32_0 : i32, i32
  }
  func.func @transform_2(%arg0: i32) -> (i32, i32) {
    %c0_i32 = arith.constant 0 : i32
    %c0_i32_0 = arith.constant 0 : i32
    %c0_i32_1 = arith.constant 0 : i32
    return %c0_i32, %c0_i32_0 : i32, i32
  }
  func.func @transform_3(%arg0: i32) -> (i32, i32) {
    %c0_i32 = arith.constant 0 : i32
    %c0_i32_0 = arith.constant 0 : i32
    %c0_i32_1 = arith.constant 0 : i32
    return %c0_i32, %c0_i32_0 : i32, i32
  }
  func.func @transform_4(%arg0: i32) -> (i32, i32, i32) {
    %c0_i32 = arith.constant 0 : i32
    %c0_i32_0 = arith.constant 0 : i32
    %c0_i32_1 = arith.constant 0 : i32
    %c0_i32_2 = arith.constant 0 : i32
    return %c0_i32, %c0_i32_0, %c0_i32_1 : i32, i32, i32
  }
}

module attributes {stable_mosaic.version = 11 : i64} {
  func.func @kernel(%arg0: i32, %arg1: memref<256x288xbf16, #tpu.memory_space<vmem>>, %arg2: memref<288x64xbf16, #tpu.memory_space<vmem>>, %arg3: memref<1x64xf32, #tpu.memory_space<vmem>>, %arg4: memref<1x64xf32, #tpu.memory_space<vmem>>, %arg5: memref<1x256x64xf32, #tpu.memory_space<vmem>>, %arg6: memref<2x64xf32, #tpu.memory_space<vmem>>) attributes {dimension_semantics = [#tpu.dimension_semantics<arbitrary>], iteration_bounds = array<i64: 1>, scalar_prefetch = 0 : i64, scratch_operands = 1 : i64, tpu.core_type = #tpu.core_type<tc>, window_params = [{transform_indices = @transform_0, window_bounds = array<i64: 256, 288>}, {pipeline_mode = #tpu.pipeline_mode<synchronous>, transform_indices = @transform_1, window_bounds = array<i64: 288, 64>}, {pipeline_mode = #tpu.pipeline_mode<synchronous>, transform_indices = @transform_2, window_bounds = array<i64: 1, 64>}, {pipeline_mode = #tpu.pipeline_mode<synchronous>, transform_indices = @transform_3, window_bounds = array<i64: 1, 64>}, {pipeline_mode = #tpu.pipeline_mode<synchronous>, transform_indices = @transform_4, window_bounds = array<i64: 1, 256, 64>}]} {
    %c0_i32 = arith.constant 0 : i32
    %0 = arith.cmpi eq, %arg0, %c0_i32 : i32
    %1 = arith.extui %0 : i1 to i32
    %c0_i32_0 = arith.constant 0 : i32
    %2 = arith.cmpi ne, %1, %c0_i32_0 : i32
    scf.if %2 {
      %cst_14 = arith.constant 0.000000e+00 : f32
      %22 = vector.broadcast %cst_14 : f32 to vector<2x64xf32>
      %c0_15 = arith.constant 0 : index
      %c0_16 = arith.constant 0 : index
      %23 = vector.load %arg6[%c0_15, %c0_16] : memref<2x64xf32, #tpu.memory_space<vmem>>, vector<2x64xf32>
      tpu.vector_store %arg6[%c0_15, %c0_16], %22 {strides = array<i32>} : memref<2x64xf32, #tpu.memory_space<vmem>>, vector<2x64xf32>,
    } else {
    }
    %c0 = arith.constant 0 : index
    %c0_1 = arith.constant 0 : index
    %3 = vector.load %arg1[%c0, %c0_1] : memref<256x288xbf16, #tpu.memory_space<vmem>>, vector<256x288xbf16>
    %c0_2 = arith.constant 0 : index
    %c0_3 = arith.constant 0 : index
    %4 = vector.load %arg2[%c0_2, %c0_3] : memref<288x64xbf16, #tpu.memory_space<vmem>>, vector<288x64xbf16>
    %cst = arith.constant dense<0.000000e+00> : vector<256x64xf32>
    %5 = tpu.matmul %3, %4, %cst {dimension_numbers = #tpu.dot_dimension_numbers<[1], [0], [0], [1], [0, 0, 1, 1], [], []>} : vector<256x288xbf16>, vector<288x64xbf16>, vector<256x64xf32> -> vector<256x64xf32>
    %6 = arith.index_cast %arg0 : i32 to index
    %c0_4 = arith.constant 0 : index
    %c0_5 = arith.constant 0 : index
    %7 = vector.load %arg5[%6, %c0_4, %c0_5] : memref<1x256x64xf32, #tpu.memory_space<vmem>>, vector<1x256x64xf32>
    %8 = vector.shape_cast %7 : vector<1x256x64xf32> to vector<256x64xf32>
    %9 = vector.shape_cast %5 : vector<256x64xf32> to vector<1x256x64xf32>
    tpu.vector_store %arg5[%6, %c0_4, %c0_5], %9 {strides = array<i32>} : memref<1x256x64xf32, #tpu.memory_space<vmem>>, vector<1x256x64xf32>,
    %cst_6 = arith.constant dense<0.000000e+00> : vector<64xf32>
    %10 = vector.multi_reduction <add>, %5, %cst_6 [0] : vector<256x64xf32> to vector<64xf32>
    %11 = vector.shape_cast %10 : vector<64xf32> to vector<1x64xf32>
    %12 = arith.mulf %5, %5 : vector<256x64xf32>
    %cst_7 = arith.constant dense<0.000000e+00> : vector<64xf32>
    %13 = vector.multi_reduction <add>, %12, %cst_7 [0] : vector<256x64xf32> to vector<64xf32>
    %14 = vector.shape_cast %13 : vector<64xf32> to vector<1x64xf32>
    %c0_8 = arith.constant 0 : index
    %c0_9 = arith.constant 0 : index
    %15 = vector.load %arg6[%c0_8, %c0_9] : memref<2x64xf32, #tpu.memory_space<vmem>>, vector<2x64xf32>
    %16 = tpu.concatenate %11, %14 in 0 : vector<1x64xf32>, vector<1x64xf32> -> vector<2x64xf32>
    %17 = arith.addf %15, %16 : vector<2x64xf32>
    %c0_10 = arith.constant 0 : index
    %c0_11 = arith.constant 0 : index
    %18 = vector.load %arg6[%c0_10, %c0_11] : memref<2x64xf32, #tpu.memory_space<vmem>>, vector<2x64xf32>
    tpu.vector_store %arg6[%c0_10, %c0_11], %17 {strides = array<i32>} : memref<2x64xf32, #tpu.memory_space<vmem>>, vector<2x64xf32>,
    %c0_i32_12 = arith.constant 0 : i32
    %19 = arith.cmpi eq, %arg0, %c0_i32_12 : i32
    %20 = arith.extui %19 : i1 to i32
    %c0_i32_13 = arith.constant 0 : i32
    %21 = arith.cmpi ne, %20, %c0_i32_13 : i32
    scf.if %21 {
      %c0_14 = arith.constant 0 : index
      %c0_15 = arith.constant 0 : index
      %22 = vector.load %arg6[%c0_14, %c0_15] : memref<2x64xf32, #tpu.memory_space<vmem>>, vector<1x64xf32>
      %cst_16 = arith.constant 3.906250e-03 : f32
      %23 = vector.broadcast %cst_16 : f32 to vector<1x64xf32>
      %24 = arith.mulf %22, %23 : vector<1x64xf32>
      %c1 = arith.constant 1 : index
      %c0_17 = arith.constant 0 : index
      %25 = vector.load %arg6[%c1, %c0_17] : memref<2x64xf32, #tpu.memory_space<vmem>>, vector<1x64xf32>
      %cst_18 = arith.constant 3.906250e-03 : f32
      %26 = vector.broadcast %cst_18 : f32 to vector<1x64xf32>
      %27 = arith.mulf %25, %26 : vector<1x64xf32>
      %28 = arith.mulf %24, %24 : vector<1x64xf32>
      %29 = arith.subf %27, %28 : vector<1x64xf32>
      %cst_19 = arith.constant 0.000000e+00 : f32
      %30 = vector.broadcast %cst_19 : f32 to vector<1x64xf32>
      %31 = arith.maximumf %29, %30 : vector<1x64xf32>
      %cst_20 = arith.constant 9.99999974E-6 : f32
      %32 = vector.broadcast %cst_20 : f32 to vector<1x64xf32>
      %33 = arith.addf %31, %32 : vector<1x64xf32>
      %34 = math.rsqrt %33 : vector<1x64xf32>
      %c0_21 = arith.constant 0 : index
      %c0_22 = arith.constant 0 : index
      %35 = vector.load %arg3[%c0_21, %c0_22] : memref<1x64xf32, #tpu.memory_space<vmem>>, vector<1x64xf32>
      %36 = arith.mulf %34, %35 : vector<1x64xf32>
      %c0_23 = arith.constant 0 : index
      %c0_24 = arith.constant 0 : index
      %37 = vector.load %arg4[%c0_23, %c0_24] : memref<1x64xf32, #tpu.memory_space<vmem>>, vector<1x64xf32>
      %38 = arith.mulf %24, %36 : vector<1x64xf32>
      %39 = arith.subf %37, %38 : vector<1x64xf32>
      %c0_i32_25 = arith.constant 0 : i32
      %c1_i32 = arith.constant 1 : i32
      %40 = arith.muli %c0_i32_25, %c1_i32 : i32
      %c0_i32_26 = arith.constant 0 : i32
      %41 = arith.addi %c0_i32_26, %40 : i32
      %42 = arith.index_cast %41 : i32 to index
      %c0_27 = arith.constant 0 : index
      %c0_28 = arith.constant 0 : index
      %43 = vector.load %arg5[%42, %c0_27, %c0_28] : memref<1x256x64xf32, #tpu.memory_space<vmem>>, vector<1x256x64xf32>
      %44 = vector.shape_cast %43 : vector<1x256x64xf32> to vector<256x64xf32>
      %45 = vector.broadcast %36 : vector<1x64xf32> to vector<256x64xf32>
      %46 = arith.mulf %44, %45 : vector<256x64xf32>
      %47 = vector.broadcast %39 : vector<1x64xf32> to vector<256x64xf32>
      %48 = arith.addf %46, %47 : vector<256x64xf32>
      %cst_29 = arith.constant 0.000000e+00 : f32
      %49 = vector.broadcast %cst_29 : f32 to vector<256x64xf32>
      %50 = arith.maximumf %48, %49 : vector<256x64xf32>
      %51 = arith.index_cast %41 : i32 to index
      %c0_30 = arith.constant 0 : index
      %c0_31 = arith.constant 0 : index
      %52 = vector.load %arg5[%51, %c0_30, %c0_31] : memref<1x256x64xf32, #tpu.memory_space<vmem>>, vector<1x256x64xf32>
      %53 = vector.shape_cast %52 : vector<1x256x64xf32> to vector<256x64xf32>
      %54 = vector.shape_cast %50 : vector<256x64xf32> to vector<1x256x64xf32>
      tpu.vector_store %arg5[%51, %c0_30, %c0_31], %54 {strides = array<i32>} : memref<1x256x64xf32, #tpu.memory_space<vmem>>, vector<1x256x64xf32>,
      %c1_i32_32 = arith.constant 1 : i32
    } else {
    }
    return
  }
  func.func @transform_0(%arg0: i32) -> (i32, i32) {
    %c0_i32 = arith.constant 0 : i32
    %c0_i32_0 = arith.constant 0 : i32
    return %arg0, %c0_i32 : i32, i32
  }
  func.func @transform_1(%arg0: i32) -> (i32, i32) {
    %c0_i32 = arith.constant 0 : i32
    %c0_i32_0 = arith.constant 0 : i32
    %c0_i32_1 = arith.constant 0 : i32
    return %c0_i32, %c0_i32_0 : i32, i32
  }
  func.func @transform_2(%arg0: i32) -> (i32, i32) {
    %c0_i32 = arith.constant 0 : i32
    %c0_i32_0 = arith.constant 0 : i32
    %c0_i32_1 = arith.constant 0 : i32
    return %c0_i32, %c0_i32_0 : i32, i32
  }
  func.func @transform_3(%arg0: i32) -> (i32, i32) {
    %c0_i32 = arith.constant 0 : i32
    %c0_i32_0 = arith.constant 0 : i32
    %c0_i32_1 = arith.constant 0 : i32
    return %c0_i32, %c0_i32_0 : i32, i32
  }
  func.func @transform_4(%arg0: i32) -> (i32, i32, i32) {
    %c0_i32 = arith.constant 0 : i32
    %c0_i32_0 = arith.constant 0 : i32
    %c0_i32_1 = arith.constant 0 : i32
    %c0_i32_2 = arith.constant 0 : i32
    return %c0_i32, %c0_i32_0, %c0_i32_1 : i32, i32, i32
  }
}

module attributes {stable_mosaic.version = 11 : i64} {
  func.func @kernel(%arg0: i32, %arg1: memref<64x576xbf16, #tpu.memory_space<vmem>>, %arg2: memref<576x64xbf16, #tpu.memory_space<vmem>>, %arg3: memref<1x64xf32, #tpu.memory_space<vmem>>, %arg4: memref<1x64xf32, #tpu.memory_space<vmem>>, %arg5: memref<1x64x64xf32, #tpu.memory_space<vmem>>, %arg6: memref<2x64xf32, #tpu.memory_space<vmem>>) attributes {dimension_semantics = [#tpu.dimension_semantics<arbitrary>], iteration_bounds = array<i64: 1>, scalar_prefetch = 0 : i64, scratch_operands = 1 : i64, tpu.core_type = #tpu.core_type<tc>, window_params = [{transform_indices = @transform_0, window_bounds = array<i64: 64, 576>}, {pipeline_mode = #tpu.pipeline_mode<synchronous>, transform_indices = @transform_1, window_bounds = array<i64: 576, 64>}, {pipeline_mode = #tpu.pipeline_mode<synchronous>, transform_indices = @transform_2, window_bounds = array<i64: 1, 64>}, {pipeline_mode = #tpu.pipeline_mode<synchronous>, transform_indices = @transform_3, window_bounds = array<i64: 1, 64>}, {pipeline_mode = #tpu.pipeline_mode<synchronous>, transform_indices = @transform_4, window_bounds = array<i64: 1, 64, 64>}]} {
    %c0_i32 = arith.constant 0 : i32
    %0 = arith.cmpi eq, %arg0, %c0_i32 : i32
    %1 = arith.extui %0 : i1 to i32
    %c0_i32_0 = arith.constant 0 : i32
    %2 = arith.cmpi ne, %1, %c0_i32_0 : i32
    scf.if %2 {
      %cst_14 = arith.constant 0.000000e+00 : f32
      %22 = vector.broadcast %cst_14 : f32 to vector<2x64xf32>
      %c0_15 = arith.constant 0 : index
      %c0_16 = arith.constant 0 : index
      %23 = vector.load %arg6[%c0_15, %c0_16] : memref<2x64xf32, #tpu.memory_space<vmem>>, vector<2x64xf32>
      tpu.vector_store %arg6[%c0_15, %c0_16], %22 {strides = array<i32>} : memref<2x64xf32, #tpu.memory_space<vmem>>, vector<2x64xf32>,
    } else {
    }
    %c0 = arith.constant 0 : index
    %c0_1 = arith.constant 0 : index
    %3 = vector.load %arg1[%c0, %c0_1] : memref<64x576xbf16, #tpu.memory_space<vmem>>, vector<64x576xbf16>
    %c0_2 = arith.constant 0 : index
    %c0_3 = arith.constant 0 : index
    %4 = vector.load %arg2[%c0_2, %c0_3] : memref<576x64xbf16, #tpu.memory_space<vmem>>, vector<576x64xbf16>
    %cst = arith.constant dense<0.000000e+00> : vector<64x64xf32>
    %5 = tpu.matmul %3, %4, %cst {dimension_numbers = #tpu.dot_dimension_numbers<[1], [0], [0], [1], [0, 0, 1, 1], [], []>} : vector<64x576xbf16>, vector<576x64xbf16>, vector<64x64xf32> -> vector<64x64xf32>
    %6 = arith.index_cast %arg0 : i32 to index
    %c0_4 = arith.constant 0 : index
    %c0_5 = arith.constant 0 : index
    %7 = vector.load %arg5[%6, %c0_4, %c0_5] : memref<1x64x64xf32, #tpu.memory_space<vmem>>, vector<1x64x64xf32>
    %8 = vector.shape_cast %7 : vector<1x64x64xf32> to vector<64x64xf32>
    %9 = vector.shape_cast %5 : vector<64x64xf32> to vector<1x64x64xf32>
    tpu.vector_store %arg5[%6, %c0_4, %c0_5], %9 {strides = array<i32>} : memref<1x64x64xf32, #tpu.memory_space<vmem>>, vector<1x64x64xf32>,
    %cst_6 = arith.constant dense<0.000000e+00> : vector<64xf32>
    %10 = vector.multi_reduction <add>, %5, %cst_6 [0] : vector<64x64xf32> to vector<64xf32>
    %11 = vector.shape_cast %10 : vector<64xf32> to vector<1x64xf32>
    %12 = arith.mulf %5, %5 : vector<64x64xf32>
    %cst_7 = arith.constant dense<0.000000e+00> : vector<64xf32>
    %13 = vector.multi_reduction <add>, %12, %cst_7 [0] : vector<64x64xf32> to vector<64xf32>
    %14 = vector.shape_cast %13 : vector<64xf32> to vector<1x64xf32>
    %c0_8 = arith.constant 0 : index
    %c0_9 = arith.constant 0 : index
    %15 = vector.load %arg6[%c0_8, %c0_9] : memref<2x64xf32, #tpu.memory_space<vmem>>, vector<2x64xf32>
    %16 = tpu.concatenate %11, %14 in 0 : vector<1x64xf32>, vector<1x64xf32> -> vector<2x64xf32>
    %17 = arith.addf %15, %16 : vector<2x64xf32>
    %c0_10 = arith.constant 0 : index
    %c0_11 = arith.constant 0 : index
    %18 = vector.load %arg6[%c0_10, %c0_11] : memref<2x64xf32, #tpu.memory_space<vmem>>, vector<2x64xf32>
    tpu.vector_store %arg6[%c0_10, %c0_11], %17 {strides = array<i32>} : memref<2x64xf32, #tpu.memory_space<vmem>>, vector<2x64xf32>,
    %c0_i32_12 = arith.constant 0 : i32
    %19 = arith.cmpi eq, %arg0, %c0_i32_12 : i32
    %20 = arith.extui %19 : i1 to i32
    %c0_i32_13 = arith.constant 0 : i32
    %21 = arith.cmpi ne, %20, %c0_i32_13 : i32
    scf.if %21 {
      %c0_14 = arith.constant 0 : index
      %c0_15 = arith.constant 0 : index
      %22 = vector.load %arg6[%c0_14, %c0_15] : memref<2x64xf32, #tpu.memory_space<vmem>>, vector<1x64xf32>
      %cst_16 = arith.constant 1.562500e-02 : f32
      %23 = vector.broadcast %cst_16 : f32 to vector<1x64xf32>
      %24 = arith.mulf %22, %23 : vector<1x64xf32>
      %c1 = arith.constant 1 : index
      %c0_17 = arith.constant 0 : index
      %25 = vector.load %arg6[%c1, %c0_17] : memref<2x64xf32, #tpu.memory_space<vmem>>, vector<1x64xf32>
      %cst_18 = arith.constant 1.562500e-02 : f32
      %26 = vector.broadcast %cst_18 : f32 to vector<1x64xf32>
      %27 = arith.mulf %25, %26 : vector<1x64xf32>
      %28 = arith.mulf %24, %24 : vector<1x64xf32>
      %29 = arith.subf %27, %28 : vector<1x64xf32>
      %cst_19 = arith.constant 0.000000e+00 : f32
      %30 = vector.broadcast %cst_19 : f32 to vector<1x64xf32>
      %31 = arith.maximumf %29, %30 : vector<1x64xf32>
      %cst_20 = arith.constant 9.99999974E-6 : f32
      %32 = vector.broadcast %cst_20 : f32 to vector<1x64xf32>
      %33 = arith.addf %31, %32 : vector<1x64xf32>
      %34 = math.rsqrt %33 : vector<1x64xf32>
      %c0_21 = arith.constant 0 : index
      %c0_22 = arith.constant 0 : index
      %35 = vector.load %arg3[%c0_21, %c0_22] : memref<1x64xf32, #tpu.memory_space<vmem>>, vector<1x64xf32>
      %36 = arith.mulf %34, %35 : vector<1x64xf32>
      %c0_23 = arith.constant 0 : index
      %c0_24 = arith.constant 0 : index
      %37 = vector.load %arg4[%c0_23, %c0_24] : memref<1x64xf32, #tpu.memory_space<vmem>>, vector<1x64xf32>
      %38 = arith.mulf %24, %36 : vector<1x64xf32>
      %39 = arith.subf %37, %38 : vector<1x64xf32>
      %c0_i32_25 = arith.constant 0 : i32
      %c1_i32 = arith.constant 1 : i32
      %40 = arith.muli %c0_i32_25, %c1_i32 : i32
      %c0_i32_26 = arith.constant 0 : i32
      %41 = arith.addi %c0_i32_26, %40 : i32
      %42 = arith.index_cast %41 : i32 to index
      %c0_27 = arith.constant 0 : index
      %c0_28 = arith.constant 0 : index
      %43 = vector.load %arg5[%42, %c0_27, %c0_28] : memref<1x64x64xf32, #tpu.memory_space<vmem>>, vector<1x64x64xf32>
      %44 = vector.shape_cast %43 : vector<1x64x64xf32> to vector<64x64xf32>
      %45 = vector.broadcast %36 : vector<1x64xf32> to vector<64x64xf32>
      %46 = arith.mulf %44, %45 : vector<64x64xf32>
      %47 = vector.broadcast %39 : vector<1x64xf32> to vector<64x64xf32>
      %48 = arith.addf %46, %47 : vector<64x64xf32>
      %cst_29 = arith.constant 0.000000e+00 : f32
      %49 = vector.broadcast %cst_29 : f32 to vector<64x64xf32>
      %50 = arith.maximumf %48, %49 : vector<64x64xf32>
      %51 = arith.index_cast %41 : i32 to index
      %c0_30 = arith.constant 0 : index
      %c0_31 = arith.constant 0 : index
      %52 = vector.load %arg5[%51, %c0_30, %c0_31] : memref<1x64x64xf32, #tpu.memory_space<vmem>>, vector<1x64x64xf32>
      %53 = vector.shape_cast %52 : vector<1x64x64xf32> to vector<64x64xf32>
      %54 = vector.shape_cast %50 : vector<64x64xf32> to vector<1x64x64xf32>
      tpu.vector_store %arg5[%51, %c0_30, %c0_31], %54 {strides = array<i32>} : memref<1x64x64xf32, #tpu.memory_space<vmem>>, vector<1x64x64xf32>,
      %c1_i32_32 = arith.constant 1 : i32
    } else {
    }
    return
  }
  func.func @transform_0(%arg0: i32) -> (i32, i32) {
    %c0_i32 = arith.constant 0 : i32
    %c0_i32_0 = arith.constant 0 : i32
    return %arg0, %c0_i32 : i32, i32
  }
  func.func @transform_1(%arg0: i32) -> (i32, i32) {
    %c0_i32 = arith.constant 0 : i32
    %c0_i32_0 = arith.constant 0 : i32
    %c0_i32_1 = arith.constant 0 : i32
    return %c0_i32, %c0_i32_0 : i32, i32
  }
  func.func @transform_2(%arg0: i32) -> (i32, i32) {
    %c0_i32 = arith.constant 0 : i32
    %c0_i32_0 = arith.constant 0 : i32
    %c0_i32_1 = arith.constant 0 : i32
    return %c0_i32, %c0_i32_0 : i32, i32
  }
  func.func @transform_3(%arg0: i32) -> (i32, i32) {
    %c0_i32 = arith.constant 0 : i32
    %c0_i32_0 = arith.constant 0 : i32
    %c0_i32_1 = arith.constant 0 : i32
    return %c0_i32, %c0_i32_0 : i32, i32
  }
  func.func @transform_4(%arg0: i32) -> (i32, i32, i32) {
    %c0_i32 = arith.constant 0 : i32
    %c0_i32_0 = arith.constant 0 : i32
    %c0_i32_1 = arith.constant 0 : i32
    %c0_i32_2 = arith.constant 0 : i32
    return %c0_i32, %c0_i32_0, %c0_i32_1 : i32, i32, i32
  }
}

module attributes {stable_mosaic.version = 11 : i64} {
  func.func @kernel(%arg0: i32, %arg1: memref<16x576xbf16, #tpu.memory_space<vmem>>, %arg2: memref<576x128xbf16, #tpu.memory_space<vmem>>, %arg3: memref<1x128xf32, #tpu.memory_space<vmem>>, %arg4: memref<1x128xf32, #tpu.memory_space<vmem>>, %arg5: memref<1x16x128xf32, #tpu.memory_space<vmem>>, %arg6: memref<2x128xf32, #tpu.memory_space<vmem>>) attributes {dimension_semantics = [#tpu.dimension_semantics<arbitrary>], iteration_bounds = array<i64: 1>, scalar_prefetch = 0 : i64, scratch_operands = 1 : i64, tpu.core_type = #tpu.core_type<tc>, window_params = [{transform_indices = @transform_0, window_bounds = array<i64: 16, 576>}, {pipeline_mode = #tpu.pipeline_mode<synchronous>, transform_indices = @transform_1, window_bounds = array<i64: 576, 128>}, {pipeline_mode = #tpu.pipeline_mode<synchronous>, transform_indices = @transform_2, window_bounds = array<i64: 1, 128>}, {pipeline_mode = #tpu.pipeline_mode<synchronous>, transform_indices = @transform_3, window_bounds = array<i64: 1, 128>}, {pipeline_mode = #tpu.pipeline_mode<synchronous>, transform_indices = @transform_4, window_bounds = array<i64: 1, 16, 128>}]} {
    %c0_i32 = arith.constant 0 : i32
    %0 = arith.cmpi eq, %arg0, %c0_i32 : i32
    %1 = arith.extui %0 : i1 to i32
    %c0_i32_0 = arith.constant 0 : i32
    %2 = arith.cmpi ne, %1, %c0_i32_0 : i32
    scf.if %2 {
      %cst_14 = arith.constant 0.000000e+00 : f32
      %22 = vector.broadcast %cst_14 : f32 to vector<2x128xf32>
      %c0_15 = arith.constant 0 : index
      %c0_16 = arith.constant 0 : index
      %23 = vector.load %arg6[%c0_15, %c0_16] : memref<2x128xf32, #tpu.memory_space<vmem>>, vector<2x128xf32>
      tpu.vector_store %arg6[%c0_15, %c0_16], %22 {strides = array<i32>} : memref<2x128xf32, #tpu.memory_space<vmem>>, vector<2x128xf32>,
    } else {
    }
    %c0 = arith.constant 0 : index
    %c0_1 = arith.constant 0 : index
    %3 = vector.load %arg1[%c0, %c0_1] : memref<16x576xbf16, #tpu.memory_space<vmem>>, vector<16x576xbf16>
    %c0_2 = arith.constant 0 : index
    %c0_3 = arith.constant 0 : index
    %4 = vector.load %arg2[%c0_2, %c0_3] : memref<576x128xbf16, #tpu.memory_space<vmem>>, vector<576x128xbf16>
    %cst = arith.constant dense<0.000000e+00> : vector<16x128xf32>
    %5 = tpu.matmul %3, %4, %cst {dimension_numbers = #tpu.dot_dimension_numbers<[1], [0], [0], [1], [0, 0, 1, 1], [], []>} : vector<16x576xbf16>, vector<576x128xbf16>, vector<16x128xf32> -> vector<16x128xf32>
    %6 = arith.index_cast %arg0 : i32 to index
    %c0_4 = arith.constant 0 : index
    %c0_5 = arith.constant 0 : index
    %7 = vector.load %arg5[%6, %c0_4, %c0_5] : memref<1x16x128xf32, #tpu.memory_space<vmem>>, vector<1x16x128xf32>
    %8 = vector.shape_cast %7 : vector<1x16x128xf32> to vector<16x128xf32>
    %9 = vector.shape_cast %5 : vector<16x128xf32> to vector<1x16x128xf32>
    tpu.vector_store %arg5[%6, %c0_4, %c0_5], %9 {strides = array<i32>} : memref<1x16x128xf32, #tpu.memory_space<vmem>>, vector<1x16x128xf32>,
    %cst_6 = arith.constant dense<0.000000e+00> : vector<128xf32>
    %10 = vector.multi_reduction <add>, %5, %cst_6 [0] : vector<16x128xf32> to vector<128xf32>
    %11 = vector.shape_cast %10 : vector<128xf32> to vector<1x128xf32>
    %12 = arith.mulf %5, %5 : vector<16x128xf32>
    %cst_7 = arith.constant dense<0.000000e+00> : vector<128xf32>
    %13 = vector.multi_reduction <add>, %12, %cst_7 [0] : vector<16x128xf32> to vector<128xf32>
    %14 = vector.shape_cast %13 : vector<128xf32> to vector<1x128xf32>
    %c0_8 = arith.constant 0 : index
    %c0_9 = arith.constant 0 : index
    %15 = vector.load %arg6[%c0_8, %c0_9] : memref<2x128xf32, #tpu.memory_space<vmem>>, vector<2x128xf32>
    %16 = tpu.concatenate %11, %14 in 0 : vector<1x128xf32>, vector<1x128xf32> -> vector<2x128xf32>
    %17 = arith.addf %15, %16 : vector<2x128xf32>
    %c0_10 = arith.constant 0 : index
    %c0_11 = arith.constant 0 : index
    %18 = vector.load %arg6[%c0_10, %c0_11] : memref<2x128xf32, #tpu.memory_space<vmem>>, vector<2x128xf32>
    tpu.vector_store %arg6[%c0_10, %c0_11], %17 {strides = array<i32>} : memref<2x128xf32, #tpu.memory_space<vmem>>, vector<2x128xf32>,
    %c0_i32_12 = arith.constant 0 : i32
    %19 = arith.cmpi eq, %arg0, %c0_i32_12 : i32
    %20 = arith.extui %19 : i1 to i32
    %c0_i32_13 = arith.constant 0 : i32
    %21 = arith.cmpi ne, %20, %c0_i32_13 : i32
    scf.if %21 {
      %c0_14 = arith.constant 0 : index
      %c0_15 = arith.constant 0 : index
      %22 = vector.load %arg6[%c0_14, %c0_15] : memref<2x128xf32, #tpu.memory_space<vmem>>, vector<1x128xf32>
      %cst_16 = arith.constant 6.250000e-02 : f32
      %23 = vector.broadcast %cst_16 : f32 to vector<1x128xf32>
      %24 = arith.mulf %22, %23 : vector<1x128xf32>
      %c1 = arith.constant 1 : index
      %c0_17 = arith.constant 0 : index
      %25 = vector.load %arg6[%c1, %c0_17] : memref<2x128xf32, #tpu.memory_space<vmem>>, vector<1x128xf32>
      %cst_18 = arith.constant 6.250000e-02 : f32
      %26 = vector.broadcast %cst_18 : f32 to vector<1x128xf32>
      %27 = arith.mulf %25, %26 : vector<1x128xf32>
      %28 = arith.mulf %24, %24 : vector<1x128xf32>
      %29 = arith.subf %27, %28 : vector<1x128xf32>
      %cst_19 = arith.constant 0.000000e+00 : f32
      %30 = vector.broadcast %cst_19 : f32 to vector<1x128xf32>
      %31 = arith.maximumf %29, %30 : vector<1x128xf32>
      %cst_20 = arith.constant 9.99999974E-6 : f32
      %32 = vector.broadcast %cst_20 : f32 to vector<1x128xf32>
      %33 = arith.addf %31, %32 : vector<1x128xf32>
      %34 = math.rsqrt %33 : vector<1x128xf32>
      %c0_21 = arith.constant 0 : index
      %c0_22 = arith.constant 0 : index
      %35 = vector.load %arg3[%c0_21, %c0_22] : memref<1x128xf32, #tpu.memory_space<vmem>>, vector<1x128xf32>
      %36 = arith.mulf %34, %35 : vector<1x128xf32>
      %c0_23 = arith.constant 0 : index
      %c0_24 = arith.constant 0 : index
      %37 = vector.load %arg4[%c0_23, %c0_24] : memref<1x128xf32, #tpu.memory_space<vmem>>, vector<1x128xf32>
      %38 = arith.mulf %24, %36 : vector<1x128xf32>
      %39 = arith.subf %37, %38 : vector<1x128xf32>
      %c0_i32_25 = arith.constant 0 : i32
      %c1_i32 = arith.constant 1 : i32
      %40 = arith.muli %c0_i32_25, %c1_i32 : i32
      %c0_i32_26 = arith.constant 0 : i32
      %41 = arith.addi %c0_i32_26, %40 : i32
      %42 = arith.index_cast %41 : i32 to index
      %c0_27 = arith.constant 0 : index
      %c0_28 = arith.constant 0 : index
      %43 = vector.load %arg5[%42, %c0_27, %c0_28] : memref<1x16x128xf32, #tpu.memory_space<vmem>>, vector<1x16x128xf32>
      %44 = vector.shape_cast %43 : vector<1x16x128xf32> to vector<16x128xf32>
      %45 = vector.broadcast %36 : vector<1x128xf32> to vector<16x128xf32>
      %46 = arith.mulf %44, %45 : vector<16x128xf32>
      %47 = vector.broadcast %39 : vector<1x128xf32> to vector<16x128xf32>
      %48 = arith.addf %46, %47 : vector<16x128xf32>
      %cst_29 = arith.constant 0.000000e+00 : f32
      %49 = vector.broadcast %cst_29 : f32 to vector<16x128xf32>
      %50 = arith.maximumf %48, %49 : vector<16x128xf32>
      %51 = arith.index_cast %41 : i32 to index
      %c0_30 = arith.constant 0 : index
      %c0_31 = arith.constant 0 : index
      %52 = vector.load %arg5[%51, %c0_30, %c0_31] : memref<1x16x128xf32, #tpu.memory_space<vmem>>, vector<1x16x128xf32>
      %53 = vector.shape_cast %52 : vector<1x16x128xf32> to vector<16x128xf32>
      %54 = vector.shape_cast %50 : vector<16x128xf32> to vector<1x16x128xf32>
      tpu.vector_store %arg5[%51, %c0_30, %c0_31], %54 {strides = array<i32>} : memref<1x16x128xf32, #tpu.memory_space<vmem>>, vector<1x16x128xf32>,
      %c1_i32_32 = arith.constant 1 : i32
    } else {
    }
    return
  }
  func.func @transform_0(%arg0: i32) -> (i32, i32) {
    %c0_i32 = arith.constant 0 : i32
    %c0_i32_0 = arith.constant 0 : i32
    return %arg0, %c0_i32 : i32, i32
  }
  func.func @transform_1(%arg0: i32) -> (i32, i32) {
    %c0_i32 = arith.constant 0 : i32
    %c0_i32_0 = arith.constant 0 : i32
    %c0_i32_1 = arith.constant 0 : i32
    return %c0_i32, %c0_i32_0 : i32, i32
  }
  func.func @transform_2(%arg0: i32) -> (i32, i32) {
    %c0_i32 = arith.constant 0 : i32
    %c0_i32_0 = arith.constant 0 : i32
    %c0_i32_1 = arith.constant 0 : i32
    return %c0_i32, %c0_i32_0 : i32, i32
  }
  func.func @transform_3(%arg0: i32) -> (i32, i32) {
    %c0_i32 = arith.constant 0 : i32
    %c0_i32_0 = arith.constant 0 : i32
    %c0_i32_1 = arith.constant 0 : i32
    return %c0_i32, %c0_i32_0 : i32, i32
  }
  func.func @transform_4(%arg0: i32) -> (i32, i32, i32) {
    %c0_i32 = arith.constant 0 : i32
    %c0_i32_0 = arith.constant 0 : i32
    %c0_i32_1 = arith.constant 0 : i32
    %c0_i32_2 = arith.constant 0 : i32
    return %c0_i32, %c0_i32_0, %c0_i32_1 : i32, i32, i32
  }
}

module attributes {stable_mosaic.version = 11 : i64} {
  func.func @kernel(%arg0: i32, %arg1: memref<4x1152xbf16, #tpu.memory_space<vmem>>, %arg2: memref<1152x128xbf16, #tpu.memory_space<vmem>>, %arg3: memref<1x128xf32, #tpu.memory_space<vmem>>, %arg4: memref<1x128xf32, #tpu.memory_space<vmem>>, %arg5: memref<1x4x128xf32, #tpu.memory_space<vmem>>, %arg6: memref<2x128xf32, #tpu.memory_space<vmem>>) attributes {dimension_semantics = [#tpu.dimension_semantics<arbitrary>], iteration_bounds = array<i64: 1>, scalar_prefetch = 0 : i64, scratch_operands = 1 : i64, tpu.core_type = #tpu.core_type<tc>, window_params = [{transform_indices = @transform_0, window_bounds = array<i64: 4, 1152>}, {pipeline_mode = #tpu.pipeline_mode<synchronous>, transform_indices = @transform_1, window_bounds = array<i64: 1152, 128>}, {pipeline_mode = #tpu.pipeline_mode<synchronous>, transform_indices = @transform_2, window_bounds = array<i64: 1, 128>}, {pipeline_mode = #tpu.pipeline_mode<synchronous>, transform_indices = @transform_3, window_bounds = array<i64: 1, 128>}, {pipeline_mode = #tpu.pipeline_mode<synchronous>, transform_indices = @transform_4, window_bounds = array<i64: 1, 4, 128>}]} {
    %c0_i32 = arith.constant 0 : i32
    %0 = arith.cmpi eq, %arg0, %c0_i32 : i32
    %1 = arith.extui %0 : i1 to i32
    %c0_i32_0 = arith.constant 0 : i32
    %2 = arith.cmpi ne, %1, %c0_i32_0 : i32
    scf.if %2 {
      %cst_14 = arith.constant 0.000000e+00 : f32
      %22 = vector.broadcast %cst_14 : f32 to vector<2x128xf32>
      %c0_15 = arith.constant 0 : index
      %c0_16 = arith.constant 0 : index
      %23 = vector.load %arg6[%c0_15, %c0_16] : memref<2x128xf32, #tpu.memory_space<vmem>>, vector<2x128xf32>
      tpu.vector_store %arg6[%c0_15, %c0_16], %22 {strides = array<i32>} : memref<2x128xf32, #tpu.memory_space<vmem>>, vector<2x128xf32>,
    } else {
    }
    %c0 = arith.constant 0 : index
    %c0_1 = arith.constant 0 : index
    %3 = vector.load %arg1[%c0, %c0_1] : memref<4x1152xbf16, #tpu.memory_space<vmem>>, vector<4x1152xbf16>
    %c0_2 = arith.constant 0 : index
    %c0_3 = arith.constant 0 : index
    %4 = vector.load %arg2[%c0_2, %c0_3] : memref<1152x128xbf16, #tpu.memory_space<vmem>>, vector<1152x128xbf16>
    %cst = arith.constant dense<0.000000e+00> : vector<4x128xf32>
    %5 = tpu.matmul %3, %4, %cst {dimension_numbers = #tpu.dot_dimension_numbers<[1], [0], [0], [1], [0, 0, 1, 1], [], []>} : vector<4x1152xbf16>, vector<1152x128xbf16>, vector<4x128xf32> -> vector<4x128xf32>
    %6 = arith.index_cast %arg0 : i32 to index
    %c0_4 = arith.constant 0 : index
    %c0_5 = arith.constant 0 : index
    %7 = vector.load %arg5[%6, %c0_4, %c0_5] : memref<1x4x128xf32, #tpu.memory_space<vmem>>, vector<1x4x128xf32>
    %8 = vector.shape_cast %7 : vector<1x4x128xf32> to vector<4x128xf32>
    %9 = vector.shape_cast %5 : vector<4x128xf32> to vector<1x4x128xf32>
    tpu.vector_store %arg5[%6, %c0_4, %c0_5], %9 {strides = array<i32>} : memref<1x4x128xf32, #tpu.memory_space<vmem>>, vector<1x4x128xf32>,
    %cst_6 = arith.constant dense<0.000000e+00> : vector<128xf32>
    %10 = vector.multi_reduction <add>, %5, %cst_6 [0] : vector<4x128xf32> to vector<128xf32>
    %11 = vector.shape_cast %10 : vector<128xf32> to vector<1x128xf32>
    %12 = arith.mulf %5, %5 : vector<4x128xf32>
    %cst_7 = arith.constant dense<0.000000e+00> : vector<128xf32>
    %13 = vector.multi_reduction <add>, %12, %cst_7 [0] : vector<4x128xf32> to vector<128xf32>
    %14 = vector.shape_cast %13 : vector<128xf32> to vector<1x128xf32>
    %c0_8 = arith.constant 0 : index
    %c0_9 = arith.constant 0 : index
    %15 = vector.load %arg6[%c0_8, %c0_9] : memref<2x128xf32, #tpu.memory_space<vmem>>, vector<2x128xf32>
    %16 = tpu.concatenate %11, %14 in 0 : vector<1x128xf32>, vector<1x128xf32> -> vector<2x128xf32>
    %17 = arith.addf %15, %16 : vector<2x128xf32>
    %c0_10 = arith.constant 0 : index
    %c0_11 = arith.constant 0 : index
    %18 = vector.load %arg6[%c0_10, %c0_11] : memref<2x128xf32, #tpu.memory_space<vmem>>, vector<2x128xf32>
    tpu.vector_store %arg6[%c0_10, %c0_11], %17 {strides = array<i32>} : memref<2x128xf32, #tpu.memory_space<vmem>>, vector<2x128xf32>,
    %c0_i32_12 = arith.constant 0 : i32
    %19 = arith.cmpi eq, %arg0, %c0_i32_12 : i32
    %20 = arith.extui %19 : i1 to i32
    %c0_i32_13 = arith.constant 0 : i32
    %21 = arith.cmpi ne, %20, %c0_i32_13 : i32
    scf.if %21 {
      %c0_14 = arith.constant 0 : index
      %c0_15 = arith.constant 0 : index
      %22 = vector.load %arg6[%c0_14, %c0_15] : memref<2x128xf32, #tpu.memory_space<vmem>>, vector<1x128xf32>
      %cst_16 = arith.constant 2.500000e-01 : f32
      %23 = vector.broadcast %cst_16 : f32 to vector<1x128xf32>
      %24 = arith.mulf %22, %23 : vector<1x128xf32>
      %c1 = arith.constant 1 : index
      %c0_17 = arith.constant 0 : index
      %25 = vector.load %arg6[%c1, %c0_17] : memref<2x128xf32, #tpu.memory_space<vmem>>, vector<1x128xf32>
      %cst_18 = arith.constant 2.500000e-01 : f32
      %26 = vector.broadcast %cst_18 : f32 to vector<1x128xf32>
      %27 = arith.mulf %25, %26 : vector<1x128xf32>
      %28 = arith.mulf %24, %24 : vector<1x128xf32>
      %29 = arith.subf %27, %28 : vector<1x128xf32>
      %cst_19 = arith.constant 0.000000e+00 : f32
      %30 = vector.broadcast %cst_19 : f32 to vector<1x128xf32>
      %31 = arith.maximumf %29, %30 : vector<1x128xf32>
      %cst_20 = arith.constant 9.99999974E-6 : f32
      %32 = vector.broadcast %cst_20 : f32 to vector<1x128xf32>
      %33 = arith.addf %31, %32 : vector<1x128xf32>
      %34 = math.rsqrt %33 : vector<1x128xf32>
      %c0_21 = arith.constant 0 : index
      %c0_22 = arith.constant 0 : index
      %35 = vector.load %arg3[%c0_21, %c0_22] : memref<1x128xf32, #tpu.memory_space<vmem>>, vector<1x128xf32>
      %36 = arith.mulf %34, %35 : vector<1x128xf32>
      %c0_23 = arith.constant 0 : index
      %c0_24 = arith.constant 0 : index
      %37 = vector.load %arg4[%c0_23, %c0_24] : memref<1x128xf32, #tpu.memory_space<vmem>>, vector<1x128xf32>
      %38 = arith.mulf %24, %36 : vector<1x128xf32>
      %39 = arith.subf %37, %38 : vector<1x128xf32>
      %c0_i32_25 = arith.constant 0 : i32
      %c1_i32 = arith.constant 1 : i32
      %40 = arith.muli %c0_i32_25, %c1_i32 : i32
      %c0_i32_26 = arith.constant 0 : i32
      %41 = arith.addi %c0_i32_26, %40 : i32
      %42 = arith.index_cast %41 : i32 to index
      %c0_27 = arith.constant 0 : index
      %c0_28 = arith.constant 0 : index
      %43 = vector.load %arg5[%42, %c0_27, %c0_28] : memref<1x4x128xf32, #tpu.memory_space<vmem>>, vector<1x4x128xf32>
      %44 = vector.shape_cast %43 : vector<1x4x128xf32> to vector<4x128xf32>
      %45 = vector.broadcast %36 : vector<1x128xf32> to vector<4x128xf32>
      %46 = arith.mulf %44, %45 : vector<4x128xf32>
      %47 = vector.broadcast %39 : vector<1x128xf32> to vector<4x128xf32>
      %48 = arith.addf %46, %47 : vector<4x128xf32>
      %cst_29 = arith.constant 0.000000e+00 : f32
      %49 = vector.broadcast %cst_29 : f32 to vector<4x128xf32>
      %50 = arith.maximumf %48, %49 : vector<4x128xf32>
      %51 = arith.index_cast %41 : i32 to index
      %c0_30 = arith.constant 0 : index
      %c0_31 = arith.constant 0 : index
      %52 = vector.load %arg5[%51, %c0_30, %c0_31] : memref<1x4x128xf32, #tpu.memory_space<vmem>>, vector<1x4x128xf32>
      %53 = vector.shape_cast %52 : vector<1x4x128xf32> to vector<4x128xf32>
      %54 = vector.shape_cast %50 : vector<4x128xf32> to vector<1x4x128xf32>
      tpu.vector_store %arg5[%51, %c0_30, %c0_31], %54 {strides = array<i32>} : memref<1x4x128xf32, #tpu.memory_space<vmem>>, vector<1x4x128xf32>,
      %c1_i32_32 = arith.constant 1 : i32
    } else {
    }
    return
  }
  func.func @transform_0(%arg0: i32) -> (i32, i32) {
    %c0_i32 = arith.constant 0 : i32
    %c0_i32_0 = arith.constant 0 : i32
    return %arg0, %c0_i32 : i32, i32
  }
  func.func @transform_1(%arg0: i32) -> (i32, i32) {
    %c0_i32 = arith.constant 0 : i32
    %c0_i32_0 = arith.constant 0 : i32
    %c0_i32_1 = arith.constant 0 : i32
    return %c0_i32, %c0_i32_0 : i32, i32
  }
  func.func @transform_2(%arg0: i32) -> (i32, i32) {
    %c0_i32 = arith.constant 0 : i32
    %c0_i32_0 = arith.constant 0 : i32
    %c0_i32_1 = arith.constant 0 : i32
    return %c0_i32, %c0_i32_0 : i32, i32
  }
  func.func @transform_3(%arg0: i32) -> (i32, i32) {
    %c0_i32 = arith.constant 0 : i32
    %c0_i32_0 = arith.constant 0 : i32
    %c0_i32_1 = arith.constant 0 : i32
    return %c0_i32, %c0_i32_0 : i32, i32
  }
  func.func @transform_4(%arg0: i32) -> (i32, i32, i32) {
    %c0_i32 = arith.constant 0 : i32
    %c0_i32_0 = arith.constant 0 : i32
    %c0_i32_1 = arith.constant 0 : i32
    %c0_i32_2 = arith.constant 0 : i32
    return %c0_i32, %c0_i32_0, %c0_i32_1 : i32, i32, i32
  }
}

module attributes {stable_mosaic.version = 11 : i64} {
  func.func @kernel(%arg0: i32, %arg1: memref<2x2x128xbf16, #tpu.memory_space<vmem>>, %arg2: memref<128x96xbf16, #tpu.memory_space<vmem>>, %arg3: memref<1x96xf32, #tpu.memory_space<vmem>>, %arg4: memref<32x96xbf16, #tpu.memory_space<vmem>>, %arg5: memref<1x96xf32, #tpu.memory_space<vmem>>, %arg6: memref<2x32xf32, #tpu.memory_space<vmem>>, %arg7: memref<2x2x96xf32, #tpu.memory_space<vmem>>) attributes {dimension_semantics = [#tpu.dimension_semantics<arbitrary>], iteration_bounds = array<i64: 1>, scalar_prefetch = 0 : i64, scratch_operands = 1 : i64, tpu.core_type = #tpu.core_type<tc>, window_params = [{transform_indices = @transform_0, window_bounds = array<i64: 2, 2, 128>}, {pipeline_mode = #tpu.pipeline_mode<synchronous>, transform_indices = @transform_1, window_bounds = array<i64: 128, 96>}, {pipeline_mode = #tpu.pipeline_mode<synchronous>, transform_indices = @transform_2, window_bounds = array<i64: 1, 96>}, {pipeline_mode = #tpu.pipeline_mode<synchronous>, transform_indices = @transform_3, window_bounds = array<i64: 32, 96>}, {pipeline_mode = #tpu.pipeline_mode<synchronous>, transform_indices = @transform_4, window_bounds = array<i64: 1, 96>}, {pipeline_mode = #tpu.pipeline_mode<synchronous>, transform_indices = @transform_5, window_bounds = array<i64: 2, 32>}]} {
    %c0_i32 = arith.constant 0 : i32
    %0 = arith.cmpi eq, %arg0, %c0_i32 : i32
    %1 = arith.extui %0 : i1 to i32
    %c0_i32_0 = arith.constant 0 : i32
    %2 = arith.cmpi ne, %1, %c0_i32_0 : i32
    scf.if %2 {
      %cst_16 = arith.constant 0.000000e+00 : f32
      %16 = vector.broadcast %cst_16 : f32 to vector<2x32xf32>
      %c0_17 = arith.constant 0 : index
      %c0_18 = arith.constant 0 : index
      %17 = vector.load %arg6[%c0_17, %c0_18] : memref<2x32xf32, #tpu.memory_space<vmem>>, vector<2x32xf32>
      tpu.vector_store %arg6[%c0_17, %c0_18], %16 {strides = array<i32>} : memref<2x32xf32, #tpu.memory_space<vmem>>, vector<2x32xf32>,
    } else {
    }
    %c0 = arith.constant 0 : index
    %c0_1 = arith.constant 0 : index
    %c0_2 = arith.constant 0 : index
    %3 = vector.load %arg1[%c0, %c0_1, %c0_2] : memref<2x2x128xbf16, #tpu.memory_space<vmem>>, vector<2x2x128xbf16>
    %4 = vector.shape_cast %3 : vector<2x2x128xbf16> to vector<4x128xbf16>
    %c0_3 = arith.constant 0 : index
    %c0_4 = arith.constant 0 : index
    %5 = vector.load %arg2[%c0_3, %c0_4] : memref<128x96xbf16, #tpu.memory_space<vmem>>, vector<128x96xbf16>
    %cst = arith.constant dense<0.000000e+00> : vector<4x96xf32>
    %6 = tpu.matmul %4, %5, %cst {dimension_numbers = #tpu.dot_dimension_numbers<[1], [0], [0], [1], [0, 0, 1, 1], [], []>} : vector<4x128xbf16>, vector<128x96xbf16>, vector<4x96xf32> -> vector<4x96xf32>
    %c0_5 = arith.constant 0 : index
    %c0_6 = arith.constant 0 : index
    %7 = vector.load %arg3[%c0_5, %c0_6] : memref<1x96xf32, #tpu.memory_space<vmem>>, vector<1x96xf32>
    %8 = vector.broadcast %7 : vector<1x96xf32> to vector<4x96xf32>
    %9 = arith.addf %6, %8 : vector<4x96xf32>
    %10 = vector.shape_cast %9 : vector<4x96xf32> to vector<2x2x96xf32>
    %c0_7 = arith.constant 0 : index
    %c0_8 = arith.constant 0 : index
    %c0_9 = arith.constant 0 : index
    %11 = vector.load %arg7[%c0_7, %c0_8, %c0_9] : memref<2x2x96xf32, #tpu.memory_space<vmem>>, vector<2x2x96xf32>
    tpu.vector_store %arg7[%c0_7, %c0_8, %c0_9], %10 {strides = array<i32>} : memref<2x2x96xf32, #tpu.memory_space<vmem>>, vector<2x2x96xf32>,
    %c0_10 = arith.constant 0 : index
    %c0_11 = arith.constant 0 : index
    %12 = vector.load %arg6[%c0_10, %c0_11] : memref<2x32xf32, #tpu.memory_space<vmem>>, vector<2x32xf32>
    %c0_i32_12 = arith.constant 0 : i32
    %c2_i32 = arith.constant 2 : i32
    %13 = arith.addi %c0_i32_12, %c2_i32 : i32
    %c1_i32 = arith.constant 1 : i32
    %14 = scf.for %arg8 = %c0_i32_12 to %13 step %c1_i32 iter_args(%arg9 = %12) -> (vector<2x32xf32>)  : i32 {
      %16 = arith.index_cast %arg8 : i32 to index
      %c0_16 = arith.constant 0 : index
      %c0_17 = arith.constant 0 : index
      %17 = vector.load %arg7[%16, %c0_16, %c0_17] : memref<2x2x96xf32, #tpu.memory_space<vmem>>, vector<1x2x96xf32>
      %18 = vector.shape_cast %17 : vector<1x2x96xf32> to vector<2x96xf32>
      %19 = arith.truncf %arg9 : vector<2x32xf32> to vector<2x32xbf16>
      %c0_18 = arith.constant 0 : index
      %c0_19 = arith.constant 0 : index
      %20 = vector.load %arg4[%c0_18, %c0_19] : memref<32x96xbf16, #tpu.memory_space<vmem>>, vector<32x96xbf16>
      %cst_20 = arith.constant dense<0.000000e+00> : vector<2x96xf32>
      %21 = tpu.matmul %19, %20, %cst_20 {dimension_numbers = #tpu.dot_dimension_numbers<[1], [0], [0], [1], [0, 0, 1, 1], [], []>} : vector<2x32xbf16>, vector<32x96xbf16>, vector<2x96xf32> -> vector<2x96xf32>
      %c0_21 = arith.constant 0 : index
      %c0_22 = arith.constant 0 : index
      %22 = vector.load %arg5[%c0_21, %c0_22] : memref<1x96xf32, #tpu.memory_space<vmem>>, vector<1x96xf32>
      %23 = vector.broadcast %22 : vector<1x96xf32> to vector<2x96xf32>
      %24 = arith.addf %21, %23 : vector<2x96xf32>
      %25 = vector.extract_strided_slice %18 {offsets = [0, 0], sizes = [2, 32], strides = [1, 1]} : vector<2x96xf32> to vector<2x32xf32>
      %26 = vector.extract_strided_slice %24 {offsets = [0, 0], sizes = [2, 32], strides = [1, 1]} : vector<2x96xf32> to vector<2x32xf32>
      %27 = arith.addf %25, %26 : vector<2x32xf32>
      %28 = arith.negf %27 : vector<2x32xf32>
      %29 = math.exp %28 : vector<2x32xf32>
      %cst_23 = arith.constant 1.000000e+00 : f32
      %30 = vector.broadcast %cst_23 : f32 to vector<2x32xf32>
      %31 = arith.addf %30, %29 : vector<2x32xf32>
      %32 = arith.divf %30, %31 : vector<2x32xf32>
      %33 = vector.extract_strided_slice %18 {offsets = [0, 32], sizes = [2, 32], strides = [1, 1]} : vector<2x96xf32> to vector<2x32xf32>
      %34 = vector.extract_strided_slice %24 {offsets = [0, 32], sizes = [2, 32], strides = [1, 1]} : vector<2x96xf32> to vector<2x32xf32>
      %35 = arith.addf %33, %34 : vector<2x32xf32>
      %36 = arith.negf %35 : vector<2x32xf32>
      %37 = math.exp %36 : vector<2x32xf32>
      %cst_24 = arith.constant 1.000000e+00 : f32
      %38 = vector.broadcast %cst_24 : f32 to vector<2x32xf32>
      %39 = arith.addf %38, %37 : vector<2x32xf32>
      %40 = arith.divf %38, %39 : vector<2x32xf32>
      %41 = vector.extract_strided_slice %18 {offsets = [0, 64], sizes = [2, 32], strides = [1, 1]} : vector<2x96xf32> to vector<2x32xf32>
      %42 = vector.extract_strided_slice %24 {offsets = [0, 64], sizes = [2, 32], strides = [1, 1]} : vector<2x96xf32> to vector<2x32xf32>
      %43 = arith.mulf %32, %42 : vector<2x32xf32>
      %44 = arith.addf %41, %43 : vector<2x32xf32>
      %45 = math.tanh %44 : vector<2x32xf32>
      %cst_25 = arith.constant 1.000000e+00 : f32
      %46 = vector.broadcast %cst_25 : f32 to vector<2x32xf32>
      %47 = arith.subf %46, %40 : vector<2x32xf32>
      %48 = arith.mulf %47, %45 : vector<2x32xf32>
      %49 = arith.mulf %40, %arg9 : vector<2x32xf32>
      %50 = arith.addf %48, %49 : vector<2x32xf32>
      scf.yield %50 : vector<2x32xf32>
    }
    %c2_i32_13 = arith.constant 2 : i32
    %c0_14 = arith.constant 0 : index
    %c0_15 = arith.constant 0 : index
    %15 = vector.load %arg6[%c0_14, %c0_15] : memref<2x32xf32, #tpu.memory_space<vmem>>, vector<2x32xf32>
    tpu.vector_store %arg6[%c0_14, %c0_15], %14 {strides = array<i32>} : memref<2x32xf32, #tpu.memory_space<vmem>>, vector<2x32xf32>,
    return
  }
  func.func @transform_0(%arg0: i32) -> (i32, i32, i32) {
    %c0_i32 = arith.constant 0 : i32
    %c0_i32_0 = arith.constant 0 : i32
    %c0_i32_1 = arith.constant 0 : i32
    return %arg0, %c0_i32, %c0_i32_0 : i32, i32, i32
  }
  func.func @transform_1(%arg0: i32) -> (i32, i32) {
    %c0_i32 = arith.constant 0 : i32
    %c0_i32_0 = arith.constant 0 : i32
    %c0_i32_1 = arith.constant 0 : i32
    return %c0_i32, %c0_i32_0 : i32, i32
  }
  func.func @transform_2(%arg0: i32) -> (i32, i32) {
    %c0_i32 = arith.constant 0 : i32
    %c0_i32_0 = arith.constant 0 : i32
    %c0_i32_1 = arith.constant 0 : i32
    return %c0_i32, %c0_i32_0 : i32, i32
  }
  func.func @transform_3(%arg0: i32) -> (i32, i32) {
    %c0_i32 = arith.constant 0 : i32
    %c0_i32_0 = arith.constant 0 : i32
    %c0_i32_1 = arith.constant 0 : i32
    return %c0_i32, %c0_i32_0 : i32, i32
  }
  func.func @transform_4(%arg0: i32) -> (i32, i32) {
    %c0_i32 = arith.constant 0 : i32
    %c0_i32_0 = arith.constant 0 : i32
    %c0_i32_1 = arith.constant 0 : i32
    return %c0_i32, %c0_i32_0 : i32, i32
  }
  func.func @transform_5(%arg0: i32) -> (i32, i32) {
    %c0_i32 = arith.constant 0 : i32
    %c0_i32_0 = arith.constant 0 : i32
    %c0_i32_1 = arith.constant 0 : i32
    return %c0_i32, %c0_i32_0 : i32, i32
  }
}

</mosaic_0001>

<bundles_post_ra>
// kernel: reference_encoder_forward.7
= control target key start
LH: loop header
LB: loop body
LE: loop exit
PB: predicated region body
PF: predicated region fallthrough
CT: control target
= control target key end

     0   :  { %s1150_s15 = smov 0   ;;  %s1633_s0 = inlined_call_operand.vmem [shape: bf16[4096,9], index: 0, kind: input, shape index: {}]   ;;  %s1634_s1 = inlined_call_operand.vmem [shape: bf16[9,32], index: 1, kind: input, shape index: {}]   ;;  %s1635_s2 = inlined_call_operand.vmem [shape: f32[1,32], index: 2, kind: input, shape index: {}]   ;;  %s1636_s3 = inlined_call_operand.vmem [shape: f32[1,32], index: 3, kind: input, shape index: {}]   ;;  %s1637_s4 = inlined_call_operand.vmem [shape: f32[16,256,32], index: 4, kind: output, shape index: {}]  }
   0x1 LB: > { %s1156_s16 = sadd.s32 4294967295, %s1117_s15   ;;  %p975_p0 = scmp.ge.s32.totalorder %s1117_s15, 1  ;;  %s1117_s15 = sphi %s1150_s15, %s14_s15  }
   0x2   : > { %p158_p1 = scmp.lt.s32.totalorder %s1117_s15, 17 }
   0x4   : > { %p159_p2 = pnand %p975_p0, %p158_p1 }
   0x5   : > { %s976_s17 = sshll.u32 (!%p159_p2), %s1156_s16, 5  ;;  %p978_p4 = scmp.ne.s32.totalorder (!%p159_p2), %s1156_s16, 0 }
   0x6   : > { %162 = sbr.rel (%p159_p2) target bundleno = 382 (0x17e), region = 36  ;;  %p180_p3 = scmp.lt.s32.totalorder (!%p159_p2), %s976_s17, 511 }
   0xb   : > { %s1639_s17 = smov (!%p180_p3, %s976_s17), 511  ;;  %189 = sbr.rel (%p978_p4) target bundleno = 18 (0x12), region = 40 }
   0xc   : > { %s977_s18 = sshll.u32 %s1639_s17, 2 }
   0xd   : > { %s1164_s21 = scalar_lea.vmem %s1633_s0, %s977_s18 }
  0x10   : > { %vm190_vm0 = vcmask 254976   ;;  %v1123_v0 = vmov 0.0  }
  0x11   : > { %191 = vst.msk [vmem:[#allocation2] sm:$0x3] %vm190_vm0, %v1123_v0 }
  0x12 PF: > { %v1088_v1 = vld [vmem:[%s1634_s1] sm:$0x1f]   ;;  %vm360_vm1 = vcmask 1043456   ;;  %vm361_vm2 = vcmask 1044480   ;;  %v1124_v3 = vmov 65535   ;;  %vm311_vm3 = vcmask 72704  }
  0x13   : > { %v1089_v2 = vld [vmem:[%s1164_s21] sm:$0xff]   ;;  %v362_v4 = vsel %vm360_vm1, 4294967295, %v1124_v3  ;;  %v1090_v7 = vld [vmem:[%s1164_s21 + $0x8] sm:$0xff]   ;;  %v1091_v8 = vld [vmem:[%s1164_s21 + $0x10] sm:$0xff]   ;;  %s1012_s24 = sshll.u32 %s1156_s16, 8  ;;  %vm530_vm4 = vcmask 261120  }
  0x14   : > { %v363_v5 = vsel %vm361_vm2, %v362_v4, 0  ;;  %1036 = vmatprep.mubr.msk.bf16.mxu0 %vm311_vm3, %v1089_v2  ;;  %v1097_v9 = vld [vmem:[%s1164_s21 + $0x40] sm:$0xff]   ;;  %v1098_v10 = vld [vmem:[%s1164_s21 + $0x48] sm:$0xff]   ;;  %v1099_v11 = vld [vmem:[%s1164_s21 + $0x50] sm:$0xff]   ;;  %s1206_s27 = scalar_lea.vmem %s1637_s4, %s1012_s24  ;;  %vm734_vm5 = vcmask 1040384   ;;  %vm737_vm6 = vcmask 254976  }
  0x15   : > { %v365_v6 = vand.u32 %v1088_v1, %v363_v5  ;;  %1052 = vmatprep.mubr.msk.bf16.mxu1 %vm311_vm3, %v1097_v9  ;;  %v1092_v12 = vld [vmem:[%s1164_s21 + $0x18] sm:$0xff]   ;;  %v1093_v13 = vld [vmem:[%s1164_s21 + $0x20] sm:$0xff]   ;;  %v1094_v16 = vld [vmem:[%s1164_s21 + $0x28] sm:$0xff]   ;;  %p1013_p5 = scmp.ne.s32.totalorder %s1156_s16, 15 }
  0x16   : > { %v1100_v14 = vld [vmem:[%s1164_s21 + $0x58] sm:$0xff]   ;;  %v1101_v15 = vld [vmem:[%s1164_s21 + $0x60] sm:$0xff]   ;;  %v1095_v17 = vld [vmem:[%s1164_s21 + $0x30] sm:$0xff]   ;;  %s1448_s6 = smov (!%p1013_p5), 0  }
  0x17   : > { %1034 = vmatprep.subr.bf16.mxu0 %v365_v6  ;;  %1068 = vmatprep.subr.bf16.mxu1 %v365_v6  ;;  %v1102_v18 = vld [vmem:[%s1164_s21 + $0x68] sm:$0xff]   ;;  %v1103_v19 = vld [vmem:[%s1164_s21 + $0x70] sm:$0xff]   ;;  %v1096_v20 = vld [vmem:[%s1164_s21 + $0x38] sm:$0xff]  }
  0x18   : > { %1035 = vmatpush3.bf16.msra.mxu0 %v365_v6  ;;  %1069 = vmatpush3.bf16.msra.mxu1 %v365_v6  ;;  %v1104_v21 = vld [vmem:[%s1164_s21 + $0x78] sm:$0xff]  }
  0x1b   : > { %1037 = vmatmul.mubr.msk.bf16.vlgmr.msra.gmra.mxu0 %vm311_vm3, %v1090_v7  ;;  %1053 = vmatmul.mubr.msk.bf16.vlgmr.msra.gmra.mxu1 %vm311_vm3, %v1098_v10 }
  0x1c   : > { %1040 = vmatprep.mubr.msk.bf16.mxu0 %vm311_vm3, %v1091_v8  ;;  %1056 = vmatprep.mubr.msk.bf16.mxu1 %vm311_vm3, %v1099_v11 }
  0x23   : > { %1041 = vmatmul.mubr.msk.bf16.gmra.mxu0 %vm311_vm3, %v1092_v12  ;;  %1057 = vmatmul.mubr.msk.bf16.gmra.mxu1 %vm311_vm3, %v1100_v14 }
  0x24   : > { %1044 = vmatprep.mubr.msk.bf16.mxu0 %vm311_vm3, %v1093_v13  ;;  %1060 = vmatprep.mubr.msk.bf16.mxu1 %vm311_vm3, %v1101_v15 }
  0x2b   : > { %1045 = vmatmul.mubr.msk.bf16.gmra.mxu0 %vm311_vm3, %v1094_v16  ;;  %1061 = vmatmul.mubr.msk.bf16.gmra.mxu1 %vm311_vm3, %v1102_v18 }
  0x2c   : > { %1048 = vmatprep.mubr.msk.bf16.mxu0 %vm311_vm3, %v1095_v17  ;;  %1064 = vmatprep.mubr.msk.bf16.mxu1 %vm311_vm3, %v1103_v19 }
  0x33   : > { %1049 = vmatmul.mubr.msk.bf16.gmra.mxu0 %vm311_vm3, %v1096_v20  ;;  %1065 = vmatmul.mubr.msk.bf16.gmra.mxu1 %vm311_vm3, %v1104_v21 }
  0xdb   : > { %v1038_v22 = vpop.f32.mrf.mxu0  ;;  %v1212_v24 = vpop.f32.mrf.mxu1 }
  0xdc   : > { %533 = vst.msk [vmem:[%s1206_s27 + $0x10] sm:$0xff] %vm530_vm4, %v1038_v22  ;;  %549 = vst.msk [vmem:[%s1206_s27 + $0x90] sm:$0xff] %vm530_vm4, %v1212_v24  ;;  %v634_v29 = vmul.f32 %v1038_v22, %v1038_v22  ;;  %v566_v36 = vsel %vm530_vm4, %v1038_v22, 0.0 }
  0xdd   : > { %v401_v23 = vpop.f32.mrf.mxu0  ;;  %v1219_v27 = vpop.f32.mrf.mxu1 }
  0xde   : > { %531 = vst.msk [vmem:[%s1206_s27] sm:$0xff] %vm530_vm4, %v401_v23  ;;  %v632_v26 = vmul.f32 %v401_v23, %v401_v23  ;;  %547 = vst.msk [vmem:[%s1206_s27 + $0x80] sm:$0xff] %vm530_vm4, %v1219_v27  ;;  %v563_v30 = vsel %vm530_vm4, %v401_v23, 0.0  ;;  %v667_v44 = vsel %vm530_vm4, %v634_v29, 0.0 }
  0xdf   : > { %v1039_v25 = vpop.f32.mrf.mxu0  ;;  %v1228_v33 = vpop.f32.mrf.mxu1 }
  0xe0   : > { %534 = vst.msk [vmem:[%s1206_s27 + $0x18] sm:$0xff] %vm530_vm4, %v1039_v25  ;;  %550 = vst.msk [vmem:[%s1206_s27 + $0x98] sm:$0xff] %vm530_vm4, %v1228_v33  ;;  %v664_v37 = vsel %vm530_vm4, %v632_v26, 0.0  ;;  %v635_v38 = vmul.f32 %v1039_v25, %v1039_v25  ;;  %v568_v45 = vsel %vm530_vm4, %v1039_v25, 0.0 }
  0xe1   : > { %v404_v28 = vpop.f32.mrf.mxu0  ;;  %v1238_v40 = vpop.f32.mrf.mxu1 }
  0xe2   : > { %532 = vst.msk [vmem:[%s1206_s27 + $0x8] sm:$0xff] %vm530_vm4, %v404_v28  ;;  %v564_v31 = vsel %vm530_vm4, %v404_v28, 0.0  ;;  %v633_v32 = vmul.f32 %v404_v28, %v404_v28  ;;  %548 = vst.msk [vmem:[%s1206_s27 + $0x88] sm:$0xff] %vm530_vm4, %v1238_v40  ;;  %v669_v51 = vsel %vm530_vm4, %v635_v38, 0.0 }
  0xe3   : > { %v565_v34 = vadd.f32 %v564_v31, %v563_v30  ;;  %v1042_v35 = vpop.f32.mrf.mxu0  ;;  %v1247_v47 = vpop.f32.mrf.mxu1 }
  0xe4   : > { %v665_v39 = vsel %vm530_vm4, %v633_v32, 0.0  ;;  %537 = vst.msk [vmem:[%s1206_s27 + $0x30] sm:$0xff] %vm530_vm4, %v1042_v35  ;;  %553 = vst.msk [vmem:[%s1206_s27 + $0xb0] sm:$0xff] %vm530_vm4, %v1247_v47  ;;  %v638_v57 = vmul.f32 %v1042_v35, %v1042_v35  ;;  %v574_v1 = vsel %vm530_vm4, %v1042_v35, 0.0 }
  0xe5   : > { %v567_v41 = vadd.f32 %v566_v36, %v565_v34  ;;  %v666_v42 = vadd.f32 %v665_v39, %v664_v37  ;;  %v417_v43 = vpop.f32.mrf.mxu0  ;;  %v1256_v53 = vpop.f32.mrf.mxu1 }
  0xe6   : > { %535 = vst.msk [vmem:[%s1206_s27 + $0x20] sm:$0xff] %vm530_vm4, %v417_v43  ;;  %v636_v46 = vmul.f32 %v417_v43, %v417_v43  ;;  %v570_v52 = vsel %vm530_vm4, %v417_v43, 0.0  ;;  %551 = vst.msk [vmem:[%s1206_s27 + $0xa0] sm:$0xff] %vm530_vm4, %v1256_v53  ;;  %v675_v8 = vsel %vm530_vm4, %v638_v57, 0.0 }
  0xe7   : > { %v668_v48 = vadd.f32 %v667_v44, %v666_v42  ;;  %v569_v49 = vadd.f32 %v568_v45, %v567_v41  ;;  %v1043_v50 = vpop.f32.mrf.mxu0  ;;  %v1265_v61 = vpop.f32.mrf.mxu1 }
  0xe8   : > { %538 = vst.msk [vmem:[%s1206_s27 + $0x38] sm:$0xff] %vm530_vm4, %v1043_v50  ;;  %v671_v58 = vsel %vm530_vm4, %v636_v46, 0.0  ;;  %554 = vst.msk [vmem:[%s1206_s27 + $0xb8] sm:$0xff] %vm530_vm4, %v1265_v61  ;;  %v639_v2 = vmul.f32 %v1043_v50, %v1043_v50  ;;  %v576_v9 = vsel %vm530_vm4, %v1043_v50, 0.0 }
  0xe9   : > { %v571_v54 = vadd.f32 %v570_v52, %v569_v49  ;;  %v670_v55 = vadd.f32 %v669_v51, %v668_v48  ;;  %v420_v56 = vpop.f32.mrf.mxu0  ;;  %v1274_v4 = vpop.f32.mrf.mxu1 }
  0xea   : > { %536 = vst.msk [vmem:[%s1206_s27 + $0x28] sm:$0xff] %vm530_vm4, %v420_v56  ;;  %v572_v59 = vsel %vm530_vm4, %v420_v56, 0.0  ;;  %v637_v60 = vmul.f32 %v420_v56, %v420_v56  ;;  %552 = vst.msk [vmem:[%s1206_s27 + $0xa8] sm:$0xff] %vm530_vm4, %v1274_v4  ;;  %v677_v15 = vsel %vm530_vm4, %v639_v2, 0.0 }
  0xeb   : > { %v672_v62 = vadd.f32 %v671_v58, %v670_v55  ;;  %v573_v63 = vadd.f32 %v572_v59, %v571_v54  ;;  %v1046_v0 = vpop.f32.mrf.mxu0  ;;  %v1283_v11 = vpop.f32.mrf.mxu1 }
  0xec   : > { %v673_v3 = vsel %vm530_vm4, %v637_v60, 0.0  ;;  %541 = vst.msk [vmem:[%s1206_s27 + $0x50] sm:$0xff] %vm530_vm4, %v1046_v0  ;;  %557 = vst.msk [vmem:[%s1206_s27 + $0xd0] sm:$0xff] %vm530_vm4, %v1283_v11  ;;  %v642_v21 = vmul.f32 %v1046_v0, %v1046_v0  ;;  %v582_v31 = vsel %vm530_vm4, %v1046_v0, 0.0 }
  0xed   : > { %v575_v5 = vadd.f32 %v574_v1, %v573_v63  ;;  %v674_v6 = vadd.f32 %v673_v3, %v672_v62  ;;  %v433_v7 = vpop.f32.mrf.mxu0  ;;  %v1292_v17 = vpop.f32.mrf.mxu1 }
  0xee   : > { %539 = vst.msk [vmem:[%s1206_s27 + $0x40] sm:$0xff] %vm530_vm4, %v433_v7  ;;  %v640_v10 = vmul.f32 %v433_v7, %v433_v7  ;;  %v578_v16 = vsel %vm530_vm4, %v433_v7, 0.0  ;;  %555 = vst.msk [vmem:[%s1206_s27 + $0xc0] sm:$0xff] %vm530_vm4, %v1292_v17  ;;  %v683_v39 = vsel %vm530_vm4, %v642_v21, 0.0 }
  0xef   : > { %v676_v12 = vadd.f32 %v675_v8, %v674_v6  ;;  %v577_v13 = vadd.f32 %v576_v9, %v575_v5  ;;  %v1047_v14 = vpop.f32.mrf.mxu0  ;;  %v1301_v26 = vpop.f32.mrf.mxu1  ;;  %v648_v8 = vmul.f32 %v1219_v27, %v1219_v27 }
  0xf0   : > { %542 = vst.msk [vmem:[%s1206_s27 + $0x58] sm:$0xff] %vm530_vm4, %v1047_v14  ;;  %v679_v22 = vsel %vm530_vm4, %v640_v10, 0.0  ;;  %558 = vst.msk [vmem:[%s1206_s27 + $0xd8] sm:$0xff] %vm530_vm4, %v1301_v26  ;;  %v643_v32 = vmul.f32 %v1047_v14, %v1047_v14  ;;  %v584_v41 = vsel %vm530_vm4, %v1047_v14, 0.0  ;;  %v649_v14 = vmul.f32 %v1238_v40, %v1238_v40 }
  0xf1   : > { %v579_v18 = vadd.f32 %v578_v16, %v577_v13  ;;  %v678_v19 = vadd.f32 %v677_v15, %v676_v12  ;;  %v436_v20 = vpop.f32.mrf.mxu0  ;;  %v1310_v35 = vpop.f32.mrf.mxu1  ;;  %v594_v13 = vsel %vm530_vm4, %v1219_v27, 0.0  ;;  %v651_v27 = vmul.f32 %v1228_v33, %v1228_v33 }
  0xf2   : > { %540 = vst.msk [vmem:[%s1206_s27 + $0x48] sm:$0xff] %vm530_vm4, %v436_v20  ;;  %v580_v23 = vsel %vm530_vm4, %v436_v20, 0.0  ;;  %v641_v25 = vmul.f32 %v436_v20, %v436_v20  ;;  %556 = vst.msk [vmem:[%s1206_s27 + $0xc8] sm:$0xff] %vm530_vm4, %v1310_v35  ;;  %v685_v48 = vsel %vm530_vm4, %v643_v32, 0.0  ;;  %v596_v20 = vsel %vm530_vm4, %v1238_v40, 0.0 }
  0xf3   : > { %v680_v28 = vadd.f32 %v679_v22, %v678_v19  ;;  %v581_v29 = vadd.f32 %v580_v23, %v579_v18  ;;  %v1050_v30 = vpop.f32.mrf.mxu0  ;;  %v1319_v43 = vpop.f32.mrf.mxu1  ;;  %v650_v18 = vmul.f32 %v1212_v24, %v1212_v24  ;;  %v695_v19 = vsel %vm530_vm4, %v648_v8, 0.0 }
  0xf4   : > { %v681_v34 = vsel %vm530_vm4, %v641_v25, 0.0  ;;  %545 = vst.msk [vmem:[%s1206_s27 + $0x70] sm:$0xff] %vm530_vm4, %v1050_v30  ;;  %561 = vst.msk [vmem:[%s1206_s27 + $0xf0] sm:$0xff] %vm530_vm4, %v1319_v43  ;;  %v646_v55 = vmul.f32 %v1050_v30, %v1050_v30  ;;  %v590_v63 = vsel %vm530_vm4, %v1050_v30, 0.0  ;;  %v598_v23 = vsel %vm530_vm4, %v1212_v24, 0.0 }
  0xf5   : > { %v583_v36 = vadd.f32 %v582_v31, %v581_v29  ;;  %v682_v37 = vadd.f32 %v681_v34, %v680_v28  ;;  %v449_v38 = vpop.f32.mrf.mxu0  ;;  %v1328_v50 = vpop.f32.mrf.mxu1  ;;  %v697_v25 = vsel %vm530_vm4, %v649_v14, 0.0  ;;  %v699_v30 = vsel %vm530_vm4, %v650_v18, 0.0 }
  0xf6   : > { %543 = vst.msk [vmem:[%s1206_s27 + $0x60] sm:$0xff] %vm530_vm4, %v449_v38  ;;  %v644_v42 = vmul.f32 %v449_v38, %v449_v38  ;;  %v586_v49 = vsel %vm530_vm4, %v449_v38, 0.0  ;;  %559 = vst.msk [vmem:[%s1206_s27 + $0xe0] sm:$0xff] %vm530_vm4, %v1328_v50  ;;  %v691_v6 = vsel %vm530_vm4, %v646_v55, 0.0  ;;  %v600_v31 = vsel %vm530_vm4, %v1228_v33, 0.0 }
  0xf7   : > { %v684_v44 = vadd.f32 %v683_v39, %v682_v37  ;;  %v585_v45 = vadd.f32 %v584_v41, %v583_v36  ;;  %v1051_v46 = vpop.f32.mrf.mxu0  ;;  %v1337_v59 = vpop.f32.mrf.mxu1  ;;  %v652_v40 = vmul.f32 %v1256_v53, %v1256_v53  ;;  %v701_v36 = vsel %vm530_vm4, %v651_v27, 0.0 }
  0xf8   : > { %546 = vst.msk [vmem:[%s1206_s27 + $0x78] sm:$0xff] %vm530_vm4, %v1051_v46  ;;  %v687_v56 = vsel %vm530_vm4, %v644_v42, 0.0  ;;  %562 = vst.msk [vmem:[%s1206_s27 + $0xf8] sm:$0xff] %vm530_vm4, %v1337_v59  ;;  %v647_v0 = vmul.f32 %v1051_v46, %v1051_v46  ;;  %v592_v7 = vsel %vm530_vm4, %v1051_v46, 0.0  ;;  %v602_v24 = vsel %vm530_vm4, %v1256_v53, 0.0 }
  0xf9   : > { %v587_v51 = vadd.f32 %v586_v49, %v585_v45  ;;  %v686_v52 = vadd.f32 %v685_v48, %v684_v44  ;;  %v452_v54 = vpop.f32.mrf.mxu0  ;;  %v1344_v2 = vpop.f32.mrf.mxu1  ;;  %v653_v37 = vmul.f32 %v1274_v4, %v1274_v4  ;;  %v654_v41 = vmul.f32 %v1247_v47, %v1247_v47 }
  0xfa   : > { %544 = vst.msk [vmem:[%s1206_s27 + $0x68] sm:$0xff] %vm530_vm4, %v452_v54  ;;  %v588_v57 = vsel %vm530_vm4, %v452_v54, 0.0  ;;  %v645_v58 = vmul.f32 %v452_v54, %v452_v54  ;;  %560 = vst.msk [vmem:[%s1206_s27 + $0xe8] sm:$0xff] %vm530_vm4, %v1344_v2  ;;  %v693_v12 = vsel %vm530_vm4, %v647_v0, 0.0  ;;  %v703_v33 = vsel %vm530_vm4, %v652_v40, 0.0 }
  0xfb   : > { %v688_v60 = vadd.f32 %v687_v56, %v686_v52  ;;  %v589_v62 = vadd.f32 %v588_v57, %v587_v51  ;;  %v604_v42 = vsel %vm530_vm4, %v1274_v4, 0.0  ;;  %v606_v46 = vsel %vm530_vm4, %v1247_v47, 0.0 }
  0xfc   : > { %v689_v1 = vsel %vm530_vm4, %v645_v58, 0.0  ;;  %v655_v53 = vmul.f32 %v1265_v61, %v1265_v61  ;;  %v705_v48 = vsel %vm530_vm4, %v653_v37, 0.0  ;;  %v707_v52 = vsel %vm530_vm4, %v654_v41, 0.0 }
  0xfd   : > { %v591_v3 = vadd.f32 %v590_v63, %v589_v62  ;;  %v690_v5 = vadd.f32 %v689_v1, %v688_v60  ;;  %v608_v54 = vsel %vm530_vm4, %v1265_v61, 0.0  ;;  %v656_v4 = vmul.f32 %v1292_v17, %v1292_v17 }
  0xfe   : > { %v709_v57 = vsel %vm530_vm4, %v655_v53, 0.0  ;;  %v610_v47 = vsel %vm530_vm4, %v1292_v17, 0.0  ;;  %v657_v58 = vmul.f32 %v1310_v35, %v1310_v35  ;;  %v658_v63 = vmul.f32 %v1283_v11, %v1283_v11 }
  0xff   : > { %v593_v9 = vadd.f32 %v592_v7, %v591_v3  ;;  %v692_v10 = vadd.f32 %v691_v6, %v690_v5  ;;  %v711_v61 = vsel %vm530_vm4, %v656_v4, 0.0  ;;  %v612_v0 = vsel %vm530_vm4, %v1310_v35, 0.0 }
 0x100   : > { %v614_v5 = vsel %vm530_vm4, %v1283_v11, 0.0  ;;  %v659_v17 = vmul.f32 %v1301_v26, %v1301_v26  ;;  %v713_v6 = vsel %vm530_vm4, %v657_v58, 0.0  ;;  %v660_v35 = vmul.f32 %v1328_v50, %v1328_v50 }
 0x101   : > { %v694_v15 = vadd.f32 %v693_v12, %v692_v10  ;;  %v595_v16 = vadd.f32 %v594_v13, %v593_v9  ;;  %v715_v9 = vsel %vm530_vm4, %v658_v63, 0.0  ;;  %v616_v10 = vsel %vm530_vm4, %v1301_v26, 0.0 }
 0x102   : > { %v717_v14 = vsel %vm530_vm4, %v659_v17, 0.0  ;;  %v618_v11 = vsel %vm530_vm4, %v1328_v50, 0.0  ;;  %v719_v26 = vsel %vm530_vm4, %v660_v35, 0.0  ;;  %v663_v50 = vmul.f32 %v1337_v59, %v1337_v59 }
 0x103   : > { %v597_v21 = vadd.f32 %v596_v20, %v595_v16  ;;  %v696_v22 = vadd.f32 %v695_v19, %v694_v15  ;;  %v661_v15 = vmul.f32 %v1344_v2, %v1344_v2  ;;  %v662_v19 = vmul.f32 %v1319_v43, %v1319_v43 }
 0x104   : > { %v620_v20 = vsel %vm530_vm4, %v1344_v2, 0.0  ;;  %v725_v2 = vsel %vm530_vm4, %v663_v50, 0.0 }
 0x105   : > { %v599_v28 = vadd.f32 %v598_v23, %v597_v21  ;;  %v698_v29 = vadd.f32 %v697_v25, %v696_v22  ;;  %v622_v23 = vsel %vm530_vm4, %v1319_v43, 0.0  ;;  %v721_v27 = vsel %vm530_vm4, %v661_v15, 0.0 }
 0x107   : > { %v700_v32 = vadd.f32 %v699_v30, %v698_v29  ;;  %v601_v34 = vadd.f32 %v600_v31, %v599_v28  ;;  %v723_v29 = vsel %vm530_vm4, %v662_v19, 0.0  ;;  %v624_v30 = vsel %vm530_vm4, %v1337_v59, 0.0 }
 0x109   : > { %v603_v38 = vadd.f32 %v602_v24, %v601_v34  ;;  %v702_v39 = vadd.f32 %v701_v36, %v700_v32 }
 0x10b   : > { %v704_v44 = vadd.f32 %v703_v33, %v702_v39  ;;  %v605_v45 = vadd.f32 %v604_v42, %v603_v38 }
 0x10d   : > { %v607_v49 = vadd.f32 %v606_v46, %v605_v45  ;;  %v706_v51 = vadd.f32 %v705_v48, %v704_v44  ;;  %v733_v46 = vld [vmem:[#allocation2] sm:$0x3] }
 0x10f   : > { %v708_v55 = vadd.f32 %v707_v52, %v706_v51  ;;  %v609_v56 = vadd.f32 %v608_v54, %v607_v49 }
 0x111   : > { %v611_v60 = vadd.f32 %v610_v47, %v609_v56  ;;  %v710_v62 = vadd.f32 %v709_v57, %v708_v55 }
 0x113   : > { %v712_v1 = vadd.f32 %v711_v61, %v710_v62  ;;  %v613_v3 = vadd.f32 %v612_v0, %v611_v60 }
 0x115   : > { %v615_v7 = vadd.f32 %v614_v5, %v613_v3  ;;  %v714_v8 = vadd.f32 %v713_v6, %v712_v1 }
 0x117   : > { %v716_v12 = vadd.f32 %v715_v9, %v714_v8  ;;  %v617_v13 = vadd.f32 %v616_v10, %v615_v7 }
 0x119   : > { %v619_v16 = vadd.f32 %v618_v11, %v617_v13  ;;  %v718_v18 = vadd.f32 %v717_v14, %v716_v12 }
 0x11b   : > { %v720_v21 = vadd.f32 %v719_v26, %v718_v18  ;;  %v621_v22 = vadd.f32 %v620_v20, %v619_v16 }
 0x11d   : > { %v623_v25 = vadd.f32 %v622_v23, %v621_v22  ;;  %v722_v28 = vadd.f32 %v721_v27, %v720_v21 }
 0x11f   : > { %v625_v31 = vadd.f32 %v624_v30, %v623_v25  ;;  %v724_v40 = vadd.f32 %v723_v29, %v722_v28 }
 0x121   : > { %v626_v32 = vrot.slane %v625_v31, 4  ;;  %v726_v34 = vadd.f32 %v725_v2, %v724_v40 }
 0x123   : > { %v627_v36 = vadd.f32 %v626_v32, %v625_v31  ;;  %v727_v43 = vrot.slane %v726_v34, 4 }
 0x125   : > { %v628_v24 = vrot.slane %v627_v36, 2  ;;  %v728_v37 = vadd.f32 %v727_v43, %v726_v34 }
 0x127   : > { %v629_v38 = vadd.f32 %v628_v24, %v627_v36  ;;  %v729_v39 = vrot.slane %v728_v37, 2 }
 0x129   : > { %v630_v41 = vrot.slane %v629_v38, 1  ;;  %v730_v33 = vadd.f32 %v729_v39, %v728_v37 }
 0x12b   : > { %v731_v42 = vrot.slane %v730_v33, 1  ;;  %v631_v44 = vadd.f32 %v630_v41, %v629_v38 }
 0x12d   : > { %v732_v45 = vadd.f32 %v731_v42, %v730_v33 }
 0x12e   : > { %742 = sbr.rel (%p1013_p5) target bundleno = 382 (0x17e), region = 44 }
 0x12f   : > { %v735_v59 = vsel %vm734_vm5, %v631_v44, %v732_v45 }
 0x130   : > { %v736_v53 = vadd.f32 %v735_v59, %v733_v46 }
 0x132   : > { %738 = vst.msk [vmem:[#allocation2] sm:$0x3] %vm737_vm6, %v736_v53 }
 0x133   : > { %v752_v57 = vld [vmem:[%s1635_s2] sm:$0x1] }
 0x134   : > { %v1441_v60 = vld [vmem:[%s1636_s3] sm:$0x1] }
 0x139   : > { %v743_v48 = vld [vmem:[#allocation2] sm:$0x1]  ;;  %v745_v49 = vld [vmem:[#allocation2 + $0x1] sm:$0x1] }
 0x13a   : > { %v744_v51 = vmul.f32 0.00024414063, %v743_v48  ;;  %v746_v52 = vmul.f32 0.00024414063, %v745_v49 }
 0x13c   : > { %v747_v54 = vmul.f32 %v744_v51, %v744_v51 }
 0x13e   : > { %v748_v4 = vsub.f32 %v746_v52, %v747_v54 }
 0x140   : > { %v749_v55 = vmax.f32 %v748_v4, 0.0 }
 0x142   : > { %v750_v56 = vadd.f32 1e-05, %v749_v55 }
 0x144   : > { %1105 = vrsqrt.f32 %v750_v56 }
 0x151   : > { %v1106_v47 = vpop.eup %1105 }
 0x152   : > { %v1436_v58 = vmul.f32 %v1106_v47, %v752_v57 }
 0x154   : > { %v1444_v62 = vmul.f32 %v1436_v58, %v744_v51 }
 0x156   : > { %v756_v63 = vsub.f32 %v1441_v60, %v1444_v62 }
 0x157 LB: >> { %v797_v61 = vlaneseq  ;;  %s1014_s7 = sshll.u32 %s1121_s6, 8  ;;  %s762_s6 = sadd.s32 1, %s1121_s6   ;;  %s1121_s6 = sphi %s1448_s6, %s762_s6  }
 0x158   : >> { %s1457_s10 = scalar_lea.vmem %s1637_s4, %s1014_s7  ;;  %p759_p6 = scmp.ge.s32.totalorder %s762_s6, 16  }
 0x159   : >> { %v798_v0 = vshrl.u32 %v797_v61, 7  ;;  %v765_v1 = vld [vmem:[%s1457_s10] sm:$0xff]  ;;  %v766_v5 = vld [vmem:[%s1457_s10 + $0x8] sm:$0xff]  ;;  %v767_v17 = vld [vmem:[%s1457_s10 + $0x10] sm:$0xff] }
 0x15a   : >> { %v768_v6 = vld [vmem:[%s1457_s10 + $0x18] sm:$0xff]  ;;  %v769_v7 = vld [vmem:[%s1457_s10 + $0x20] sm:$0xff]  ;;  %v770_v10 = vld [vmem:[%s1457_s10 + $0x28] sm:$0xff] }
 0x15b   : >> { %v799_v3 = vsub.s32 0, %v798_v0  ;;  %v771_v35 = vld [vmem:[%s1457_s10 + $0x30] sm:$0xff]  ;;  %v772_v12 = vld [vmem:[%s1457_s10 + $0x38] sm:$0xff]  ;;  %v773_v50 = vld [vmem:[%s1457_s10 + $0x40] sm:$0xff] }
 0x15c   : >> { %v774_v27 = vld [vmem:[%s1457_s10 + $0x48] sm:$0xff]  ;;  %v775_v25 = vld [vmem:[%s1457_s10 + $0x50] sm:$0xff]  ;;  %v776_v40 = vld [vmem:[%s1457_s10 + $0x58] sm:$0xff] }
 0x15d   : >> { %v1465_v8 = vrot.slane %v1436_v58, %v799_v3  ;;  %v1470_v9 = vrot.slane %v756_v63, %v799_v3  ;;  %v777_v2 = vld [vmem:[%s1457_s10 + $0x60] sm:$0xff]  ;;  %v778_v32 = vld [vmem:[%s1457_s10 + $0x68] sm:$0xff]  ;;  %v779_v37 = vld [vmem:[%s1457_s10 + $0x70] sm:$0xff] }
 0x15e   : >> { %v780_v38 = vld [vmem:[%s1457_s10 + $0x78] sm:$0xff]  ;;  %v781_v56 = vld [vmem:[%s1457_s10 + $0x80] sm:$0xff]  ;;  %v782_v57 = vld [vmem:[%s1457_s10 + $0x88] sm:$0xff] }
 0x15f   : >> { %v801_v13 = vmul.f32 %v1465_v8, %v765_v1  ;;  %v802_v14 = vmul.f32 %v1465_v8, %v766_v5  ;;  %v803_v11 = vmul.f32 %v1465_v8, %v767_v17  ;;  %v804_v15 = vmul.f32 %v1465_v8, %v768_v6  ;;  %v783_v47 = vld [vmem:[%s1457_s10 + $0x90] sm:$0xff]  ;;  %v784_v5 = vld [vmem:[%s1457_s10 + $0x98] sm:$0xff]  ;;  %v785_v17 = vld [vmem:[%s1457_s10 + $0xa0] sm:$0xff] }
 0x160   : >> { %v805_v16 = vmul.f32 %v1465_v8, %v769_v7  ;;  %v806_v18 = vmul.f32 %v1465_v8, %v770_v10  ;;  %v807_v19 = vmul.f32 %v1465_v8, %v771_v35  ;;  %v808_v26 = vmul.f32 %v1465_v8, %v772_v12  ;;  %v786_v6 = vld [vmem:[%s1457_s10 + $0xa8] sm:$0xff] }
 0x161   : >> { %v839_v20 = vadd.f32 %v1470_v9, %v801_v13  ;;  %v840_v21 = vadd.f32 %v1470_v9, %v802_v14  ;;  %v841_v22 = vadd.f32 %v1470_v9, %v803_v11  ;;  %v842_v23 = vadd.f32 %v1470_v9, %v804_v15  ;;  %v787_v13 = vld [vmem:[%s1457_s10 + $0xb0] sm:$0xff]  ;;  %v788_v14 = vld [vmem:[%s1457_s10 + $0xb8] sm:$0xff] }
 0x162   : >> { %v843_v28 = vadd.f32 %v1470_v9, %v805_v16  ;;  %v844_v29 = vadd.f32 %v1470_v9, %v806_v18  ;;  %v845_v30 = vadd.f32 %v1470_v9, %v807_v19  ;;  %v846_v31 = vadd.f32 %v1470_v9, %v808_v26 }
 0x163   : >> { %v871_v34 = vmax.f32 %v839_v20, 0.0  ;;  %v872_v36 = vmax.f32 %v840_v21, 0.0  ;;  %v873_v43 = vmax.f32 %v841_v22, 0.0  ;;  %v874_v24 = vmax.f32 %v842_v23, 0.0 }
 0x164   : >> { %v875_v39 = vmax.f32 %v843_v28, 0.0  ;;  %v876_v41 = vmax.f32 %v844_v29, 0.0  ;;  %v877_v33 = vmax.f32 %v845_v30, 0.0  ;;  %v878_v42 = vmax.f32 %v846_v31, 0.0  ;;  %v789_v31 = vld [vmem:[%s1457_s10 + $0xc0] sm:$0xff] }
 0x165   : >> { %903 = vst.msk [vmem:[%s1457_s10] sm:$0xff] %vm530_vm4, %v871_v34  ;;  %904 = vst.msk [vmem:[%s1457_s10 + $0x8] sm:$0xff] %vm530_vm4, %v872_v36  ;;  %v809_v44 = vmul.f32 %v1465_v8, %v773_v50  ;;  %v810_v45 = vmul.f32 %v1465_v8, %v774_v27  ;;  %v811_v46 = vmul.f32 %v1465_v8, %v775_v25 }
 0x166   : >> { %905 = vst.msk [vmem:[%s1457_s10 + $0x10] sm:$0xff] %vm530_vm4, %v873_v43  ;;  %906 = vst.msk [vmem:[%s1457_s10 + $0x18] sm:$0xff] %vm530_vm4, %v874_v24  ;;  %v812_v59 = vmul.f32 %v1465_v8, %v776_v40  ;;  %v813_v53 = vmul.f32 %v1465_v8, %v777_v2  ;;  %v814_v48 = vmul.f32 %v1465_v8, %v778_v32  ;;  %v790_v40 = vld [vmem:[%s1457_s10 + $0xc8] sm:$0xff]  ;;  %v791_v2 = vld [vmem:[%s1457_s10 + $0xd0] sm:$0xff] }
 0x167   : >> { %907 = vst.msk [vmem:[%s1457_s10 + $0x20] sm:$0xff] %vm530_vm4, %v875_v39  ;;  %908 = vst.msk [vmem:[%s1457_s10 + $0x28] sm:$0xff] %vm530_vm4, %v876_v41  ;;  %v815_v49 = vmul.f32 %v1465_v8, %v779_v37  ;;  %v816_v51 = vmul.f32 %v1465_v8, %v780_v38  ;;  %v847_v52 = vadd.f32 %v1470_v9, %v809_v44  ;;  %v792_v24 = vld [vmem:[%s1457_s10 + $0xd8] sm:$0xff]  ;;  %v793_v37 = vld [vmem:[%s1457_s10 + $0xe0] sm:$0xff] }
 0x168   : >> { %909 = vst.msk [vmem:[%s1457_s10 + $0x30] sm:$0xff] %vm530_vm4, %v877_v33  ;;  %910 = vst.msk [vmem:[%s1457_s10 + $0x38] sm:$0xff] %vm530_vm4, %v878_v42  ;;  %v848_v54 = vadd.f32 %v1470_v9, %v810_v45  ;;  %v849_v4 = vadd.f32 %v1470_v9, %v811_v46  ;;  %v850_v55 = vadd.f32 %v1470_v9, %v812_v59  ;;  %v794_v38 = vld [vmem:[%s1457_s10 + $0xe8] sm:$0xff]  ;;  %v795_v44 = vld [vmem:[%s1457_s10 + $0xf0] sm:$0xff] }
 0x169   : >> { %v851_v61 = vadd.f32 %v1470_v9, %v813_v53  ;;  %v852_v0 = vadd.f32 %v1470_v9, %v814_v48  ;;  %v853_v1 = vadd.f32 %v1470_v9, %v815_v49  ;;  %v854_v3 = vadd.f32 %v1470_v9, %v816_v51  ;;  %v796_v45 = vld [vmem:[%s1457_s10 + $0xf8] sm:$0xff] }
 0x16a   : >> { %v879_v7 = vmax.f32 %v847_v52, 0.0  ;;  %v880_v10 = vmax.f32 %v848_v54, 0.0  ;;  %v881_v35 = vmax.f32 %v849_v4, 0.0  ;;  %v882_v12 = vmax.f32 %v850_v55, 0.0 }
 0x16b   : >> { %v883_v11 = vmax.f32 %v851_v61, 0.0  ;;  %v884_v15 = vmax.f32 %v852_v0, 0.0  ;;  %v885_v16 = vmax.f32 %v853_v1, 0.0  ;;  %v886_v18 = vmax.f32 %v854_v3, 0.0 }
 0x16c   : >> { %911 = vst.msk [vmem:[%s1457_s10 + $0x40] sm:$0xff] %vm530_vm4, %v879_v7  ;;  %912 = vst.msk [vmem:[%s1457_s10 + $0x48] sm:$0xff] %vm530_vm4, %v880_v10  ;;  %v817_v19 = vmul.f32 %v1465_v8, %v781_v56  ;;  %v818_v26 = vmul.f32 %v1465_v8, %v782_v57  ;;  %v819_v20 = vmul.f32 %v1465_v8, %v783_v47 }
 0x16d   : >> { %913 = vst.msk [vmem:[%s1457_s10 + $0x50] sm:$0xff] %vm530_vm4, %v881_v35  ;;  %914 = vst.msk [vmem:[%s1457_s10 + $0x58] sm:$0xff] %vm530_vm4, %v882_v12  ;;  %v820_v21 = vmul.f32 %v1465_v8, %v784_v5  ;;  %v821_v22 = vmul.f32 %v1465_v8, %v785_v17  ;;  %v822_v23 = vmul.f32 %v1465_v8, %v786_v6 }
 0x16e   : >> { %915 = vst.msk [vmem:[%s1457_s10 + $0x60] sm:$0xff] %vm530_vm4, %v883_v11  ;;  %916 = vst.msk [vmem:[%s1457_s10 + $0x68] sm:$0xff] %vm530_vm4, %v884_v15  ;;  %v823_v50 = vmul.f32 %v1465_v8, %v787_v13  ;;  %v824_v27 = vmul.f32 %v1465_v8, %v788_v14  ;;  %v855_v25 = vadd.f32 %v1470_v9, %v817_v19 }
 0x16f   : >> { %917 = vst.msk [vmem:[%s1457_s10 + $0x70] sm:$0xff] %vm530_vm4, %v885_v16  ;;  %918 = vst.msk [vmem:[%s1457_s10 + $0x78] sm:$0xff] %vm530_vm4, %v886_v18  ;;  %v856_v28 = vadd.f32 %v1470_v9, %v818_v26  ;;  %v857_v29 = vadd.f32 %v1470_v9, %v819_v20  ;;  %v858_v30 = vadd.f32 %v1470_v9, %v820_v21 }
 0x170   : >> { %v859_v32 = vadd.f32 %v1470_v9, %v821_v22  ;;  %v860_v34 = vadd.f32 %v1470_v9, %v822_v23  ;;  %v861_v36 = vadd.f32 %v1470_v9, %v823_v50  ;;  %v862_v43 = vadd.f32 %v1470_v9, %v824_v27 }
 0x171   : >> { %v887_v39 = vmax.f32 %v855_v25, 0.0  ;;  %v888_v41 = vmax.f32 %v856_v28, 0.0  ;;  %v889_v33 = vmax.f32 %v857_v29, 0.0  ;;  %v890_v42 = vmax.f32 %v858_v30, 0.0 }
 0x172   : >> { %v891_v46 = vmax.f32 %v859_v32, 0.0  ;;  %v892_v59 = vmax.f32 %v860_v34, 0.0  ;;  %v893_v53 = vmax.f32 %v861_v36, 0.0  ;;  %v894_v48 = vmax.f32 %v862_v43, 0.0 }
 0x173   : >> { %919 = vst.msk [vmem:[%s1457_s10 + $0x80] sm:$0xff] %vm530_vm4, %v887_v39  ;;  %920 = vst.msk [vmem:[%s1457_s10 + $0x88] sm:$0xff] %vm530_vm4, %v888_v41  ;;  %v825_v49 = vmul.f32 %v1465_v8, %v789_v31  ;;  %v826_v51 = vmul.f32 %v1465_v8, %v790_v40  ;;  %v827_v52 = vmul.f32 %v1465_v8, %v791_v2 }
 0x174   : >> { %921 = vst.msk [vmem:[%s1457_s10 + $0x90] sm:$0xff] %vm530_vm4, %v889_v33  ;;  %922 = vst.msk [vmem:[%s1457_s10 + $0x98] sm:$0xff] %vm530_vm4, %v890_v42  ;;  %v828_v54 = vmul.f32 %v1465_v8, %v792_v24  ;;  %v829_v4 = vmul.f32 %v1465_v8, %v793_v37  ;;  %v830_v55 = vmul.f32 %v1465_v8, %v794_v38 }
 0x175   : >> { %923 = vst.msk [vmem:[%s1457_s10 + $0xa0] sm:$0xff] %vm530_vm4, %v891_v46  ;;  %924 = vst.msk [vmem:[%s1457_s10 + $0xa8] sm:$0xff] %vm530_vm4, %v892_v59  ;;  %v831_v56 = vmul.f32 %v1465_v8, %v795_v44  ;;  %v832_v57 = vmul.f32 %v1465_v8, %v796_v45  ;;  %v863_v47 = vadd.f32 %v1470_v9, %v825_v49 }
 0x176   : >> { %925 = vst.msk [vmem:[%s1457_s10 + $0xb0] sm:$0xff] %vm530_vm4, %v893_v53  ;;  %926 = vst.msk [vmem:[%s1457_s10 + $0xb8] sm:$0xff] %vm530_vm4, %v894_v48  ;;  %v864_v61 = vadd.f32 %v1470_v9, %v826_v51  ;;  %v865_v0 = vadd.f32 %v1470_v9, %v827_v52  ;;  %v866_v1 = vadd.f32 %v1470_v9, %v828_v54 }
 0x177   : >> { %v867_v3 = vadd.f32 %v1470_v9, %v829_v4  ;;  %v868_v5 = vadd.f32 %v1470_v9, %v830_v55  ;;  %v869_v8 = vadd.f32 %v1470_v9, %v831_v56  ;;  %v870_v17 = vadd.f32 %v1470_v9, %v832_v57 }
 0x178   : >> { %v895_v6 = vmax.f32 %v863_v47, 0.0  ;;  %v896_v7 = vmax.f32 %v864_v61, 0.0  ;;  %v897_v10 = vmax.f32 %v865_v0, 0.0  ;;  %v898_v35 = vmax.f32 %v866_v1, 0.0 }
 0x179   : >> { %v899_v12 = vmax.f32 %v867_v3, 0.0  ;;  %v900_v13 = vmax.f32 %v868_v5, 0.0  ;;  %v901_v14 = vmax.f32 %v869_v8, 0.0  ;;  %v902_v11 = vmax.f32 %v870_v17, 0.0  ;;  %761 = sbr.rel (!%p759_p6) target bundleno = 343 (0x157), region = 79 }
 0x17a   : >> { %927 = vst.msk [vmem:[%s1457_s10 + $0xc0] sm:$0xff] %vm530_vm4, %v895_v6  ;;  %928 = vst.msk [vmem:[%s1457_s10 + $0xc8] sm:$0xff] %vm530_vm4, %v896_v7 }
 0x17b   : >> { %929 = vst.msk [vmem:[%s1457_s10 + $0xd0] sm:$0xff] %vm530_vm4, %v897_v10  ;;  %930 = vst.msk [vmem:[%s1457_s10 + $0xd8] sm:$0xff] %vm530_vm4, %v898_v35 }
 0x17c   : >> { %931 = vst.msk [vmem:[%s1457_s10 + $0xe0] sm:$0xff] %vm530_vm4, %v899_v12  ;;  %932 = vst.msk [vmem:[%s1457_s10 + $0xe8] sm:$0xff] %vm530_vm4, %v900_v13 }
 0x17d   : >> { %933 = vst.msk [vmem:[%s1457_s10 + $0xf0] sm:$0xff] %vm530_vm4, %v901_v14  ;;  %934 = vst.msk [vmem:[%s1457_s10 + $0xf8] sm:$0xff] %vm530_vm4, %v902_v11 }
 0x17e PF: > { %s14_s15 = sadd.s32 1, %s1117_s15  }
 0x17f   : > { %p11_p7 = scmp.ge.s32.totalorder %s14_s15, 18  }
 0x181   :  { %13 = sbr.rel (!%p11_p7) target bundleno = 1 (0x1), region = 90 }

// kernel: reference_encoder_forward.8
= control target key start
LH: loop header
LB: loop body
LE: loop exit
PB: predicated region body
PF: predicated region fallthrough
CT: control target
= control target key end

     0   :  { %s1877_s15 = smov 0   ;;  %s2425_s0 = inlined_call_operand.vmem [shape: bf16[1024,288], index: 0, kind: input, shape index: {}]   ;;  %s2426_s1 = inlined_call_operand.vmem [shape: bf16[288,32], index: 1, kind: input, shape index: {}]   ;;  %s2427_s2 = inlined_call_operand.vmem [shape: f32[1,32], index: 2, kind: input, shape index: {}]   ;;  %s2428_s3 = inlined_call_operand.vmem [shape: f32[1,32], index: 3, kind: input, shape index: {}]   ;;  %s2429_s4 = inlined_call_operand.vmem [shape: f32[4,256,32], index: 4, kind: output, shape index: {}]  }
   0x1 LB: > { %s1883_s16 = sadd.s32 4294967295, %s1845_s15   ;;  %p1460_p0 = scmp.ge.s32.totalorder %s1845_s15, 1  ;;  %s1845_s15 = sphi %s1877_s15, %s14_s15  }
   0x2   : > { %p159_p1 = scmp.lt.s32.totalorder %s1845_s15, 5 }
   0x4   : > { %p160_p2 = pnand %p1460_p0, %p159_p1 }
   0x5   : > { %s1461_s17 = sshll.u32 (!%p160_p2), %s1883_s16, 5  ;;  %p1463_p4 = scmp.ne.s32.totalorder (!%p160_p2), %s1883_s16, 0 }
   0x6   : > { %163 = sbr.rel (%p160_p2) target bundleno = 454 (0x1c6), region = 36  ;;  %p182_p3 = scmp.lt.s32.totalorder (!%p160_p2), %s1461_s17, 127 }
   0xb   : > { %s2431_s17 = smov (!%p182_p3, %s1461_s17), 127  ;;  %192 = sbr.rel (%p1463_p4) target bundleno = 18 (0x12), region = 40 }
   0xc   : > { %s1733_s18 = smul.u32 12, %s2431_s17 }
   0xe   : > { %s1891_s21 = scalar_lea.vmem %s2425_s0, %s1733_s18 }
  0x10   : > { %vm193_vm0 = vcmask 254976   ;;  %v1851_v0 = vmov 0.0  }
  0x11   : > { %194 = vst.msk [vmem:[#allocation2] sm:$0x3] %vm193_vm0, %v1851_v0 }
  0x12 PF: > { %v1751_v1 = vld [vmem:[%s2426_s1 + $0x78] sm:$0xff]   ;;  %v1753_v3 = vld [vmem:[%s2426_s1 + $0x70] sm:$0xff]   ;;  %v1755_v5 = vld [vmem:[%s2426_s1 + $0x68] sm:$0xff]   ;;  %vm643_vm1 = vcmask 261120   ;;  %vm1219_vm2 = vcmask 1040384   ;;  %vm1222_vm3 = vcmask 254976  }
  0x13   : > { %v1752_v2 = vld [vmem:[%s2426_s1 + $0x38] sm:$0xff]   ;;  %1551 = vmatprep.subr.bf16.mxu0 %v1751_v1  ;;  %1717 = vmatprep.subr.bf16.mxu1 %v1751_v1  ;;  %v1754_v4 = vld [vmem:[%s2426_s1 + $0x30] sm:$0xff]   ;;  %v1756_v6 = vld [vmem:[%s2426_s1 + $0x28] sm:$0xff]   ;;  %p1547_p5 = scmp.ne.s32.totalorder %s1883_s16, 3 }
  0x14   : > { %1552 = vmatpush3.bf16.msra.mxu0 %v1752_v2  ;;  %1725 = vmatpush3.bf16.msra.mxu1 %v1752_v2  ;;  %v1757_v7 = vld [vmem:[%s2426_s1 + $0x60] sm:$0xff]   ;;  %v1759_v9 = vld [vmem:[%s2426_s1 + $0x58] sm:$0xff]   ;;  %v1761_v11 = vld [vmem:[%s2426_s1 + $0x50] sm:$0xff]  }
  0x15   : > { %1553 = vmatprep.subr.bf16.mxu0 %v1753_v3  ;;  %1718 = vmatprep.subr.bf16.mxu1 %v1753_v3  ;;  %v1758_v8 = vld [vmem:[%s2426_s1 + $0x20] sm:$0xff]   ;;  %v1760_v10 = vld [vmem:[%s2426_s1 + $0x18] sm:$0xff]   ;;  %v1762_v14 = vld [vmem:[%s2426_s1 + $0x10] sm:$0xff]  }
  0x16   : > { %v1769_v12 = vld [vmem:[%s1891_s21 + $0x4] ss:$12 sps:$4 sm:$0xff]   ;;  %v1763_v15 = vld [vmem:[%s2426_s1 + $0x48] sm:$0xff]   ;;  %v1780_v27 = vld [vmem:[%s1891_s21 + $0x34] ss:$12 sps:$4 sm:$0xff]  }
  0x17   : > { %v1772_v13 = vld [vmem:[%s1891_s21 + $0x124] ss:$12 sps:$4 sm:$0xff]   ;;  %724 = vmatprep.mubr.bf16.mxu0 %v1769_v12  ;;  %v1764_v16 = vld [vmem:[%s2426_s1 + $0x8] sm:$0xff]   ;;  %v1782_v28 = vld [vmem:[%s1891_s21 + $0x154] ss:$12 sps:$4 sm:$0xff]  }
  0x18   : > { %1554 = vmatpush3.bf16.msra.mxu0 %v1754_v4  ;;  %1726 = vmatpush3.bf16.msra.mxu1 %v1754_v4  ;;  %v1765_v17 = vld [vmem:[%s2426_s1 + $0x40] sm:$0xff]   ;;  %v1779_v19 = vld [vmem:[%s2426_s1 + $0x88] sm:$0xff]   ;;  %v1784_v29 = vld [vmem:[%s1891_s21 + $0x30] ss:$12 sps:$4 sm:$0xff]  }
  0x19   : > { %1555 = vmatprep.subr.bf16.mxu0 %v1755_v5  ;;  %1719 = vmatprep.subr.bf16.mxu1 %v1755_v5  ;;  %v1766_v18 = vld [vmem:[%s2426_s1] sm:$0xff]   ;;  %v1773_v22 = vld [vmem:[%s1891_s21 + $0x1c] ss:$12 sps:$4 sm:$0xff]   ;;  %v1786_v31 = vld [vmem:[%s1891_s21 + $0x4c] ss:$12 sps:$4 sm:$0xff]  }
  0x1a   : > { %820 = vmatprep.mubr.bf16.mxu1 %v1772_v13  ;;  %v1767_v20 = vld [vmem:[%s1891_s21] ss:$12 sps:$4 sm:$0xff]   ;;  %v1775_v23 = vld [vmem:[%s1891_s21 + $0x13c] ss:$12 sps:$4 sm:$0xff]   ;;  %v1777_v25 = vld [vmem:[%s1891_s21 + $0x18] ss:$12 sps:$4 sm:$0xff]  }
  0x1b   : > { %v1770_v21 = vld [vmem:[%s1891_s21 + $0x120] ss:$12 sps:$4 sm:$0xff]   ;;  %v1778_v26 = vld [vmem:[%s1891_s21 + $0x138] ss:$12 sps:$4 sm:$0xff]   ;;  %v1785_v30 = vld [vmem:[%s1891_s21 + $0x150] ss:$12 sps:$4 sm:$0xff]  }
  0x1c   : > { %1556 = vmatpush3.bf16.msra.mxu0 %v1756_v6  ;;  %1727 = vmatpush3.bf16.msra.mxu1 %v1756_v6  ;;  %v1792_v24 = vld [vmem:[%s2426_s1 + $0x80] sm:$0xff]   ;;  %v1788_v32 = vld [vmem:[%s1891_s21 + $0x16c] ss:$12 sps:$4 sm:$0xff]   ;;  %v1790_v33 = vld [vmem:[%s1891_s21 + $0x48] ss:$12 sps:$4 sm:$0xff]  }
  0x1d   : > { %1557 = vmatprep.subr.bf16.mxu0 %v1757_v7  ;;  %1720 = vmatprep.subr.bf16.mxu1 %v1757_v7  ;;  %v1791_v34 = vld [vmem:[%s1891_s21 + $0x168] ss:$12 sps:$4 sm:$0xff]   ;;  %v1793_v35 = vld [vmem:[%s1891_s21 + $0x64] ss:$12 sps:$4 sm:$0xff]   ;;  %v1796_v37 = vld [vmem:[%s1891_s21 + $0x60] ss:$12 sps:$4 sm:$0xff]  }
  0x1e   : > { %v1795_v36 = vld [vmem:[%s1891_s21 + $0x8] ss:$12 sps:$4 sm:$0xff]   ;;  %v1797_v38 = vld [vmem:[%s1891_s21 + $0x20] ss:$12 sps:$4 sm:$0xff]   ;;  %v1800_v40 = vld [vmem:[%s1891_s21 + $0x38] ss:$12 sps:$4 sm:$0xff]  }
  0x1f   : > { %v1798_v39 = vld [vmem:[%s1891_s21 + $0x7c] ss:$12 sps:$4 sm:$0xff]   ;;  %v1801_v41 = vld [vmem:[%s1891_s21 + $0x78] ss:$12 sps:$4 sm:$0xff]   ;;  %v1803_v43 = vld [vmem:[%s1891_s21 + $0x94] ss:$12 sps:$4 sm:$0xff]  }
  0x20   : > { %1558 = vmatpush3.bf16.msra.mxu0 %v1758_v8  ;;  %1728 = vmatpush3.bf16.msra.mxu1 %v1758_v8  ;;  %v1802_v42 = vld [vmem:[%s1891_s21 + $0x50] ss:$12 sps:$4 sm:$0xff]   ;;  %v1805_v44 = vld [vmem:[%s1891_s21 + $0x68] ss:$12 sps:$4 sm:$0xff]   ;;  %v1807_v46 = vld [vmem:[%s1891_s21 + $0x80] ss:$12 sps:$4 sm:$0xff]  }
  0x21   : > { %1559 = vmatprep.subr.bf16.mxu0 %v1759_v9  ;;  %1721 = vmatprep.subr.bf16.mxu1 %v1759_v9  ;;  %v1806_v45 = vld [vmem:[%s1891_s21 + $0x90] ss:$12 sps:$4 sm:$0xff]   ;;  %v1808_v47 = vld [vmem:[%s1891_s21 + $0xac] ss:$12 sps:$4 sm:$0xff]   ;;  %v1811_v49 = vld [vmem:[%s1891_s21 + $0xa8] ss:$12 sps:$4 sm:$0xff]  }
  0x22   : > { %v1810_v48 = vld [vmem:[%s1891_s21 + $0x98] ss:$12 sps:$4 sm:$0xff]   ;;  %v1812_v50 = vld [vmem:[%s1891_s21 + $0xb0] ss:$12 sps:$4 sm:$0xff]   ;;  %v1815_v52 = vld [vmem:[%s1891_s21 + $0xc8] ss:$12 sps:$4 sm:$0xff]  }
  0x23   : > { %v1813_v51 = vld [vmem:[%s1891_s21 + $0xc4] ss:$12 sps:$4 sm:$0xff]   ;;  %v1816_v53 = vld [vmem:[%s1891_s21 + $0xc0] ss:$12 sps:$4 sm:$0xff]   ;;  %v1818_v55 = vld [vmem:[%s1891_s21 + $0xdc] ss:$12 sps:$4 sm:$0xff]  }
  0x24   : > { %1560 = vmatpush3.bf16.msra.mxu0 %v1760_v10  ;;  %1729 = vmatpush3.bf16.msra.mxu1 %v1760_v10  ;;  %v1817_v54 = vld [vmem:[%s1891_s21 + $0xe0] ss:$12 sps:$4 sm:$0xff]   ;;  %v1820_v56 = vld [vmem:[%s1891_s21 + $0xf8] ss:$12 sps:$4 sm:$0xff]   ;;  %v1822_v58 = vld [vmem:[%s1891_s21 + $0x110] ss:$12 sps:$4 sm:$0xff]  }
  0x25   : > { %1561 = vmatprep.subr.bf16.mxu0 %v1761_v11  ;;  %1722 = vmatprep.subr.bf16.mxu1 %v1761_v11  ;;  %v1821_v57 = vld [vmem:[%s1891_s21 + $0xd8] ss:$12 sps:$4 sm:$0xff]   ;;  %v1823_v59 = vld [vmem:[%s1891_s21 + $0xf4] ss:$12 sps:$4 sm:$0xff]   ;;  %v1826_v61 = vld [vmem:[%s1891_s21 + $0xf0] ss:$12 sps:$4 sm:$0xff]  }
  0x26   : > { %v1825_v60 = vld [vmem:[%s1891_s21 + $0x128] ss:$12 sps:$4 sm:$0xff]   ;;  %v1827_v62 = vld [vmem:[%s1891_s21 + $0x140] ss:$12 sps:$4 sm:$0xff]   ;;  %v1830_v0 = vld [vmem:[%s1891_s21 + $0x158] ss:$12 sps:$4 sm:$0xff]  }
  0x27   : > { %v1828_v63 = vld [vmem:[%s1891_s21 + $0x10c] ss:$12 sps:$4 sm:$0xff]   ;;  %v1831_v1 = vld [vmem:[%s1891_s21 + $0x108] ss:$12 sps:$4 sm:$0xff]   ;;  %v1832_v2 = vld [vmem:[%s1891_s21 + $0x170] ss:$12 sps:$4 sm:$0xff]  }
  0x28   : > { %1562 = vmatpush3.bf16.msra.mxu0 %v1762_v14  ;;  %1730 = vmatpush3.bf16.msra.mxu1 %v1762_v14  ;;  %s1546_s21 = sshll.u32 %s1883_s16, 8  ;;  %s2240_s16 = smov (!%p1547_p5), 0  }
  0x29   : > { %1563 = vmatprep.subr.bf16.mxu0 %v1763_v15  ;;  %1723 = vmatprep.subr.bf16.mxu1 %v1763_v15  ;;  %s2036_s11 = scalar_lea.vmem %s2429_s4, %s1546_s21 }
  0x2c   : > { %1564 = vmatpush3.bf16.msra.mxu0 %v1764_v16  ;;  %1731 = vmatpush3.bf16.msra.mxu1 %v1764_v16 }
  0x2d   : > { %1565 = vmatprep.subr.bf16.mxu0 %v1765_v17  ;;  %1724 = vmatprep.subr.bf16.mxu1 %v1765_v17 }
  0x30   : > { %1566 = vmatpush3.bf16.msra.mxu0 %v1766_v18  ;;  %1732 = vmatpush3.bf16.msra.mxu1 %v1766_v18 }
  0x31   : > { %1681 = vmatprep.subr.bf16.mxu1 %v1779_v19 }
  0x33   : > { %725 = vmatmul.mubr.bf16.vlgmr.msra.gmra.mxu0 %v1767_v20  ;;  %821 = vmatmul.mubr.bf16.vlgmr.msra.gmra.mxu1 %v1770_v21 }
  0x34   : > { %732 = vmatprep.mubr.bf16.mxu0 %v1773_v22  ;;  %828 = vmatprep.mubr.bf16.mxu1 %v1775_v23 }
  0x35   : > { %1682 = vmatpush3.bf16.msra.mxu1 %v1779_v19 }
  0x36   : > { %1683 = vmatprep.subr.bf16.mxu1 %v1792_v24 }
  0x39   : > { %1684 = vmatpush3.bf16.msra.mxu1 %v1792_v24 }
  0x3b   : > { %733 = vmatmul.mubr.bf16.gmra.mxu0 %v1777_v25  ;;  %829 = vmatmul.mubr.bf16.gmra.mxu1 %v1778_v26 }
  0x3c   : > { %740 = vmatprep.mubr.bf16.mxu0 %v1780_v27  ;;  %836 = vmatprep.mubr.bf16.mxu1 %v1782_v28 }
  0x43   : > { %741 = vmatmul.mubr.bf16.gmra.mxu0 %v1784_v29  ;;  %837 = vmatmul.mubr.bf16.gmra.mxu1 %v1785_v30 }
  0x44   : > { %748 = vmatprep.mubr.bf16.mxu0 %v1786_v31  ;;  %844 = vmatprep.mubr.bf16.mxu1 %v1788_v32 }
  0x4b   : > { %749 = vmatmul.mubr.bf16.gmra.mxu0 %v1790_v33  ;;  %845 = vmatmul.mubr.bf16.gmra.mxu1 %v1791_v34 }
  0x4c   : > { %756 = vmatprep.mubr.bf16.mxu0 %v1793_v35  ;;  %1685 = vmatprep.mubr.msk.bf16.mxu1 %vm643_vm1, %v1795_v36 }
  0x53   : > { %757 = vmatmul.mubr.bf16.gmra.mxu0 %v1796_v37  ;;  %1686 = vmatmul.mubr.msk.bf16.vlgmr.msra.gmra.mxu1 %vm643_vm1, %v1797_v38 }
  0x54   : > { %764 = vmatprep.mubr.bf16.mxu0 %v1798_v39  ;;  %1689 = vmatprep.mubr.msk.bf16.mxu1 %vm643_vm1, %v1800_v40 }
  0x5b   : > { %765 = vmatmul.mubr.bf16.gmra.mxu0 %v1801_v41  ;;  %1690 = vmatmul.mubr.msk.bf16.gmra.mxu1 %vm643_vm1, %v1802_v42 }
  0x5c   : > { %772 = vmatprep.mubr.bf16.mxu0 %v1803_v43  ;;  %1693 = vmatprep.mubr.msk.bf16.mxu1 %vm643_vm1, %v1805_v44 }
  0x63   : > { %773 = vmatmul.mubr.bf16.gmra.mxu0 %v1806_v45  ;;  %1694 = vmatmul.mubr.msk.bf16.gmra.mxu1 %vm643_vm1, %v1807_v46 }
  0x64   : > { %780 = vmatprep.mubr.bf16.mxu0 %v1808_v47  ;;  %1697 = vmatprep.mubr.msk.bf16.mxu1 %vm643_vm1, %v1810_v48 }
  0x6b   : > { %781 = vmatmul.mubr.bf16.gmra.mxu0 %v1811_v49  ;;  %1698 = vmatmul.mubr.msk.bf16.gmra.mxu1 %vm643_vm1, %v1812_v50 }
  0x6c   : > { %788 = vmatprep.mubr.bf16.mxu0 %v1813_v51  ;;  %1701 = vmatprep.mubr.msk.bf16.mxu1 %vm643_vm1, %v1815_v52 }
  0x73   : > { %789 = vmatmul.mubr.bf16.gmra.mxu0 %v1816_v53  ;;  %1702 = vmatmul.mubr.msk.bf16.gmra.mxu1 %vm643_vm1, %v1817_v54 }
  0x74   : > { %796 = vmatprep.mubr.bf16.mxu0 %v1818_v55  ;;  %1705 = vmatprep.mubr.msk.bf16.mxu1 %vm643_vm1, %v1820_v56 }
  0x7b   : > { %797 = vmatmul.mubr.bf16.gmra.mxu0 %v1821_v57  ;;  %1706 = vmatmul.mubr.msk.bf16.gmra.mxu1 %vm643_vm1, %v1822_v58 }
  0x7c   : > { %804 = vmatprep.mubr.bf16.mxu0 %v1823_v59  ;;  %1709 = vmatprep.mubr.msk.bf16.mxu1 %vm643_vm1, %v1825_v60 }
  0x83   : > { %805 = vmatmul.mubr.bf16.gmra.mxu0 %v1826_v61  ;;  %1710 = vmatmul.mubr.msk.bf16.gmra.mxu1 %vm643_vm1, %v1827_v62 }
  0x84   : > { %812 = vmatprep.mubr.bf16.mxu0 %v1828_v63  ;;  %1713 = vmatprep.mubr.msk.bf16.mxu1 %vm643_vm1, %v1830_v0 }
  0x8b   : > { %813 = vmatmul.mubr.bf16.gmra.mxu0 %v1831_v1  ;;  %1714 = vmatmul.mubr.msk.bf16.gmra.mxu1 %vm643_vm1, %v1832_v2 }
  0xf3   : > { %v1567_v3 = vpop.f32.mrf.mxu0  ;;  %v1639_v4 = vpop.f32.mrf.mxu1 }
  0xf5   : > { %v1568_v5 = vpop.f32.mrf.mxu0  ;;  %v1640_v6 = vpop.f32.mrf.mxu1 }
  0xf6   : > { %v2012_v7 = vadd.f32 %v1640_v6, %v1639_v4  ;;  %v1569_v44 = vadd.f32 %v1568_v5, %v1567_v3 }
  0xf7   : > { %v1570_v8 = vpop.f32.mrf.mxu0  ;;  %v1642_v9 = vpop.f32.mrf.mxu1 }
  0xf9   : > { %v1571_v10 = vpop.f32.mrf.mxu0  ;;  %v1643_v11 = vpop.f32.mrf.mxu1 }
  0xfa   : > { %v2014_v12 = vadd.f32 %v1643_v11, %v1642_v9  ;;  %v1572_v53 = vadd.f32 %v1571_v10, %v1570_v8 }
  0xfb   : > { %v1573_v13 = vpop.f32.mrf.mxu0  ;;  %v1645_v14 = vpop.f32.mrf.mxu1 }
  0xfd   : > { %v1574_v15 = vpop.f32.mrf.mxu0  ;;  %v1646_v16 = vpop.f32.mrf.mxu1 }
  0xfe   : > { %v2016_v17 = vadd.f32 %v1646_v16, %v1645_v14  ;;  %v1575_v41 = vadd.f32 %v1574_v15, %v1573_v13 }
  0xff   : > { %v1576_v18 = vpop.f32.mrf.mxu0  ;;  %v1648_v19 = vpop.f32.mrf.mxu1 }
 0x101   : > { %v1577_v20 = vpop.f32.mrf.mxu0  ;;  %v1649_v21 = vpop.f32.mrf.mxu1 }
 0x102   : > { %v2018_v22 = vadd.f32 %v1649_v21, %v1648_v19  ;;  %v1578_v48 = vadd.f32 %v1577_v20, %v1576_v18 }
 0x103   : > { %v1579_v23 = vpop.f32.mrf.mxu0  ;;  %v1651_v24 = vpop.f32.mrf.mxu1 }
 0x105   : > { %v1580_v25 = vpop.f32.mrf.mxu0  ;;  %v1652_v26 = vpop.f32.mrf.mxu1 }
 0x106   : > { %v2020_v27 = vadd.f32 %v1652_v26, %v1651_v24  ;;  %v1581_v61 = vadd.f32 %v1580_v25, %v1579_v23 }
 0x107   : > { %v1582_v28 = vpop.f32.mrf.mxu0  ;;  %v1654_v29 = vpop.f32.mrf.mxu1 }
 0x109   : > { %v1583_v30 = vpop.f32.mrf.mxu0  ;;  %v1655_v31 = vpop.f32.mrf.mxu1 }
 0x10a   : > { %v2022_v32 = vadd.f32 %v1655_v31, %v1654_v29  ;;  %v1584_v20 = vadd.f32 %v1583_v30, %v1582_v28 }
 0x10b   : > { %v1585_v33 = vpop.f32.mrf.mxu0  ;;  %v2024_v34 = vpop.f32.mrf.mxu1 }
 0x10d   : > { %v1586_v35 = vpop.f32.mrf.mxu0  ;;  %v2026_v36 = vpop.f32.mrf.mxu1 }
 0x10e   : > { %v1587_v56 = vadd.f32 %v1586_v35, %v1585_v33 }
 0x10f   : > { %v1588_v37 = vpop.f32.mrf.mxu0  ;;  %v2028_v38 = vpop.f32.mrf.mxu1 }
 0x111   : > { %v1589_v39 = vpop.f32.mrf.mxu0  ;;  %v2031_v40 = vpop.f32.mrf.mxu1 }
 0x112   : > { %v1590_v5 = vadd.f32 %v1589_v39, %v1588_v37 }
 0x113   : > { %v1591_v42 = vpop.f32.mrf.mxu0  ;;  %v1687_v43 = vpop.f32.mrf.mxu1 }
 0x114   : > { %v896_v45 = vadd.f32 %v1687_v43, %v1575_v41 }
 0x115   : > { %v1592_v46 = vpop.f32.mrf.mxu0  ;;  %v887_v47 = vpop.f32.mrf.mxu1 }
 0x116   : > { %1018 = vst.msk [vmem:[%s2036_s11 + $0x10] sm:$0xff] %vm643_vm1, %v896_v45  ;;  %v888_v49 = vadd.f32 %v1569_v44, %v887_v47  ;;  %v1119_v63 = vmul.f32 %v896_v45, %v896_v45  ;;  %v1051_v6 = vsel %vm643_vm1, %v896_v45, 0.0  ;;  %v1593_v41 = vadd.f32 %v1592_v46, %v1591_v42 }
 0x117   : > { %v2040_v50 = vpop.f32.mrf.mxu0  ;;  %v1688_v51 = vpop.f32.mrf.mxu1 }
 0x118   : > { %1016 = vst.msk [vmem:[%s2036_s11] sm:$0xff] %vm643_vm1, %v888_v49  ;;  %v899_v52 = vadd.f32 %v1688_v51, %v1578_v48  ;;  %v1117_v57 = vmul.f32 %v888_v49, %v888_v49  ;;  %v1048_v0 = vsel %vm643_vm1, %v888_v49, 0.0  ;;  %v1152_v21 = vsel %vm643_vm1, %v1119_v63, 0.0 }
 0x119   : > { %v2044_v54 = vpop.f32.mrf.mxu0  ;;  %v890_v55 = vpop.f32.mrf.mxu1 }
 0x11a   : > { %1019 = vst.msk [vmem:[%s2036_s11 + $0x18] sm:$0xff] %vm643_vm1, %v899_v52  ;;  %v891_v58 = vadd.f32 %v1572_v53, %v890_v55  ;;  %v1149_v9 = vsel %vm643_vm1, %v1117_v57, 0.0  ;;  %v1120_v10 = vmul.f32 %v899_v52, %v899_v52  ;;  %v1053_v23 = vsel %vm643_vm1, %v899_v52, 0.0 }
 0x11b   : > { %v1597_v59 = vpop.f32.mrf.mxu0  ;;  %v1691_v60 = vpop.f32.mrf.mxu1 }
 0x11c   : > { %v912_v62 = vadd.f32 %v1691_v60, %v1587_v56  ;;  %1017 = vst.msk [vmem:[%s2036_s11 + $0x8] sm:$0xff] %vm643_vm1, %v891_v58  ;;  %v1049_v1 = vsel %vm643_vm1, %v891_v58, 0.0  ;;  %v1118_v2 = vmul.f32 %v891_v58, %v891_v58  ;;  %v1154_v35 = vsel %vm643_vm1, %v1120_v10, 0.0 }
 0x11d   : > { %v1598_v3 = vpop.f32.mrf.mxu0  ;;  %v903_v4 = vpop.f32.mrf.mxu1  ;;  %v1050_v8 = vadd.f32 %v1049_v1, %v1048_v0 }
 0x11e   : > { %1022 = vst.msk [vmem:[%s2036_s11 + $0x30] sm:$0xff] %vm643_vm1, %v912_v62  ;;  %v1150_v11 = vsel %vm643_vm1, %v1118_v2, 0.0  ;;  %v904_v13 = vadd.f32 %v1581_v61, %v903_v4  ;;  %v1599_v31 = vadd.f32 %v1598_v3, %v1597_v59  ;;  %v1123_v47 = vmul.f32 %v912_v62, %v912_v62 }
 0x11f   : > { %v1600_v14 = vpop.f32.mrf.mxu0  ;;  %v1692_v15 = vpop.f32.mrf.mxu1  ;;  %v1052_v16 = vadd.f32 %v1051_v6, %v1050_v8  ;;  %v1151_v18 = vadd.f32 %v1150_v11, %v1149_v9  ;;  %v1059_v42 = vsel %vm643_vm1, %v912_v62, 0.0  ;;  %v1596_v2 = vadd.f32 %v2044_v54, %v2040_v50 }
 0x120   : > { %v915_v19 = vadd.f32 %v1692_v15, %v1590_v5  ;;  %1020 = vst.msk [vmem:[%s2036_s11 + $0x20] sm:$0xff] %vm643_vm1, %v904_v13  ;;  %v1121_v24 = vmul.f32 %v904_v13, %v904_v13  ;;  %v1055_v37 = vsel %vm643_vm1, %v904_v13, 0.0  ;;  %v1160_v3 = vsel %vm643_vm1, %v1123_v47, 0.0 }
 0x121   : > { %v1601_v25 = vpop.f32.mrf.mxu0  ;;  %v906_v26 = vpop.f32.mrf.mxu1  ;;  %v1153_v29 = vadd.f32 %v1152_v21, %v1151_v18  ;;  %v1054_v33 = vadd.f32 %v1053_v23, %v1052_v16 }
 0x122   : > { %1023 = vst.msk [vmem:[%s2036_s11 + $0x38] sm:$0xff] %vm643_vm1, %v915_v19  ;;  %v907_v28 = vadd.f32 %v1584_v20, %v906_v26  ;;  %v1156_v48 = vsel %vm643_vm1, %v1121_v24, 0.0  ;;  %v1602_v56 = vadd.f32 %v1601_v25, %v1600_v14  ;;  %v1124_v46 = vmul.f32 %v915_v19, %v915_v19 }
 0x123   : > { %v1603_v30 = vpop.f32.mrf.mxu0  ;;  %v1695_v39 = vpop.f32.mrf.mxu1  ;;  %v1056_v43 = vadd.f32 %v1055_v37, %v1054_v33  ;;  %v1155_v44 = vadd.f32 %v1154_v35, %v1153_v29  ;;  %v1061_v4 = vsel %vm643_vm1, %v915_v19, 0.0 }
 0x124   : > { %v928_v45 = vadd.f32 %v1695_v39, %v1599_v31  ;;  %1021 = vst.msk [vmem:[%s2036_s11 + $0x28] sm:$0xff] %vm643_vm1, %v907_v28  ;;  %v1057_v49 = vsel %vm643_vm1, %v907_v28, 0.0  ;;  %v1122_v51 = vmul.f32 %v907_v28, %v907_v28  ;;  %v1162_v10 = vsel %vm643_vm1, %v1124_v46, 0.0 }
 0x125   : > { %v1604_v52 = vpop.f32.mrf.mxu0  ;;  %v919_v53 = vpop.f32.mrf.mxu1  ;;  %v1157_v55 = vadd.f32 %v1156_v48, %v1155_v44  ;;  %v1058_v57 = vadd.f32 %v1057_v49, %v1056_v43 }
 0x126   : > { %1026 = vst.msk [vmem:[%s2036_s11 + $0x50] sm:$0xff] %vm643_vm1, %v928_v45  ;;  %v1158_v58 = vsel %vm643_vm1, %v1122_v51, 0.0  ;;  %v920_v59 = vadd.f32 %v1593_v41, %v919_v53  ;;  %v1605_v14 = vadd.f32 %v1604_v52, %v1603_v30  ;;  %v1127_v18 = vmul.f32 %v928_v45, %v928_v45 }
 0x127   : > { %v1606_v60 = vpop.f32.mrf.mxu0  ;;  %v1696_v61 = vpop.f32.mrf.mxu1  ;;  %v1060_v63 = vadd.f32 %v1059_v42, %v1058_v57  ;;  %v1159_v0 = vadd.f32 %v1158_v58, %v1157_v55  ;;  %v1067_v39 = vsel %vm643_vm1, %v928_v45, 0.0 }
 0x128   : > { %v931_v1 = vadd.f32 %v1696_v61, %v1602_v56  ;;  %1024 = vst.msk [vmem:[%s2036_s11 + $0x40] sm:$0xff] %vm643_vm1, %v920_v59  ;;  %v1125_v62 = vmul.f32 %v920_v59, %v920_v59  ;;  %v1063_v11 = vsel %vm643_vm1, %v920_v59, 0.0  ;;  %v1168_v47 = vsel %vm643_vm1, %v1127_v18, 0.0 }
 0x129   : > { %v1607_v5 = vpop.f32.mrf.mxu0  ;;  %v922_v6 = vpop.f32.mrf.mxu1  ;;  %v1161_v8 = vadd.f32 %v1160_v3, %v1159_v0  ;;  %v1062_v9 = vadd.f32 %v1061_v4, %v1060_v63 }
 0x12a   : > { %1027 = vst.msk [vmem:[%s2036_s11 + $0x58] sm:$0xff] %vm643_vm1, %v931_v1  ;;  %v923_v13 = vadd.f32 %v1596_v2, %v922_v6  ;;  %v1164_v19 = vsel %vm643_vm1, %v1125_v62, 0.0  ;;  %v1608_v41 = vadd.f32 %v1607_v5, %v1606_v60  ;;  %v1128_v48 = vmul.f32 %v931_v1, %v931_v1 }
 0x12b   : > { %v1609_v50 = vpop.f32.mrf.mxu0  ;;  %v1699_v54 = vpop.f32.mrf.mxu1  ;;  %v1064_v15 = vadd.f32 %v1063_v11, %v1062_v9  ;;  %v1163_v16 = vadd.f32 %v1162_v10, %v1161_v8  ;;  %v1069_v57 = vsel %vm643_vm1, %v931_v1, 0.0 }
 0x12c   : > { %1025 = vst.msk [vmem:[%s2036_s11 + $0x48] sm:$0xff] %vm643_vm1, %v923_v13  ;;  %v1065_v20 = vsel %vm643_vm1, %v923_v13, 0.0  ;;  %v1126_v21 = vmul.f32 %v923_v13, %v923_v13  ;;  %v1170_v58 = vsel %vm643_vm1, %v1128_v48, 0.0 }
 0x12d   : > { %v1610_v23 = vpop.f32.mrf.mxu0  ;;  %v935_v24 = vpop.f32.mrf.mxu1  ;;  %v1165_v25 = vadd.f32 %v1164_v19, %v1163_v16  ;;  %v1066_v26 = vadd.f32 %v1065_v20, %v1064_v15 }
 0x12e   : > { %v1611_v29 = vadd.f32 %v1610_v23, %v1609_v50  ;;  %v936_v31 = vadd.f32 %v1605_v14, %v935_v24  ;;  %v1166_v33 = vsel %vm643_vm1, %v1126_v21, 0.0 }
 0x12f   : > { %v1612_v35 = vpop.f32.mrf.mxu0  ;;  %v1700_v37 = vpop.f32.mrf.mxu1  ;;  %v1167_v28 = vadd.f32 %v1166_v33, %v1165_v25  ;;  %v1068_v49 = vadd.f32 %v1067_v39, %v1066_v26 }
 0x130   : > { %v944_v30 = vadd.f32 %v1699_v54, %v1611_v29  ;;  %1028 = vst.msk [vmem:[%s2036_s11 + $0x60] sm:$0xff] %vm643_vm1, %v936_v31  ;;  %v1129_v60 = vmul.f32 %v936_v31, %v936_v31  ;;  %v1071_v1 = vsel %vm643_vm1, %v936_v31, 0.0 }
 0x131   : > { %v1613_v43 = vpop.f32.mrf.mxu0  ;;  %v938_v44 = vpop.f32.mrf.mxu1  ;;  %v1169_v51 = vadd.f32 %v1168_v47, %v1167_v28  ;;  %v1070_v59 = vadd.f32 %v1069_v57, %v1068_v49 }
 0x132   : > { %1030 = vst.msk [vmem:[%s2036_s11 + $0x70] sm:$0xff] %vm643_vm1, %v944_v30  ;;  %v1614_v52 = vadd.f32 %v1613_v43, %v1612_v35  ;;  %v939_v53 = vadd.f32 %v1608_v41, %v938_v44  ;;  %v1172_v8 = vsel %vm643_vm1, %v1129_v60, 0.0  ;;  %v1131_v18 = vmul.f32 %v944_v30, %v944_v30 }
 0x133   : > { %v1615_v55 = vpop.f32.mrf.mxu0  ;;  %v1703_v56 = vpop.f32.mrf.mxu1  ;;  %v1171_v63 = vadd.f32 %v1170_v58, %v1169_v51  ;;  %v1072_v6 = vadd.f32 %v1071_v1, %v1070_v59  ;;  %v1075_v26 = vsel %vm643_vm1, %v944_v30, 0.0 }
 0x134   : > { %v947_v42 = vadd.f32 %v1700_v37, %v1614_v52  ;;  %1029 = vst.msk [vmem:[%s2036_s11 + $0x68] sm:$0xff] %vm643_vm1, %v939_v53  ;;  %v1130_v3 = vmul.f32 %v939_v53, %v939_v53  ;;  %v1073_v10 = vsel %vm643_vm1, %v939_v53, 0.0  ;;  %v1176_v33 = vsel %vm643_vm1, %v1131_v18, 0.0 }
 0x135   : > { %v1616_v45 = vpop.f32.mrf.mxu0  ;;  %v951_v46 = vpop.f32.mrf.mxu1  ;;  %v1173_v9 = vadd.f32 %v1172_v8, %v1171_v63  ;;  %v1074_v19 = vadd.f32 %v1073_v10, %v1072_v6 }
 0x136   : > { %v1617_v61 = vadd.f32 %v1616_v45, %v1615_v55  ;;  %1031 = vst.msk [vmem:[%s2036_s11 + $0x78] sm:$0xff] %vm643_vm1, %v947_v42  ;;  %v1174_v54 = vsel %vm643_vm1, %v1130_v3, 0.0  ;;  %v1132_v35 = vmul.f32 %v947_v42, %v947_v42  ;;  %v1077_v30 = vsel %vm643_vm1, %v947_v42, 0.0 }
 0x137   : > { %v1618_v0 = vpop.f32.mrf.mxu0  ;;  %v1704_v2 = vpop.f32.mrf.mxu1  ;;  %v1175_v21 = vadd.f32 %v1174_v54, %v1173_v9  ;;  %v1076_v37 = vadd.f32 %v1075_v26, %v1074_v19 }
 0x138   : > { %v952_v4 = vadd.f32 %v1617_v61, %v951_v46  ;;  %v1178_v52 = vsel %vm643_vm1, %v1132_v35, 0.0 }
 0x139   : > { %v1619_v62 = vpop.f32.mrf.mxu0  ;;  %v954_v5 = vpop.f32.mrf.mxu1  ;;  %v1177_v39 = vadd.f32 %v1176_v33, %v1175_v21  ;;  %v1078_v53 = vadd.f32 %v1077_v30, %v1076_v37 }
 0x13a   : > { %1032 = vst.msk [vmem:[%s2036_s11 + $0x80] sm:$0xff] %vm643_vm1, %v952_v4  ;;  %v1620_v11 = vadd.f32 %v1619_v62, %v1618_v0  ;;  %v1133_v44 = vmul.f32 %v952_v4, %v952_v4 }
 0x13b   : > { %v1621_v13 = vpop.f32.mrf.mxu0  ;;  %v2105_v50 = vpop.f32.mrf.mxu1  ;;  %v1179_v57 = vadd.f32 %v1178_v52, %v1177_v39 }
 0x13c   : > { %v955_v14 = vadd.f32 %v1620_v11, %v954_v5  ;;  %v1180_v58 = vsel %vm643_vm1, %v1133_v44, 0.0 }
 0x13d   : > { %v1622_v15 = vpop.f32.mrf.mxu0  ;;  %v967_v16 = vpop.f32.mrf.mxu1  ;;  %v1181_v62 = vadd.f32 %v1180_v58, %v1179_v57 }
 0x13e   : > { %v1623_v20 = vadd.f32 %v1622_v15, %v1621_v13  ;;  %1033 = vst.msk [vmem:[%s2036_s11 + $0x88] sm:$0xff] %vm643_vm1, %v955_v14  ;;  %v1134_v55 = vmul.f32 %v955_v14, %v955_v14  ;;  %v1081_v61 = vsel %vm643_vm1, %v955_v14, 0.0 }
 0x13f   : > { %v1624_v23 = vpop.f32.mrf.mxu0  ;;  %v2110_v24 = vpop.f32.mrf.mxu1 }
 0x140   : > { %v960_v25 = vadd.f32 %v1703_v56, %v1623_v20  ;;  %v1079_v56 = vsel %vm643_vm1, %v952_v4, 0.0  ;;  %v1182_v3 = vsel %vm643_vm1, %v1134_v55, 0.0 }
 0x141   : > { %v1625_v29 = vpop.f32.mrf.mxu0  ;;  %v970_v31 = vpop.f32.mrf.mxu1 }
 0x142   : > { %1034 = vst.msk [vmem:[%s2036_s11 + $0x90] sm:$0xff] %vm643_vm1, %v960_v25  ;;  %v1626_v28 = vadd.f32 %v1625_v29, %v1624_v23  ;;  %v1135_v59 = vmul.f32 %v960_v25, %v960_v25  ;;  %v1083_v5 = vsel %vm643_vm1, %v960_v25, 0.0 }
 0x143   : > { %v1627_v41 = vpop.f32.mrf.mxu0  ;;  %v1711_v43 = vpop.f32.mrf.mxu1 }
 0x144   : > { %v963_v47 = vadd.f32 %v1704_v2, %v1626_v28  ;;  %v2117_v48 = vadd.f32 %v1711_v43, %v2016_v17  ;;  %v1184_v11 = vsel %vm643_vm1, %v1135_v59, 0.0 }
 0x145   : > { %v1628_v49 = vpop.f32.mrf.mxu0  ;;  %v983_v51 = vpop.f32.mrf.mxu1 }
 0x146   : > { %1035 = vst.msk [vmem:[%s2036_s11 + $0x98] sm:$0xff] %vm643_vm1, %v963_v47  ;;  %1042 = vst.msk [vmem:[%s2036_s11 + $0xd0] sm:$0xff] %vm643_vm1, %v2117_v48  ;;  %v1629_v17 = vadd.f32 %v1628_v49, %v1627_v41  ;;  %v2128_v45 = vadd.f32 %v2012_v7, %v983_v51  ;;  %v1080_v7 = vadd.f32 %v1079_v56, %v1078_v53 }
 0x147   : > { %v1630_v42 = vpop.f32.mrf.mxu0  ;;  %v1712_v46 = vpop.f32.mrf.mxu1  ;;  %v1136_v6 = vmul.f32 %v963_v47, %v963_v47 }
 0x148   : > { %v2132_v60 = vadd.f32 %v1712_v46, %v2018_v22  ;;  %v968_v63 = vadd.f32 %v1629_v17, %v967_v16  ;;  %1040 = vst.msk [vmem:[%s2036_s11 + $0xc0] sm:$0xff] %vm643_vm1, %v2128_v45  ;;  %v1659_v22 = vadd.f32 %v2026_v36, %v2024_v34  ;;  %v1082_v10 = vadd.f32 %v1081_v61, %v1080_v7 }
 0x149   : > { %v1631_v0 = vpop.f32.mrf.mxu0  ;;  %v986_v2 = vpop.f32.mrf.mxu1  ;;  %v1085_v34 = vsel %vm643_vm1, %v963_v47, 0.0  ;;  %v1662_v16 = vadd.f32 %v2031_v40, %v2028_v38  ;;  %v1186_v21 = vsel %vm643_vm1, %v1136_v6, 0.0  ;;  %v1141_v57 = vmul.f32 %v2128_v45, %v2128_v45 }
 0x14a   : > { %1043 = vst.msk [vmem:[%s2036_s11 + $0xd8] sm:$0xff] %vm643_vm1, %v2132_v60  ;;  %v1632_v4 = vadd.f32 %v1631_v0, %v1630_v42  ;;  %v2143_v1 = vadd.f32 %v2014_v12, %v986_v2  ;;  %1036 = vst.msk [vmem:[%s2036_s11 + $0xa0] sm:$0xff] %vm643_vm1, %v968_v63  ;;  %v1183_v12 = vadd.f32 %v1182_v3, %v1181_v62  ;;  %v1087_v23 = vsel %vm643_vm1, %v968_v63, 0.0 }
 0x14b   : > { %v1633_v8 = vpop.f32.mrf.mxu0  ;;  %v1715_v9 = vpop.f32.mrf.mxu1  ;;  %v1137_v36 = vmul.f32 %v968_v63, %v968_v63  ;;  %v1084_v18 = vadd.f32 %v1083_v5, %v1082_v10  ;;  %v1143_v0 = vmul.f32 %v2117_v48, %v2117_v48  ;;  %v1196_v2 = vsel %vm643_vm1, %v1141_v57, 0.0 }
 0x14c   : > { %v971_v13 = vadd.f32 %v1632_v4, %v970_v31  ;;  %1041 = vst.msk [vmem:[%s2036_s11 + $0xc8] sm:$0xff] %vm643_vm1, %v2143_v1  ;;  %v2155_v54 = vadd.f32 %v1715_v9, %v1659_v22  ;;  %v1185_v20 = vadd.f32 %v1184_v11, %v1183_v12  ;;  %v1097_v7 = vsel %vm643_vm1, %v2143_v1, 0.0 }
 0x14d   : > { %v1634_v14 = vpop.f32.mrf.mxu0  ;;  %v999_v15 = vpop.f32.mrf.mxu1  ;;  %v1086_v31 = vadd.f32 %v1085_v34, %v1084_v18  ;;  %v1188_v35 = vsel %vm643_vm1, %v1137_v36, 0.0  ;;  %v1144_v22 = vmul.f32 %v2132_v60, %v2132_v60  ;;  %v1101_v9 = vsel %vm643_vm1, %v2132_v60, 0.0 }
 0x14e   : > { %1037 = vst.msk [vmem:[%s2036_s11 + $0xa8] sm:$0xff] %vm643_vm1, %v971_v13  ;;  %v1635_v19 = vadd.f32 %v1634_v14, %v1633_v8  ;;  %v1138_v25 = vmul.f32 %v971_v13, %v971_v13  ;;  %1046 = vst.msk [vmem:[%s2036_s11 + $0xf0] sm:$0xff] %vm643_vm1, %v2155_v54  ;;  %v1000_v40 = vadd.f32 %v2020_v27, %v999_v15  ;;  %v1089_v37 = vsel %vm643_vm1, %v971_v13, 0.0 }
 0x14f   : > { %v1636_v26 = vpop.f32.mrf.mxu0  ;;  %v1716_v29 = vpop.f32.mrf.mxu1  ;;  %v1187_v41 = vadd.f32 %v1186_v21, %v1185_v20  ;;  %v1088_v43 = vadd.f32 %v1087_v23, %v1086_v31  ;;  %v1200_v8 = vsel %vm643_vm1, %v1143_v0, 0.0  ;;  %v1202_v13 = vsel %vm643_vm1, %v1144_v22, 0.0 }
 0x150   : > { %v976_v38 = vadd.f32 %v2105_v50, %v1635_v19  ;;  %v2168_v33 = vadd.f32 %v1716_v29, %v1662_v16  ;;  %1044 = vst.msk [vmem:[%s2036_s11 + $0xe0] sm:$0xff] %vm643_vm1, %v1000_v40  ;;  %v1190_v27 = vsel %vm643_vm1, %v1138_v25, 0.0  ;;  %v1145_v10 = vmul.f32 %v1000_v40, %v1000_v40 }
 0x151   : > { %v1637_v28 = vpop.f32.mrf.mxu0  ;;  %v1002_v39 = vpop.f32.mrf.mxu1  ;;  %v1189_v30 = vadd.f32 %v1188_v35, %v1187_v41  ;;  %v1090_v49 = vadd.f32 %v1089_v37, %v1088_v43  ;;  %v1103_v12 = vsel %vm643_vm1, %v1000_v40, 0.0  ;;  %v1147_v14 = vmul.f32 %v2155_v54, %v2155_v54 }
 0x152   : > { %1038 = vst.msk [vmem:[%s2036_s11 + $0xb0] sm:$0xff] %vm643_vm1, %v976_v38  ;;  %v1139_v44 = vmul.f32 %v976_v38, %v976_v38  ;;  %1047 = vst.msk [vmem:[%s2036_s11 + $0xf8] sm:$0xff] %vm643_vm1, %v2168_v33  ;;  %v1091_v50 = vsel %vm643_vm1, %v976_v38, 0.0  ;;  %v1638_v47 = vadd.f32 %v1637_v28, %v1636_v26  ;;  %v1003_v51 = vadd.f32 %v2022_v32, %v1002_v39 }
 0x153   : > { %v1191_v55 = vadd.f32 %v1190_v27, %v1189_v30  ;;  %v1092_v56 = vadd.f32 %v1091_v50, %v1090_v49  ;;  %v1095_v32 = vsel %vm643_vm1, %v2128_v45, 0.0  ;;  %v1099_v45 = vsel %vm643_vm1, %v2117_v48, 0.0 }
 0x154   : > { %v1192_v52 = vsel %vm643_vm1, %v1139_v44, 0.0  ;;  %v979_v53 = vadd.f32 %v2110_v24, %v1638_v47  ;;  %1045 = vst.msk [vmem:[%s2036_s11 + $0xe8] sm:$0xff] %vm643_vm1, %v1003_v51  ;;  %v1142_v24 = vmul.f32 %v2143_v1, %v2143_v1  ;;  %v1146_v48 = vmul.f32 %v1003_v51, %v1003_v51 }
 0x155   : > { %v1193_v46 = vadd.f32 %v1192_v52, %v1191_v55  ;;  %v1204_v15 = vsel %vm643_vm1, %v1145_v10, 0.0  ;;  %v1105_v16 = vsel %vm643_vm1, %v1003_v51, 0.0  ;;  %v1107_v60 = vsel %vm643_vm1, %v2155_v54, 0.0  ;;  %v1218_v51 = vld [vmem:[#allocation2] sm:$0x3] }
 0x156   : > { %1039 = vst.msk [vmem:[%s2036_s11 + $0xb8] sm:$0xff] %vm643_vm1, %v979_v53  ;;  %v1093_v17 = vsel %vm643_vm1, %v979_v53, 0.0  ;;  %v1140_v42 = vmul.f32 %v979_v53, %v979_v53  ;;  %v1198_v62 = vsel %vm643_vm1, %v1142_v24, 0.0  ;;  %v1148_v20 = vmul.f32 %v2168_v33, %v2168_v33 }
 0x157   : > { %v1094_v58 = vadd.f32 %v1093_v17, %v1092_v56  ;;  %v1206_v21 = vsel %vm643_vm1, %v1146_v48, 0.0  ;;  %v1208_v26 = vsel %vm643_vm1, %v1147_v14, 0.0  ;;  %v1109_v29 = vsel %vm643_vm1, %v2168_v33, 0.0 }
 0x158   : > { %v1194_v59 = vsel %vm643_vm1, %v1140_v42, 0.0  ;;  %v1210_v40 = vsel %vm643_vm1, %v1148_v20, 0.0 }
 0x159   : > { %v1096_v61 = vadd.f32 %v1095_v32, %v1094_v58  ;;  %v1195_v63 = vadd.f32 %v1194_v59, %v1193_v46 }
 0x15b   : > { %v1098_v3 = vadd.f32 %v1097_v7, %v1096_v61  ;;  %v1197_v4 = vadd.f32 %v1196_v2, %v1195_v63 }
 0x15d   : > { %v1199_v5 = vadd.f32 %v1198_v62, %v1197_v4  ;;  %v1100_v6 = vadd.f32 %v1099_v45, %v1098_v3 }
 0x15f   : > { %v1102_v11 = vadd.f32 %v1101_v9, %v1100_v6  ;;  %v1201_v1 = vadd.f32 %v1200_v8, %v1199_v5 }
 0x161   : > { %v1104_v34 = vadd.f32 %v1103_v12, %v1102_v11  ;;  %v1203_v36 = vadd.f32 %v1202_v13, %v1201_v1 }
 0x163   : > { %v1106_v18 = vadd.f32 %v1105_v16, %v1104_v34  ;;  %v1205_v19 = vadd.f32 %v1204_v15, %v1203_v36 }
 0x165   : > { %v1108_v23 = vadd.f32 %v1107_v60, %v1106_v18  ;;  %v1207_v25 = vadd.f32 %v1206_v21, %v1205_v19 }
 0x167   : > { %v1110_v31 = vadd.f32 %v1109_v29, %v1108_v23  ;;  %v1209_v38 = vadd.f32 %v1208_v26, %v1207_v25 }
 0x169   : > { %v1111_v35 = vrot.slane %v1110_v31, 4  ;;  %v1211_v37 = vadd.f32 %v1210_v40, %v1209_v38 }
 0x16b   : > { %v1112_v28 = vadd.f32 %v1111_v35, %v1110_v31  ;;  %v1212_v54 = vrot.slane %v1211_v37, 4 }
 0x16d   : > { %v1113_v39 = vrot.slane %v1112_v28, 2  ;;  %v1213_v41 = vadd.f32 %v1212_v54, %v1211_v37 }
 0x16f   : > { %v1114_v43 = vadd.f32 %v1113_v39, %v1112_v28  ;;  %v1214_v44 = vrot.slane %v1213_v41, 2 }
 0x171   : > { %v1115_v27 = vrot.slane %v1114_v43, 1  ;;  %v1215_v50 = vadd.f32 %v1214_v44, %v1213_v41 }
 0x173   : > { %v1216_v47 = vrot.slane %v1215_v50, 1  ;;  %v1116_v30 = vadd.f32 %v1115_v27, %v1114_v43 }
 0x175   : > { %v1217_v49 = vadd.f32 %v1216_v47, %v1215_v50 }
 0x176   : > { %1227 = sbr.rel (%p1547_p5) target bundleno = 454 (0x1c6), region = 44 }
 0x177   : > { %v1220_v33 = vsel %vm1219_vm2, %v1116_v30, %v1217_v49 }
 0x178   : > { %v1221_v52 = vadd.f32 %v1220_v33, %v1218_v51 }
 0x17a   : > { %1223 = vst.msk [vmem:[#allocation2] sm:$0x3] %vm1222_vm3, %v1221_v52 }
 0x17b   : > { %v1237_v32 = vld [vmem:[%s2427_s2] sm:$0x1] }
 0x17c   : > { %v2233_v61 = vld [vmem:[%s2428_s3] sm:$0x1] }
 0x181   : > { %v1228_v53 = vld [vmem:[#allocation2] sm:$0x1]  ;;  %v1230_v55 = vld [vmem:[#allocation2 + $0x1] sm:$0x1] }
 0x182   : > { %v1229_v56 = vmul.f32 0.0009765625, %v1228_v53  ;;  %v1231_v57 = vmul.f32 0.0009765625, %v1230_v55 }
 0x184   : > { %v1232_v17 = vmul.f32 %v1229_v56, %v1229_v56 }
 0x186   : > { %v1233_v42 = vsub.f32 %v1231_v57, %v1232_v17 }
 0x188   : > { %v1234_v46 = vmax.f32 %v1233_v42, 0.0 }
 0x18a   : > { %v1235_v58 = vadd.f32 1e-05, %v1234_v46 }
 0x18c   : > { %1833 = vrsqrt.f32 %v1235_v58 }
 0x199   : > { %v1834_v24 = vpop.eup %1833 }
 0x19a   : > { %v2228_v59 = vmul.f32 %v1834_v24, %v1237_v32 }
 0x19c   : > { %v2236_v63 = vmul.f32 %v2228_v59, %v1229_v56 }
 0x19e   : > { %v1241_v0 = vsub.f32 %v2233_v61, %v2236_v63 }
 0x19f LB: >> { %v1282_v2 = vlaneseq  ;;  %s1548_s18 = sshll.u32 %s1849_s16, 8  ;;  %s1247_s16 = sadd.s32 1, %s1849_s16   ;;  %s1849_s16 = sphi %s2240_s16, %s1247_s16  }
 0x1a0   : >> { %s2249_s22 = scalar_lea.vmem %s2429_s4, %s1548_s18  ;;  %p1244_p6 = scmp.ge.s32.totalorder %s1247_s16, 4  }
 0x1a1   : >> { %v1283_v7 = vshrl.u32 %v1282_v2, 7  ;;  %v1250_v3 = vld [vmem:[%s2249_s22] sm:$0xff]  ;;  %v1251_v45 = vld [vmem:[%s2249_s22 + $0x8] sm:$0xff]  ;;  %v1252_v22 = vld [vmem:[%s2249_s22 + $0x10] sm:$0xff] }
 0x1a2   : >> { %v1253_v62 = vld [vmem:[%s2249_s22 + $0x18] sm:$0xff]  ;;  %v1254_v5 = vld [vmem:[%s2249_s22 + $0x20] sm:$0xff]  ;;  %v1255_v9 = vld [vmem:[%s2249_s22 + $0x28] sm:$0xff] }
 0x1a3   : >> { %v1284_v4 = vsub.s32 0, %v1283_v7  ;;  %v1256_v10 = vld [vmem:[%s2249_s22 + $0x30] sm:$0xff]  ;;  %v1257_v11 = vld [vmem:[%s2249_s22 + $0x38] sm:$0xff]  ;;  %v1258_v20 = vld [vmem:[%s2249_s22 + $0x40] sm:$0xff] }
 0x1a4   : >> { %v1259_v21 = vld [vmem:[%s2249_s22 + $0x48] sm:$0xff]  ;;  %v1260_v23 = vld [vmem:[%s2249_s22 + $0x50] sm:$0xff]  ;;  %v1261_v38 = vld [vmem:[%s2249_s22 + $0x58] sm:$0xff] }
 0x1a5   : >> { %v2257_v6 = vrot.slane %v2228_v59, %v1284_v4  ;;  %v2262_v8 = vrot.slane %v1241_v0, %v1284_v4  ;;  %v1262_v40 = vld [vmem:[%s2249_s22 + $0x60] sm:$0xff]  ;;  %v1263_v35 = vld [vmem:[%s2249_s22 + $0x68] sm:$0xff]  ;;  %v1264_v41 = vld [vmem:[%s2249_s22 + $0x70] sm:$0xff] }
 0x1a6   : >> { %v1265_v43 = vld [vmem:[%s2249_s22 + $0x78] sm:$0xff]  ;;  %v1266_v58 = vld [vmem:[%s2249_s22 + $0x80] sm:$0xff]  ;;  %v1267_v32 = vld [vmem:[%s2249_s22 + $0x88] sm:$0xff] }
 0x1a7   : >> { %v1286_v1 = vmul.f32 %v2257_v6, %v1250_v3  ;;  %v1287_v13 = vmul.f32 %v2257_v6, %v1251_v45  ;;  %v1288_v12 = vmul.f32 %v2257_v6, %v1252_v22  ;;  %v1289_v48 = vmul.f32 %v2257_v6, %v1253_v62  ;;  %v1268_v24 = vld [vmem:[%s2249_s22 + $0x90] sm:$0xff]  ;;  %v1269_v45 = vld [vmem:[%s2249_s22 + $0x98] sm:$0xff]  ;;  %v1270_v22 = vld [vmem:[%s2249_s22 + $0xa0] sm:$0xff] }
 0x1a8   : >> { %v1290_v34 = vmul.f32 %v2257_v6, %v1254_v5  ;;  %v1291_v36 = vmul.f32 %v2257_v6, %v1255_v9  ;;  %v1292_v14 = vmul.f32 %v2257_v6, %v1256_v10  ;;  %v1293_v15 = vmul.f32 %v2257_v6, %v1257_v11  ;;  %v1271_v62 = vld [vmem:[%s2249_s22 + $0xa8] sm:$0xff] }
 0x1a9   : >> { %v1324_v16 = vadd.f32 %v2262_v8, %v1286_v1  ;;  %v1325_v18 = vadd.f32 %v2262_v8, %v1287_v13  ;;  %v1326_v19 = vadd.f32 %v2262_v8, %v1288_v12  ;;  %v1327_v60 = vadd.f32 %v2262_v8, %v1289_v48  ;;  %v1272_v1 = vld [vmem:[%s2249_s22 + $0xb0] sm:$0xff]  ;;  %v1273_v13 = vld [vmem:[%s2249_s22 + $0xb8] sm:$0xff] }
 0x1aa   : >> { %v1328_v25 = vadd.f32 %v2262_v8, %v1290_v34  ;;  %v1329_v26 = vadd.f32 %v2262_v8, %v1291_v36  ;;  %v1330_v29 = vadd.f32 %v2262_v8, %v1292_v14  ;;  %v1331_v31 = vadd.f32 %v2262_v8, %v1293_v15 }
 0x1ab   : >> { %v1356_v37 = vmax.f32 %v1324_v16, 0.0  ;;  %v1357_v28 = vmax.f32 %v1325_v18, 0.0  ;;  %v1358_v54 = vmax.f32 %v1326_v19, 0.0  ;;  %v1359_v39 = vmax.f32 %v1327_v60, 0.0 }
 0x1ac   : >> { %v1360_v44 = vmax.f32 %v1328_v25, 0.0  ;;  %v1361_v27 = vmax.f32 %v1329_v26, 0.0  ;;  %v1362_v50 = vmax.f32 %v1330_v29, 0.0  ;;  %v1363_v47 = vmax.f32 %v1331_v31, 0.0  ;;  %v1274_v31 = vld [vmem:[%s2249_s22 + $0xc0] sm:$0xff] }
 0x1ad   : >> { %1388 = vst.msk [vmem:[%s2249_s22] sm:$0xff] %vm643_vm1, %v1356_v37  ;;  %1389 = vst.msk [vmem:[%s2249_s22 + $0x8] sm:$0xff] %vm643_vm1, %v1357_v28  ;;  %v1294_v30 = vmul.f32 %v2257_v6, %v1258_v20  ;;  %v1295_v49 = vmul.f32 %v2257_v6, %v1259_v21  ;;  %v1296_v51 = vmul.f32 %v2257_v6, %v1260_v23 }
 0x1ae   : >> { %1390 = vst.msk [vmem:[%s2249_s22 + $0x10] sm:$0xff] %vm643_vm1, %v1358_v54  ;;  %1391 = vst.msk [vmem:[%s2249_s22 + $0x18] sm:$0xff] %vm643_vm1, %v1359_v39  ;;  %v1297_v33 = vmul.f32 %v2257_v6, %v1261_v38  ;;  %v1298_v52 = vmul.f32 %v2257_v6, %v1262_v40  ;;  %v1299_v53 = vmul.f32 %v2257_v6, %v1263_v35  ;;  %v1275_v38 = vld [vmem:[%s2249_s22 + $0xc8] sm:$0xff]  ;;  %v1276_v40 = vld [vmem:[%s2249_s22 + $0xd0] sm:$0xff] }
 0x1af   : >> { %1392 = vst.msk [vmem:[%s2249_s22 + $0x20] sm:$0xff] %vm643_vm1, %v1360_v44  ;;  %1393 = vst.msk [vmem:[%s2249_s22 + $0x28] sm:$0xff] %vm643_vm1, %v1361_v27  ;;  %v1300_v55 = vmul.f32 %v2257_v6, %v1264_v41  ;;  %v1301_v56 = vmul.f32 %v2257_v6, %v1265_v43  ;;  %v1332_v57 = vadd.f32 %v2262_v8, %v1294_v30  ;;  %v1277_v39 = vld [vmem:[%s2249_s22 + $0xd8] sm:$0xff]  ;;  %v1278_v41 = vld [vmem:[%s2249_s22 + $0xe0] sm:$0xff] }
 0x1b0   : >> { %1394 = vst.msk [vmem:[%s2249_s22 + $0x30] sm:$0xff] %vm643_vm1, %v1362_v50  ;;  %1395 = vst.msk [vmem:[%s2249_s22 + $0x38] sm:$0xff] %vm643_vm1, %v1363_v47  ;;  %v1333_v17 = vadd.f32 %v2262_v8, %v1295_v49  ;;  %v1334_v42 = vadd.f32 %v2262_v8, %v1296_v51  ;;  %v1335_v46 = vadd.f32 %v2262_v8, %v1297_v33  ;;  %v1279_v43 = vld [vmem:[%s2249_s22 + $0xe8] sm:$0xff]  ;;  %v1280_v30 = vld [vmem:[%s2249_s22 + $0xf0] sm:$0xff] }
 0x1b1   : >> { %v1336_v2 = vadd.f32 %v2262_v8, %v1298_v52  ;;  %v1337_v7 = vadd.f32 %v2262_v8, %v1299_v53  ;;  %v1338_v3 = vadd.f32 %v2262_v8, %v1300_v55  ;;  %v1339_v4 = vadd.f32 %v2262_v8, %v1301_v56  ;;  %v1281_v49 = vld [vmem:[%s2249_s22 + $0xf8] sm:$0xff] }
 0x1b2   : >> { %v1364_v5 = vmax.f32 %v1332_v57, 0.0  ;;  %v1365_v9 = vmax.f32 %v1333_v17, 0.0  ;;  %v1366_v10 = vmax.f32 %v1334_v42, 0.0  ;;  %v1367_v11 = vmax.f32 %v1335_v46, 0.0 }
 0x1b3   : >> { %v1368_v12 = vmax.f32 %v1336_v2, 0.0  ;;  %v1369_v48 = vmax.f32 %v1337_v7, 0.0  ;;  %v1370_v34 = vmax.f32 %v1338_v3, 0.0  ;;  %v1371_v36 = vmax.f32 %v1339_v4, 0.0 }
 0x1b4   : >> { %1396 = vst.msk [vmem:[%s2249_s22 + $0x40] sm:$0xff] %vm643_vm1, %v1364_v5  ;;  %1397 = vst.msk [vmem:[%s2249_s22 + $0x48] sm:$0xff] %vm643_vm1, %v1365_v9  ;;  %v1302_v14 = vmul.f32 %v2257_v6, %v1266_v58  ;;  %v1303_v15 = vmul.f32 %v2257_v6, %v1267_v32  ;;  %v1304_v16 = vmul.f32 %v2257_v6, %v1268_v24 }
 0x1b5   : >> { %1398 = vst.msk [vmem:[%s2249_s22 + $0x50] sm:$0xff] %vm643_vm1, %v1366_v10  ;;  %1399 = vst.msk [vmem:[%s2249_s22 + $0x58] sm:$0xff] %vm643_vm1, %v1367_v11  ;;  %v1305_v18 = vmul.f32 %v2257_v6, %v1269_v45  ;;  %v1306_v19 = vmul.f32 %v2257_v6, %v1270_v22  ;;  %v1307_v60 = vmul.f32 %v2257_v6, %v1271_v62 }
 0x1b6   : >> { %1400 = vst.msk [vmem:[%s2249_s22 + $0x60] sm:$0xff] %vm643_vm1, %v1368_v12  ;;  %1401 = vst.msk [vmem:[%s2249_s22 + $0x68] sm:$0xff] %vm643_vm1, %v1369_v48  ;;  %v1308_v20 = vmul.f32 %v2257_v6, %v1272_v1  ;;  %v1309_v21 = vmul.f32 %v2257_v6, %v1273_v13  ;;  %v1340_v23 = vadd.f32 %v2262_v8, %v1302_v14 }
 0x1b7   : >> { %1402 = vst.msk [vmem:[%s2249_s22 + $0x70] sm:$0xff] %vm643_vm1, %v1370_v34  ;;  %1403 = vst.msk [vmem:[%s2249_s22 + $0x78] sm:$0xff] %vm643_vm1, %v1371_v36  ;;  %v1341_v25 = vadd.f32 %v2262_v8, %v1303_v15  ;;  %v1342_v26 = vadd.f32 %v2262_v8, %v1304_v16  ;;  %v1343_v29 = vadd.f32 %v2262_v8, %v1305_v18 }
 0x1b8   : >> { %v1344_v35 = vadd.f32 %v2262_v8, %v1306_v19  ;;  %v1345_v37 = vadd.f32 %v2262_v8, %v1307_v60  ;;  %v1346_v28 = vadd.f32 %v2262_v8, %v1308_v20  ;;  %v1347_v54 = vadd.f32 %v2262_v8, %v1309_v21 }
 0x1b9   : >> { %v1372_v44 = vmax.f32 %v1340_v23, 0.0  ;;  %v1373_v27 = vmax.f32 %v1341_v25, 0.0  ;;  %v1374_v50 = vmax.f32 %v1342_v26, 0.0  ;;  %v1375_v47 = vmax.f32 %v1343_v29, 0.0 }
 0x1ba   : >> { %v1376_v51 = vmax.f32 %v1344_v35, 0.0  ;;  %v1377_v33 = vmax.f32 %v1345_v37, 0.0  ;;  %v1378_v52 = vmax.f32 %v1346_v28, 0.0  ;;  %v1379_v53 = vmax.f32 %v1347_v54, 0.0 }
 0x1bb   : >> { %1404 = vst.msk [vmem:[%s2249_s22 + $0x80] sm:$0xff] %vm643_vm1, %v1372_v44  ;;  %1405 = vst.msk [vmem:[%s2249_s22 + $0x88] sm:$0xff] %vm643_vm1, %v1373_v27  ;;  %v1310_v55 = vmul.f32 %v2257_v6, %v1274_v31  ;;  %v1311_v56 = vmul.f32 %v2257_v6, %v1275_v38  ;;  %v1312_v57 = vmul.f32 %v2257_v6, %v1276_v40 }
 0x1bc   : >> { %1406 = vst.msk [vmem:[%s2249_s22 + $0x90] sm:$0xff] %vm643_vm1, %v1374_v50  ;;  %1407 = vst.msk [vmem:[%s2249_s22 + $0x98] sm:$0xff] %vm643_vm1, %v1375_v47  ;;  %v1313_v17 = vmul.f32 %v2257_v6, %v1277_v39  ;;  %v1314_v42 = vmul.f32 %v2257_v6, %v1278_v41  ;;  %v1315_v46 = vmul.f32 %v2257_v6, %v1279_v43 }
 0x1bd   : >> { %1408 = vst.msk [vmem:[%s2249_s22 + $0xa0] sm:$0xff] %vm643_vm1, %v1376_v51  ;;  %1409 = vst.msk [vmem:[%s2249_s22 + $0xa8] sm:$0xff] %vm643_vm1, %v1377_v33  ;;  %v1316_v58 = vmul.f32 %v2257_v6, %v1280_v30  ;;  %v1317_v32 = vmul.f32 %v2257_v6, %v1281_v49  ;;  %v1348_v24 = vadd.f32 %v2262_v8, %v1310_v55 }
 0x1be   : >> { %1410 = vst.msk [vmem:[%s2249_s22 + $0xb0] sm:$0xff] %vm643_vm1, %v1378_v52  ;;  %1411 = vst.msk [vmem:[%s2249_s22 + $0xb8] sm:$0xff] %vm643_vm1, %v1379_v53  ;;  %v1349_v2 = vadd.f32 %v2262_v8, %v1311_v56  ;;  %v1350_v7 = vadd.f32 %v2262_v8, %v1312_v57  ;;  %v1351_v3 = vadd.f32 %v2262_v8, %v1313_v17 }
 0x1bf   : >> { %v1352_v4 = vadd.f32 %v2262_v8, %v1314_v42  ;;  %v1353_v45 = vadd.f32 %v2262_v8, %v1315_v46  ;;  %v1354_v6 = vadd.f32 %v2262_v8, %v1316_v58  ;;  %v1355_v22 = vadd.f32 %v2262_v8, %v1317_v32 }
 0x1c0   : >> { %v1380_v62 = vmax.f32 %v1348_v24, 0.0  ;;  %v1381_v5 = vmax.f32 %v1349_v2, 0.0  ;;  %v1382_v9 = vmax.f32 %v1350_v7, 0.0  ;;  %v1383_v10 = vmax.f32 %v1351_v3, 0.0 }
 0x1c1   : >> { %v1384_v11 = vmax.f32 %v1352_v4, 0.0  ;;  %v1385_v1 = vmax.f32 %v1353_v45, 0.0  ;;  %v1386_v13 = vmax.f32 %v1354_v6, 0.0  ;;  %v1387_v12 = vmax.f32 %v1355_v22, 0.0  ;;  %1246 = sbr.rel (!%p1244_p6) target bundleno = 415 (0x19f), region = 79 }
 0x1c2   : >> { %1412 = vst.msk [vmem:[%s2249_s22 + $0xc0] sm:$0xff] %vm643_vm1, %v1380_v62  ;;  %1413 = vst.msk [vmem:[%s2249_s22 + $0xc8] sm:$0xff] %vm643_vm1, %v1381_v5 }
 0x1c3   : >> { %1414 = vst.msk [vmem:[%s2249_s22 + $0xd0] sm:$0xff] %vm643_vm1, %v1382_v9  ;;  %1415 = vst.msk [vmem:[%s2249_s22 + $0xd8] sm:$0xff] %vm643_vm1, %v1383_v10 }
 0x1c4   : >> { %1416 = vst.msk [vmem:[%s2249_s22 + $0xe0] sm:$0xff] %vm643_vm1, %v1384_v11  ;;  %1417 = vst.msk [vmem:[%s2249_s22 + $0xe8] sm:$0xff] %vm643_vm1, %v1385_v1 }
 0x1c5   : >> { %1418 = vst.msk [vmem:[%s2249_s22 + $0xf0] sm:$0xff] %vm643_vm1, %v1386_v13  ;;  %1419 = vst.msk [vmem:[%s2249_s22 + $0xf8] sm:$0xff] %vm643_vm1, %v1387_v12 }
 0x1c6 PF: > { %s14_s15 = sadd.s32 1, %s1845_s15  }
 0x1c7   : > { %p11_p7 = scmp.ge.s32.totalorder %s14_s15, 6  }
 0x1c9   :  { %13 = sbr.rel (!%p11_p7) target bundleno = 1 (0x1), region = 90 }

// kernel: reference_encoder_forward.9
= control target key start
LH: loop header
LB: loop body
LE: loop exit
PB: predicated region body
PF: predicated region fallthrough
CT: control target
= control target key end

     0   :  { %vm472_vm0 = vcmask 261120   ;;  %vm22_vm1 = vcmask 517120   ;;  %vm845_vm2 = vcmask 523264   ;;  %vm1049_vm3 = vcmask 1040384   ;;  %s2419_s1 = inlined_call_operand.vmem [shape: bf16[288,64], index: 1, kind: input, shape index: {}]   ;;  %s2420_s0 = inlined_call_operand.vmem [shape: bf16[256,288], index: 0, kind: input, shape index: {}]   ;;  %s2421_s4 = inlined_call_operand.vmem [shape: f32[1,256,64], index: 4, kind: output, shape index: {}]   ;;  %s2422_s2 = inlined_call_operand.vmem [shape: f32[1,64], index: 2, kind: input, shape index: {}]   ;;  %s2423_s3 = inlined_call_operand.vmem [shape: f32[1,64], index: 3, kind: input, shape index: {}]  }
   0x1   :  { %v1510_v0 = vld [vmem:[%s2419_s1 + $0x78] sm:$0xff]   ;;  %v1512_v2 = vld [vmem:[%s2419_s1 + $0x70] sm:$0xff]   ;;  %v1514_v4 = vld [vmem:[%s2419_s1 + $0x68] sm:$0xff]  }
   0x2   :  { %v1511_v1 = vld [vmem:[%s2419_s1 + $0x38] sm:$0xff]   ;;  %1327 = vmatprep.subr.bf16.mxu0 %v1510_v0  ;;  %1493 = vmatprep.subr.bf16.mxu1 %v1510_v0  ;;  %v1513_v3 = vld [vmem:[%s2419_s1 + $0x30] sm:$0xff]   ;;  %v1515_v5 = vld [vmem:[%s2419_s1 + $0x28] sm:$0xff]  }
   0x3   :  { %1328 = vmatpush3.bf16.msra.mxu0 %v1511_v1  ;;  %1501 = vmatpush3.bf16.msra.mxu1 %v1511_v1  ;;  %v1516_v6 = vld [vmem:[%s2419_s1 + $0x60] sm:$0xff]   ;;  %v1518_v8 = vld [vmem:[%s2419_s1 + $0x58] sm:$0xff]   ;;  %v1520_v10 = vld [vmem:[%s2419_s1 + $0x50] sm:$0xff]  }
   0x4   :  { %1329 = vmatprep.subr.bf16.mxu0 %v1512_v2  ;;  %1494 = vmatprep.subr.bf16.mxu1 %v1512_v2  ;;  %v1517_v7 = vld [vmem:[%s2419_s1 + $0x20] sm:$0xff]   ;;  %v1519_v9 = vld [vmem:[%s2419_s1 + $0x18] sm:$0xff]   ;;  %v1521_v13 = vld [vmem:[%s2419_s1 + $0x10] sm:$0xff]   ;;  %v1594_v2 = vmov 0.0  }
   0x5   :  { %v1528_v11 = vld [vmem:[%s2420_s0 + $0x4] ss:$12 sps:$4 sm:$0xff]   ;;  %v1522_v14 = vld [vmem:[%s2419_s1 + $0x48] sm:$0xff]   ;;  %v1539_v26 = vld [vmem:[%s2420_s0 + $0x34] ss:$12 sps:$4 sm:$0xff]  }
   0x6   :  { %v1531_v12 = vld [vmem:[%s2420_s0 + $0x124] ss:$12 sps:$4 sm:$0xff]   ;;  %553 = vmatprep.mubr.bf16.mxu0 %v1528_v11  ;;  %v1523_v15 = vld [vmem:[%s2419_s1 + $0x8] sm:$0xff]   ;;  %v1541_v27 = vld [vmem:[%s2420_s0 + $0x154] ss:$12 sps:$4 sm:$0xff]  }
   0x7   :  { %1330 = vmatpush3.bf16.msra.mxu0 %v1513_v3  ;;  %1502 = vmatpush3.bf16.msra.mxu1 %v1513_v3  ;;  %v1524_v16 = vld [vmem:[%s2419_s1 + $0x40] sm:$0xff]   ;;  %v1538_v18 = vld [vmem:[%s2419_s1 + $0x88] sm:$0xff]   ;;  %v1543_v28 = vld [vmem:[%s2420_s0 + $0x30] ss:$12 sps:$4 sm:$0xff]   ;;  %23 = vst.msk [vmem:[#allocation2] sm:$0x3] %vm22_vm1, %v1594_v2 }
   0x8   :  { %1331 = vmatprep.subr.bf16.mxu0 %v1514_v4  ;;  %1495 = vmatprep.subr.bf16.mxu1 %v1514_v4  ;;  %v1525_v17 = vld [vmem:[%s2419_s1] sm:$0xff]   ;;  %v1532_v21 = vld [vmem:[%s2420_s0 + $0x1c] ss:$12 sps:$4 sm:$0xff]   ;;  %v1545_v30 = vld [vmem:[%s2420_s0 + $0x4c] ss:$12 sps:$4 sm:$0xff]  }
   0x9   :  { %649 = vmatprep.mubr.bf16.mxu1 %v1531_v12  ;;  %v1526_v19 = vld [vmem:[%s2420_s0] ss:$12 sps:$4 sm:$0xff]   ;;  %v1534_v22 = vld [vmem:[%s2420_s0 + $0x13c] ss:$12 sps:$4 sm:$0xff]   ;;  %v1536_v24 = vld [vmem:[%s2420_s0 + $0x18] ss:$12 sps:$4 sm:$0xff]  }
   0xa   :  { %v1529_v20 = vld [vmem:[%s2420_s0 + $0x120] ss:$12 sps:$4 sm:$0xff]   ;;  %v1537_v25 = vld [vmem:[%s2420_s0 + $0x138] ss:$12 sps:$4 sm:$0xff]   ;;  %v1544_v29 = vld [vmem:[%s2420_s0 + $0x150] ss:$12 sps:$4 sm:$0xff]  }
   0xb   :  { %1332 = vmatpush3.bf16.msra.mxu0 %v1515_v5  ;;  %1503 = vmatpush3.bf16.msra.mxu1 %v1515_v5  ;;  %v1551_v23 = vld [vmem:[%s2419_s1 + $0x80] sm:$0xff]   ;;  %v1547_v31 = vld [vmem:[%s2420_s0 + $0x16c] ss:$12 sps:$4 sm:$0xff]   ;;  %v1549_v32 = vld [vmem:[%s2420_s0 + $0x48] ss:$12 sps:$4 sm:$0xff]  }
   0xc   :  { %1333 = vmatprep.subr.bf16.mxu0 %v1516_v6  ;;  %1496 = vmatprep.subr.bf16.mxu1 %v1516_v6  ;;  %v1550_v33 = vld [vmem:[%s2420_s0 + $0x168] ss:$12 sps:$4 sm:$0xff]   ;;  %v1552_v34 = vld [vmem:[%s2420_s0 + $0x64] ss:$12 sps:$4 sm:$0xff]   ;;  %v1555_v36 = vld [vmem:[%s2420_s0 + $0x60] ss:$12 sps:$4 sm:$0xff]  }
   0xd   :  { %v1554_v35 = vld [vmem:[%s2420_s0 + $0x8] ss:$12 sps:$4 sm:$0xff]   ;;  %v1556_v37 = vld [vmem:[%s2420_s0 + $0x20] ss:$12 sps:$4 sm:$0xff]   ;;  %v1559_v39 = vld [vmem:[%s2420_s0 + $0x38] ss:$12 sps:$4 sm:$0xff]  }
   0xe   :  { %v1557_v38 = vld [vmem:[%s2420_s0 + $0x7c] ss:$12 sps:$4 sm:$0xff]   ;;  %v1560_v40 = vld [vmem:[%s2420_s0 + $0x78] ss:$12 sps:$4 sm:$0xff]   ;;  %v1562_v42 = vld [vmem:[%s2420_s0 + $0x94] ss:$12 sps:$4 sm:$0xff]  }
   0xf   :  { %1334 = vmatpush3.bf16.msra.mxu0 %v1517_v7  ;;  %1504 = vmatpush3.bf16.msra.mxu1 %v1517_v7  ;;  %v1561_v41 = vld [vmem:[%s2420_s0 + $0x50] ss:$12 sps:$4 sm:$0xff]   ;;  %v1564_v43 = vld [vmem:[%s2420_s0 + $0x68] ss:$12 sps:$4 sm:$0xff]   ;;  %v1566_v45 = vld [vmem:[%s2420_s0 + $0x80] ss:$12 sps:$4 sm:$0xff]  }
  0x10   :  { %1335 = vmatprep.subr.bf16.mxu0 %v1518_v8  ;;  %1497 = vmatprep.subr.bf16.mxu1 %v1518_v8  ;;  %v1565_v44 = vld [vmem:[%s2420_s0 + $0x90] ss:$12 sps:$4 sm:$0xff]   ;;  %v1567_v46 = vld [vmem:[%s2420_s0 + $0xac] ss:$12 sps:$4 sm:$0xff]   ;;  %v1570_v48 = vld [vmem:[%s2420_s0 + $0xa8] ss:$12 sps:$4 sm:$0xff]  }
  0x11   :  { %v1569_v47 = vld [vmem:[%s2420_s0 + $0x98] ss:$12 sps:$4 sm:$0xff]   ;;  %v1571_v49 = vld [vmem:[%s2420_s0 + $0xb0] ss:$12 sps:$4 sm:$0xff]   ;;  %v1574_v51 = vld [vmem:[%s2420_s0 + $0xc8] ss:$12 sps:$4 sm:$0xff]  }
  0x12   :  { %v1572_v50 = vld [vmem:[%s2420_s0 + $0xc4] ss:$12 sps:$4 sm:$0xff]   ;;  %v1575_v52 = vld [vmem:[%s2420_s0 + $0xc0] ss:$12 sps:$4 sm:$0xff]   ;;  %v1577_v54 = vld [vmem:[%s2420_s0 + $0xdc] ss:$12 sps:$4 sm:$0xff]  }
  0x13   :  { %1336 = vmatpush3.bf16.msra.mxu0 %v1519_v9  ;;  %1505 = vmatpush3.bf16.msra.mxu1 %v1519_v9  ;;  %v1576_v53 = vld [vmem:[%s2420_s0 + $0xe0] ss:$12 sps:$4 sm:$0xff]   ;;  %v1579_v55 = vld [vmem:[%s2420_s0 + $0xf8] ss:$12 sps:$4 sm:$0xff]   ;;  %v1581_v57 = vld [vmem:[%s2420_s0 + $0x110] ss:$12 sps:$4 sm:$0xff]  }
  0x14   :  { %1337 = vmatprep.subr.bf16.mxu0 %v1520_v10  ;;  %1498 = vmatprep.subr.bf16.mxu1 %v1520_v10  ;;  %v1580_v56 = vld [vmem:[%s2420_s0 + $0xd8] ss:$12 sps:$4 sm:$0xff]   ;;  %v1582_v58 = vld [vmem:[%s2420_s0 + $0xf4] ss:$12 sps:$4 sm:$0xff]   ;;  %v1585_v60 = vld [vmem:[%s2420_s0 + $0xf0] ss:$12 sps:$4 sm:$0xff]  }
  0x15   :  { %v1584_v59 = vld [vmem:[%s2420_s0 + $0x128] ss:$12 sps:$4 sm:$0xff]   ;;  %v1586_v61 = vld [vmem:[%s2420_s0 + $0x140] ss:$12 sps:$4 sm:$0xff]   ;;  %v1589_v63 = vld [vmem:[%s2420_s0 + $0x158] ss:$12 sps:$4 sm:$0xff]  }
  0x16   :  { %v1587_v62 = vld [vmem:[%s2420_s0 + $0x10c] ss:$12 sps:$4 sm:$0xff]   ;;  %v1590_v0 = vld [vmem:[%s2420_s0 + $0x108] ss:$12 sps:$4 sm:$0xff]   ;;  %v1591_v1 = vld [vmem:[%s2420_s0 + $0x170] ss:$12 sps:$4 sm:$0xff]  }
  0x17   :  { %1338 = vmatpush3.bf16.msra.mxu0 %v1521_v13  ;;  %1506 = vmatpush3.bf16.msra.mxu1 %v1521_v13 }
  0x18   :  { %1339 = vmatprep.subr.bf16.mxu0 %v1522_v14  ;;  %1499 = vmatprep.subr.bf16.mxu1 %v1522_v14 }
  0x1b   :  { %1340 = vmatpush3.bf16.msra.mxu0 %v1523_v15  ;;  %1507 = vmatpush3.bf16.msra.mxu1 %v1523_v15 }
  0x1c   :  { %1341 = vmatprep.subr.bf16.mxu0 %v1524_v16  ;;  %1500 = vmatprep.subr.bf16.mxu1 %v1524_v16 }
  0x1f   :  { %1342 = vmatpush3.bf16.msra.mxu0 %v1525_v17  ;;  %1508 = vmatpush3.bf16.msra.mxu1 %v1525_v17 }
  0x20   :  { %1457 = vmatprep.subr.bf16.mxu1 %v1538_v18 }
  0x22   :  { %554 = vmatmul.mubr.bf16.vlgmr.msra.gmra.mxu0 %v1526_v19  ;;  %650 = vmatmul.mubr.bf16.vlgmr.msra.gmra.mxu1 %v1529_v20 }
  0x23   :  { %561 = vmatprep.mubr.bf16.mxu0 %v1532_v21  ;;  %657 = vmatprep.mubr.bf16.mxu1 %v1534_v22 }
  0x24   :  { %1458 = vmatpush3.bf16.msra.mxu1 %v1538_v18 }
  0x25   :  { %1459 = vmatprep.subr.bf16.mxu1 %v1551_v23 }
  0x28   :  { %1460 = vmatpush3.bf16.msra.mxu1 %v1551_v23 }
  0x2a   :  { %562 = vmatmul.mubr.bf16.gmra.mxu0 %v1536_v24  ;;  %658 = vmatmul.mubr.bf16.gmra.mxu1 %v1537_v25 }
  0x2b   :  { %569 = vmatprep.mubr.bf16.mxu0 %v1539_v26  ;;  %665 = vmatprep.mubr.bf16.mxu1 %v1541_v27 }
  0x32   :  { %570 = vmatmul.mubr.bf16.gmra.mxu0 %v1543_v28  ;;  %666 = vmatmul.mubr.bf16.gmra.mxu1 %v1544_v29 }
  0x33   :  { %577 = vmatprep.mubr.bf16.mxu0 %v1545_v30  ;;  %673 = vmatprep.mubr.bf16.mxu1 %v1547_v31 }
  0x3a   :  { %578 = vmatmul.mubr.bf16.gmra.mxu0 %v1549_v32  ;;  %674 = vmatmul.mubr.bf16.gmra.mxu1 %v1550_v33 }
  0x3b   :  { %585 = vmatprep.mubr.bf16.mxu0 %v1552_v34  ;;  %1461 = vmatprep.mubr.msk.bf16.mxu1 %vm472_vm0, %v1554_v35 }
  0x42   :  { %586 = vmatmul.mubr.bf16.gmra.mxu0 %v1555_v36  ;;  %1462 = vmatmul.mubr.msk.bf16.vlgmr.msra.gmra.mxu1 %vm472_vm0, %v1556_v37 }
  0x43   :  { %593 = vmatprep.mubr.bf16.mxu0 %v1557_v38  ;;  %1465 = vmatprep.mubr.msk.bf16.mxu1 %vm472_vm0, %v1559_v39 }
  0x4a   :  { %594 = vmatmul.mubr.bf16.gmra.mxu0 %v1560_v40  ;;  %1466 = vmatmul.mubr.msk.bf16.gmra.mxu1 %vm472_vm0, %v1561_v41 }
  0x4b   :  { %601 = vmatprep.mubr.bf16.mxu0 %v1562_v42  ;;  %1469 = vmatprep.mubr.msk.bf16.mxu1 %vm472_vm0, %v1564_v43 }
  0x52   :  { %602 = vmatmul.mubr.bf16.gmra.mxu0 %v1565_v44  ;;  %1470 = vmatmul.mubr.msk.bf16.gmra.mxu1 %vm472_vm0, %v1566_v45 }
  0x53   :  { %609 = vmatprep.mubr.bf16.mxu0 %v1567_v46  ;;  %1473 = vmatprep.mubr.msk.bf16.mxu1 %vm472_vm0, %v1569_v47 }
  0x5a   :  { %610 = vmatmul.mubr.bf16.gmra.mxu0 %v1570_v48  ;;  %1474 = vmatmul.mubr.msk.bf16.gmra.mxu1 %vm472_vm0, %v1571_v49 }
  0x5b   :  { %617 = vmatprep.mubr.bf16.mxu0 %v1572_v50  ;;  %1477 = vmatprep.mubr.msk.bf16.mxu1 %vm472_vm0, %v1574_v51 }
  0x62   :  { %618 = vmatmul.mubr.bf16.gmra.mxu0 %v1575_v52  ;;  %1478 = vmatmul.mubr.msk.bf16.gmra.mxu1 %vm472_vm0, %v1576_v53 }
  0x63   :  { %625 = vmatprep.mubr.bf16.mxu0 %v1577_v54  ;;  %1481 = vmatprep.mubr.msk.bf16.mxu1 %vm472_vm0, %v1579_v55 }
  0x6a   :  { %626 = vmatmul.mubr.bf16.gmra.mxu0 %v1580_v56  ;;  %1482 = vmatmul.mubr.msk.bf16.gmra.mxu1 %vm472_vm0, %v1581_v57 }
  0x6b   :  { %633 = vmatprep.mubr.bf16.mxu0 %v1582_v58  ;;  %1485 = vmatprep.mubr.msk.bf16.mxu1 %vm472_vm0, %v1584_v59 }
  0x72   :  { %634 = vmatmul.mubr.bf16.gmra.mxu0 %v1585_v60  ;;  %1486 = vmatmul.mubr.msk.bf16.gmra.mxu1 %vm472_vm0, %v1586_v61 }
  0x73   :  { %641 = vmatprep.mubr.bf16.mxu0 %v1587_v62  ;;  %1489 = vmatprep.mubr.msk.bf16.mxu1 %vm472_vm0, %v1589_v63 }
  0x7a   :  { %642 = vmatmul.mubr.bf16.gmra.mxu0 %v1590_v0  ;;  %1490 = vmatmul.mubr.msk.bf16.gmra.mxu1 %vm472_vm0, %v1591_v1 }
  0xe2   :  { %v1343_v3 = vpop.f32.mrf.mxu0  ;;  %v1415_v4 = vpop.f32.mrf.mxu1 }
  0xe4   :  { %v1344_v5 = vpop.f32.mrf.mxu0  ;;  %v1416_v6 = vpop.f32.mrf.mxu1 }
  0xe5   :  { %v1835_v7 = vadd.f32 %v1416_v6, %v1415_v4  ;;  %v1345_v44 = vadd.f32 %v1344_v5, %v1343_v3 }
  0xe6   :  { %v1346_v8 = vpop.f32.mrf.mxu0  ;;  %v1418_v9 = vpop.f32.mrf.mxu1 }
  0xe8   :  { %v1347_v10 = vpop.f32.mrf.mxu0  ;;  %v1419_v11 = vpop.f32.mrf.mxu1 }
  0xe9   :  { %v1837_v12 = vadd.f32 %v1419_v11, %v1418_v9  ;;  %v1348_v53 = vadd.f32 %v1347_v10, %v1346_v8 }
  0xea   :  { %v1349_v13 = vpop.f32.mrf.mxu0  ;;  %v1421_v14 = vpop.f32.mrf.mxu1 }
  0xec   :  { %v1350_v15 = vpop.f32.mrf.mxu0  ;;  %v1422_v16 = vpop.f32.mrf.mxu1 }
  0xed   :  { %v1839_v17 = vadd.f32 %v1422_v16, %v1421_v14  ;;  %v1351_v41 = vadd.f32 %v1350_v15, %v1349_v13 }
  0xee   :  { %v1352_v18 = vpop.f32.mrf.mxu0  ;;  %v1424_v19 = vpop.f32.mrf.mxu1 }
  0xf0   :  { %v1353_v20 = vpop.f32.mrf.mxu0  ;;  %v1425_v21 = vpop.f32.mrf.mxu1 }
  0xf1   :  { %v1841_v22 = vadd.f32 %v1425_v21, %v1424_v19  ;;  %v1354_v48 = vadd.f32 %v1353_v20, %v1352_v18 }
  0xf2   :  { %v1355_v23 = vpop.f32.mrf.mxu0  ;;  %v1427_v24 = vpop.f32.mrf.mxu1 }
  0xf4   :  { %v1356_v25 = vpop.f32.mrf.mxu0  ;;  %v1428_v26 = vpop.f32.mrf.mxu1 }
  0xf5   :  { %v1843_v27 = vadd.f32 %v1428_v26, %v1427_v24  ;;  %v1357_v61 = vadd.f32 %v1356_v25, %v1355_v23 }
  0xf6   :  { %v1358_v28 = vpop.f32.mrf.mxu0  ;;  %v1430_v29 = vpop.f32.mrf.mxu1 }
  0xf8   :  { %v1359_v30 = vpop.f32.mrf.mxu0  ;;  %v1431_v31 = vpop.f32.mrf.mxu1 }
  0xf9   :  { %v1845_v32 = vadd.f32 %v1431_v31, %v1430_v29  ;;  %v1360_v20 = vadd.f32 %v1359_v30, %v1358_v28 }
  0xfa   :  { %v1361_v33 = vpop.f32.mrf.mxu0  ;;  %v1847_v34 = vpop.f32.mrf.mxu1 }
  0xfc   :  { %v1362_v35 = vpop.f32.mrf.mxu0  ;;  %v1849_v36 = vpop.f32.mrf.mxu1 }
  0xfd   :  { %v1363_v56 = vadd.f32 %v1362_v35, %v1361_v33 }
  0xfe   :  { %v1364_v37 = vpop.f32.mrf.mxu0  ;;  %v1851_v38 = vpop.f32.mrf.mxu1 }
 0x100   :  { %v1365_v39 = vpop.f32.mrf.mxu0  ;;  %v1853_v40 = vpop.f32.mrf.mxu1 }
 0x101   :  { %v1366_v5 = vadd.f32 %v1365_v39, %v1364_v37 }
 0x102   :  { %v1367_v42 = vpop.f32.mrf.mxu0  ;;  %v1463_v43 = vpop.f32.mrf.mxu1 }
 0x103   :  { %v725_v45 = vadd.f32 %v1463_v43, %v1351_v41 }
 0x104   :  { %v1368_v46 = vpop.f32.mrf.mxu0  ;;  %v716_v47 = vpop.f32.mrf.mxu1 }
 0x105   :  { %848 = vst.msk [vmem:[%s2421_s4 + $0x10] sm:$0xff] %vm845_vm2, %v725_v45  ;;  %v717_v49 = vadd.f32 %v1345_v44, %v716_v47  ;;  %v949_v63 = vmul.f32 %v725_v45, %v725_v45  ;;  %v881_v6 = vsel %vm845_vm2, %v725_v45, 0.0  ;;  %v1369_v41 = vadd.f32 %v1368_v46, %v1367_v42 }
 0x106   :  { %v1859_v50 = vpop.f32.mrf.mxu0  ;;  %v1464_v51 = vpop.f32.mrf.mxu1 }
 0x107   :  { %846 = vst.msk [vmem:[%s2421_s4] sm:$0xff] %vm845_vm2, %v717_v49  ;;  %v728_v52 = vadd.f32 %v1464_v51, %v1354_v48  ;;  %v947_v57 = vmul.f32 %v717_v49, %v717_v49  ;;  %v878_v0 = vsel %vm845_vm2, %v717_v49, 0.0  ;;  %v982_v21 = vsel %vm845_vm2, %v949_v63, 0.0 }
 0x108   :  { %v1865_v54 = vpop.f32.mrf.mxu0  ;;  %v719_v55 = vpop.f32.mrf.mxu1 }
 0x109   :  { %849 = vst.msk [vmem:[%s2421_s4 + $0x18] sm:$0xff] %vm845_vm2, %v728_v52  ;;  %v720_v58 = vadd.f32 %v1348_v53, %v719_v55  ;;  %v979_v9 = vsel %vm845_vm2, %v947_v57, 0.0  ;;  %v950_v10 = vmul.f32 %v728_v52, %v728_v52  ;;  %v883_v23 = vsel %vm845_vm2, %v728_v52, 0.0 }
 0x10a   :  { %v1373_v59 = vpop.f32.mrf.mxu0  ;;  %v1467_v60 = vpop.f32.mrf.mxu1 }
 0x10b   :  { %v741_v62 = vadd.f32 %v1467_v60, %v1363_v56  ;;  %847 = vst.msk [vmem:[%s2421_s4 + $0x8] sm:$0xff] %vm845_vm2, %v720_v58  ;;  %v879_v1 = vsel %vm845_vm2, %v720_v58, 0.0  ;;  %v948_v2 = vmul.f32 %v720_v58, %v720_v58  ;;  %v984_v28 = vsel %vm845_vm2, %v950_v10, 0.0 }
 0x10c   :  { %v1374_v3 = vpop.f32.mrf.mxu0  ;;  %v732_v4 = vpop.f32.mrf.mxu1  ;;  %v880_v8 = vadd.f32 %v879_v1, %v878_v0 }
 0x10d   :  { %852 = vst.msk [vmem:[%s2421_s4 + $0x30] sm:$0xff] %vm845_vm2, %v741_v62  ;;  %v980_v11 = vsel %vm845_vm2, %v948_v2, 0.0  ;;  %v733_v13 = vadd.f32 %v1357_v61, %v732_v4  ;;  %v1375_v31 = vadd.f32 %v1374_v3, %v1373_v59  ;;  %v953_v47 = vmul.f32 %v741_v62, %v741_v62 }
 0x10e   :  { %v1376_v14 = vpop.f32.mrf.mxu0  ;;  %v1468_v15 = vpop.f32.mrf.mxu1  ;;  %v882_v16 = vadd.f32 %v881_v6, %v880_v8  ;;  %v981_v18 = vadd.f32 %v980_v11, %v979_v9  ;;  %v889_v42 = vsel %vm845_vm2, %v741_v62, 0.0  ;;  %v1372_v2 = vadd.f32 %v1865_v54, %v1859_v50 }
 0x10f   :  { %v744_v19 = vadd.f32 %v1468_v15, %v1366_v5  ;;  %850 = vst.msk [vmem:[%s2421_s4 + $0x20] sm:$0xff] %vm845_vm2, %v733_v13  ;;  %v951_v24 = vmul.f32 %v733_v13, %v733_v13  ;;  %v885_v30 = vsel %vm845_vm2, %v733_v13, 0.0  ;;  %v990_v3 = vsel %vm845_vm2, %v953_v47, 0.0 }
 0x110   :  { %v1377_v25 = vpop.f32.mrf.mxu0  ;;  %v735_v26 = vpop.f32.mrf.mxu1  ;;  %v983_v29 = vadd.f32 %v982_v21, %v981_v18  ;;  %v884_v33 = vadd.f32 %v883_v23, %v882_v16 }
 0x111   :  { %853 = vst.msk [vmem:[%s2421_s4 + $0x38] sm:$0xff] %vm845_vm2, %v744_v19  ;;  %v736_v35 = vadd.f32 %v1360_v20, %v735_v26  ;;  %v986_v48 = vsel %vm845_vm2, %v951_v24, 0.0  ;;  %v1378_v56 = vadd.f32 %v1377_v25, %v1376_v14  ;;  %v954_v46 = vmul.f32 %v744_v19, %v744_v19 }
 0x112   :  { %v1379_v37 = vpop.f32.mrf.mxu0  ;;  %v1471_v39 = vpop.f32.mrf.mxu1  ;;  %v886_v43 = vadd.f32 %v885_v30, %v884_v33  ;;  %v985_v44 = vadd.f32 %v984_v28, %v983_v29  ;;  %v891_v4 = vsel %vm845_vm2, %v744_v19, 0.0 }
 0x113   :  { %v757_v45 = vadd.f32 %v1471_v39, %v1375_v31  ;;  %851 = vst.msk [vmem:[%s2421_s4 + $0x28] sm:$0xff] %vm845_vm2, %v736_v35  ;;  %v887_v49 = vsel %vm845_vm2, %v736_v35, 0.0  ;;  %v952_v51 = vmul.f32 %v736_v35, %v736_v35  ;;  %v992_v50 = vsel %vm845_vm2, %v954_v46, 0.0 }
 0x114   :  { %v1380_v52 = vpop.f32.mrf.mxu0  ;;  %v748_v53 = vpop.f32.mrf.mxu1  ;;  %v987_v55 = vadd.f32 %v986_v48, %v985_v44  ;;  %v888_v57 = vadd.f32 %v887_v49, %v886_v43 }
 0x115   :  { %856 = vst.msk [vmem:[%s2421_s4 + $0x50] sm:$0xff] %vm845_vm2, %v757_v45  ;;  %v988_v58 = vsel %vm845_vm2, %v952_v51, 0.0  ;;  %v749_v59 = vadd.f32 %v1369_v41, %v748_v53  ;;  %v1381_v14 = vadd.f32 %v1380_v52, %v1379_v37  ;;  %v957_v18 = vmul.f32 %v757_v45, %v757_v45 }
 0x116   :  { %v1382_v60 = vpop.f32.mrf.mxu0  ;;  %v1472_v61 = vpop.f32.mrf.mxu1  ;;  %v890_v63 = vadd.f32 %v889_v42, %v888_v57  ;;  %v989_v0 = vadd.f32 %v988_v58, %v987_v55  ;;  %v897_v39 = vsel %vm845_vm2, %v757_v45, 0.0 }
 0x117   :  { %v760_v1 = vadd.f32 %v1472_v61, %v1378_v56  ;;  %854 = vst.msk [vmem:[%s2421_s4 + $0x40] sm:$0xff] %vm845_vm2, %v749_v59  ;;  %v955_v62 = vmul.f32 %v749_v59, %v749_v59  ;;  %v893_v54 = vsel %vm845_vm2, %v749_v59, 0.0  ;;  %v998_v47 = vsel %vm845_vm2, %v957_v18, 0.0 }
 0x118   :  { %v1383_v5 = vpop.f32.mrf.mxu0  ;;  %v751_v6 = vpop.f32.mrf.mxu1  ;;  %v991_v8 = vadd.f32 %v990_v3, %v989_v0  ;;  %v892_v9 = vadd.f32 %v891_v4, %v890_v63 }
 0x119   :  { %857 = vst.msk [vmem:[%s2421_s4 + $0x58] sm:$0xff] %vm845_vm2, %v760_v1  ;;  %v752_v10 = vadd.f32 %v1372_v2, %v751_v6  ;;  %v994_v19 = vsel %vm845_vm2, %v955_v62, 0.0  ;;  %v1384_v41 = vadd.f32 %v1383_v5, %v1382_v60  ;;  %v958_v48 = vmul.f32 %v760_v1, %v760_v1 }
 0x11a   :  { %v1385_v11 = vpop.f32.mrf.mxu0  ;;  %v1475_v13 = vpop.f32.mrf.mxu1  ;;  %v894_v15 = vadd.f32 %v893_v54, %v892_v9  ;;  %v993_v16 = vadd.f32 %v992_v50, %v991_v8  ;;  %v899_v57 = vsel %vm845_vm2, %v760_v1, 0.0 }
 0x11b   :  { %855 = vst.msk [vmem:[%s2421_s4 + $0x48] sm:$0xff] %vm845_vm2, %v752_v10  ;;  %v895_v20 = vsel %vm845_vm2, %v752_v10, 0.0  ;;  %v956_v21 = vmul.f32 %v752_v10, %v752_v10  ;;  %v1000_v58 = vsel %vm845_vm2, %v958_v48, 0.0 }
 0x11c   :  { %v1386_v23 = vpop.f32.mrf.mxu0  ;;  %v764_v24 = vpop.f32.mrf.mxu1  ;;  %v995_v25 = vadd.f32 %v994_v19, %v993_v16  ;;  %v896_v26 = vadd.f32 %v895_v20, %v894_v15 }
 0x11d   :  { %v1387_v29 = vadd.f32 %v1386_v23, %v1385_v11  ;;  %v765_v31 = vadd.f32 %v1381_v14, %v764_v24  ;;  %v996_v33 = vsel %vm845_vm2, %v956_v21, 0.0 }
 0x11e   :  { %v1388_v28 = vpop.f32.mrf.mxu0  ;;  %v1476_v30 = vpop.f32.mrf.mxu1  ;;  %v997_v35 = vadd.f32 %v996_v33, %v995_v25  ;;  %v898_v49 = vadd.f32 %v897_v39, %v896_v26 }
 0x11f   :  { %v773_v37 = vadd.f32 %v1475_v13, %v1387_v29  ;;  %858 = vst.msk [vmem:[%s2421_s4 + $0x60] sm:$0xff] %vm845_vm2, %v765_v31  ;;  %v959_v60 = vmul.f32 %v765_v31, %v765_v31  ;;  %v901_v4 = vsel %vm845_vm2, %v765_v31, 0.0 }
 0x120   :  { %v1389_v43 = vpop.f32.mrf.mxu0  ;;  %v767_v44 = vpop.f32.mrf.mxu1  ;;  %v999_v51 = vadd.f32 %v998_v47, %v997_v35  ;;  %v900_v59 = vadd.f32 %v899_v57, %v898_v49 }
 0x121   :  { %860 = vst.msk [vmem:[%s2421_s4 + $0x70] sm:$0xff] %vm845_vm2, %v773_v37  ;;  %v1390_v52 = vadd.f32 %v1389_v43, %v1388_v28  ;;  %v768_v53 = vadd.f32 %v1384_v41, %v767_v44  ;;  %v1002_v8 = vsel %vm845_vm2, %v959_v60, 0.0  ;;  %v961_v18 = vmul.f32 %v773_v37, %v773_v37 }
 0x122   :  { %v1391_v55 = vpop.f32.mrf.mxu0  ;;  %v1479_v56 = vpop.f32.mrf.mxu1  ;;  %v1001_v63 = vadd.f32 %v1000_v58, %v999_v51  ;;  %v902_v6 = vadd.f32 %v901_v4, %v900_v59  ;;  %v905_v26 = vsel %vm845_vm2, %v773_v37, 0.0  ;;  %v1435_v4 = vadd.f32 %v1849_v36, %v1847_v34 }
 0x123   :  { %v776_v45 = vadd.f32 %v1476_v30, %v1390_v52  ;;  %859 = vst.msk [vmem:[%s2421_s4 + $0x68] sm:$0xff] %vm845_vm2, %v768_v53  ;;  %v960_v2 = vmul.f32 %v768_v53, %v768_v53  ;;  %v903_v50 = vsel %vm845_vm2, %v768_v53, 0.0  ;;  %v1006_v33 = vsel %vm845_vm2, %v961_v18, 0.0 }
 0x124   :  { %v1392_v42 = vpop.f32.mrf.mxu0  ;;  %v780_v46 = vpop.f32.mrf.mxu1  ;;  %v1003_v9 = vadd.f32 %v1002_v8, %v1001_v63  ;;  %v904_v19 = vadd.f32 %v903_v50, %v902_v6 }
 0x125   :  { %v1393_v61 = vadd.f32 %v1392_v42, %v1391_v55  ;;  %861 = vst.msk [vmem:[%s2421_s4 + $0x78] sm:$0xff] %vm845_vm2, %v776_v45  ;;  %v1004_v13 = vsel %vm845_vm2, %v960_v2, 0.0  ;;  %v962_v28 = vmul.f32 %v776_v45, %v776_v45  ;;  %v907_v37 = vsel %vm845_vm2, %v776_v45, 0.0 }
 0x126   :  { %v1394_v0 = vpop.f32.mrf.mxu0  ;;  %v1480_v1 = vpop.f32.mrf.mxu1  ;;  %v1005_v21 = vadd.f32 %v1004_v13, %v1003_v9  ;;  %v906_v30 = vadd.f32 %v905_v26, %v904_v19 }
 0x127   :  { %v781_v3 = vadd.f32 %v1393_v61, %v780_v46  ;;  %v1008_v52 = vsel %vm845_vm2, %v962_v28, 0.0 }
 0x128   :  { %v1395_v62 = vpop.f32.mrf.mxu0  ;;  %v783_v5 = vpop.f32.mrf.mxu1  ;;  %v1007_v39 = vadd.f32 %v1006_v33, %v1005_v21  ;;  %v908_v53 = vadd.f32 %v907_v37, %v906_v30 }
 0x129   :  { %862 = vst.msk [vmem:[%s2421_s4 + $0x80] sm:$0xff] %vm845_vm2, %v781_v3  ;;  %v1396_v54 = vadd.f32 %v1395_v62, %v1394_v0  ;;  %v963_v44 = vmul.f32 %v781_v3, %v781_v3 }
 0x12a   :  { %v1397_v10 = vpop.f32.mrf.mxu0  ;;  %v1956_v11 = vpop.f32.mrf.mxu1 }
 0x12b   :  { %v784_v14 = vadd.f32 %v1396_v54, %v783_v5  ;;  %v1010_v58 = vsel %vm845_vm2, %v963_v44, 0.0 }
 0x12c   :  { %v1398_v15 = vpop.f32.mrf.mxu0  ;;  %v796_v16 = vpop.f32.mrf.mxu1 }
 0x12d   :  { %v1399_v20 = vadd.f32 %v1398_v15, %v1397_v10  ;;  %863 = vst.msk [vmem:[%s2421_s4 + $0x88] sm:$0xff] %vm845_vm2, %v784_v14  ;;  %v964_v55 = vmul.f32 %v784_v14, %v784_v14  ;;  %v911_v61 = vsel %vm845_vm2, %v784_v14, 0.0 }
 0x12e   :  { %v1400_v23 = vpop.f32.mrf.mxu0  ;;  %v1963_v24 = vpop.f32.mrf.mxu1 }
 0x12f   :  { %v789_v25 = vadd.f32 %v1479_v56, %v1399_v20  ;;  %v1009_v56 = vadd.f32 %v1008_v52, %v1007_v39  ;;  %v1012_v2 = vsel %vm845_vm2, %v964_v55, 0.0 }
 0x130   :  { %v1401_v29 = vpop.f32.mrf.mxu0  ;;  %v799_v31 = vpop.f32.mrf.mxu1 }
 0x131   :  { %864 = vst.msk [vmem:[%s2421_s4 + $0x90] sm:$0xff] %vm845_vm2, %v789_v25  ;;  %v1402_v35 = vadd.f32 %v1401_v29, %v1400_v23  ;;  %v965_v59 = vmul.f32 %v789_v25, %v789_v25  ;;  %v1011_v62 = vadd.f32 %v1010_v58, %v1009_v56  ;;  %v913_v5 = vsel %vm845_vm2, %v789_v25, 0.0 }
 0x132   :  { %v1403_v41 = vpop.f32.mrf.mxu0  ;;  %v1487_v43 = vpop.f32.mrf.mxu1 }
 0x133   :  { %v792_v47 = vadd.f32 %v1480_v1, %v1402_v35  ;;  %v1972_v48 = vadd.f32 %v1487_v43, %v1839_v17  ;;  %v909_v17 = vsel %vm845_vm2, %v781_v3, 0.0  ;;  %v1014_v54 = vsel %vm845_vm2, %v965_v59, 0.0 }
 0x134   :  { %v1404_v49 = vpop.f32.mrf.mxu0  ;;  %v812_v51 = vpop.f32.mrf.mxu1  ;;  %v910_v1 = vadd.f32 %v909_v17, %v908_v53 }
 0x135   :  { %865 = vst.msk [vmem:[%s2421_s4 + $0x98] sm:$0xff] %vm845_vm2, %v792_v47  ;;  %872 = vst.msk [vmem:[%s2421_s4 + $0xd0] sm:$0xff] %vm845_vm2, %v1972_v48  ;;  %v1405_v57 = vadd.f32 %v1404_v49, %v1403_v41  ;;  %v1987_v45 = vadd.f32 %v1835_v7, %v812_v51  ;;  %v966_v6 = vmul.f32 %v792_v47, %v792_v47  ;;  %v915_v34 = vsel %vm845_vm2, %v792_v47, 0.0 }
 0x136   :  { %v1406_v42 = vpop.f32.mrf.mxu0  ;;  %v1488_v46 = vpop.f32.mrf.mxu1  ;;  %v912_v50 = vadd.f32 %v911_v61, %v910_v1 }
 0x137   :  { %v1991_v60 = vadd.f32 %v1488_v46, %v1841_v22  ;;  %v797_v63 = vadd.f32 %v1405_v57, %v796_v16  ;;  %870 = vst.msk [vmem:[%s2421_s4 + $0xc0] sm:$0xff] %vm845_vm2, %v1987_v45  ;;  %v1438_v16 = vadd.f32 %v1853_v40, %v1851_v38  ;;  %v1016_v21 = vsel %vm845_vm2, %v966_v6, 0.0 }
 0x138   :  { %v1407_v0 = vpop.f32.mrf.mxu0  ;;  %v815_v7 = vpop.f32.mrf.mxu1  ;;  %v914_v18 = vadd.f32 %v913_v5, %v912_v50  ;;  %v971_v56 = vmul.f32 %v1987_v45, %v1987_v45  ;;  %v925_v46 = vsel %vm845_vm2, %v1987_v45, 0.0  ;;  %v929_v45 = vsel %vm845_vm2, %v1972_v48, 0.0 }
 0x139   :  { %873 = vst.msk [vmem:[%s2421_s4 + $0xd8] sm:$0xff] %vm845_vm2, %v1991_v60  ;;  %v1408_v22 = vadd.f32 %v1407_v0, %v1406_v42  ;;  %v2006_v3 = vadd.f32 %v1837_v12, %v815_v7  ;;  %866 = vst.msk [vmem:[%s2421_s4 + $0xa0] sm:$0xff] %vm845_vm2, %v797_v63  ;;  %v1013_v12 = vadd.f32 %v1012_v2, %v1011_v62  ;;  %v917_v23 = vsel %vm845_vm2, %v797_v63, 0.0 }
 0x13a   :  { %v1409_v8 = vpop.f32.mrf.mxu0  ;;  %v1491_v9 = vpop.f32.mrf.mxu1  ;;  %v967_v36 = vmul.f32 %v797_v63, %v797_v63  ;;  %v916_v26 = vadd.f32 %v915_v34, %v914_v18  ;;  %v973_v0 = vmul.f32 %v1972_v48, %v1972_v48  ;;  %v1026_v7 = vsel %vm845_vm2, %v971_v56, 0.0 }
 0x13b   :  { %v800_v10 = vadd.f32 %v1408_v22, %v799_v31  ;;  %871 = vst.msk [vmem:[%s2421_s4 + $0xc8] sm:$0xff] %vm845_vm2, %v2006_v3  ;;  %v2022_v13 = vadd.f32 %v1491_v9, %v1435_v4  ;;  %v1015_v20 = vadd.f32 %v1014_v54, %v1013_v12  ;;  %v972_v58 = vmul.f32 %v2006_v3, %v2006_v3 }
 0x13c   :  { %v1410_v14 = vpop.f32.mrf.mxu0  ;;  %v828_v15 = vpop.f32.mrf.mxu1  ;;  %v1018_v28 = vsel %vm845_vm2, %v967_v36, 0.0  ;;  %v918_v43 = vadd.f32 %v917_v23, %v916_v26  ;;  %v927_v1 = vsel %vm845_vm2, %v2006_v3, 0.0  ;;  %v974_v4 = vmul.f32 %v1991_v60, %v1991_v60 }
 0x13d   :  { %867 = vst.msk [vmem:[%s2421_s4 + $0xa8] sm:$0xff] %vm845_vm2, %v800_v10  ;;  %v1411_v19 = vadd.f32 %v1410_v14, %v1409_v8  ;;  %v968_v25 = vmul.f32 %v800_v10, %v800_v10  ;;  %876 = vst.msk [vmem:[%s2421_s4 + $0xf0] sm:$0xff] %vm845_vm2, %v2022_v13  ;;  %v829_v31 = vadd.f32 %v1843_v27, %v828_v15  ;;  %v919_v30 = vsel %vm845_vm2, %v800_v10, 0.0 }
 0x13e   :  { %v1412_v38 = vpop.f32.mrf.mxu0  ;;  %v1492_v40 = vpop.f32.mrf.mxu1  ;;  %v1017_v41 = vadd.f32 %v1016_v21, %v1015_v20  ;;  %v920_v49 = vadd.f32 %v919_v30, %v918_v43  ;;  %v1028_v62 = vsel %vm845_vm2, %v972_v58, 0.0  ;;  %v1030_v8 = vsel %vm845_vm2, %v973_v0, 0.0 }
 0x13f   :  { %v805_v29 = vadd.f32 %v1956_v11, %v1411_v19  ;;  %v2039_v33 = vadd.f32 %v1492_v40, %v1438_v16  ;;  %874 = vst.msk [vmem:[%s2421_s4 + $0xe0] sm:$0xff] %vm845_vm2, %v829_v31  ;;  %v1020_v27 = vsel %vm845_vm2, %v968_v25, 0.0  ;;  %v931_v9 = vsel %vm845_vm2, %v1991_v60, 0.0 }
 0x140   :  { %v1413_v35 = vpop.f32.mrf.mxu0  ;;  %v831_v39 = vpop.f32.mrf.mxu1  ;;  %v1019_v37 = vadd.f32 %v1018_v28, %v1017_v41  ;;  %v975_v50 = vmul.f32 %v829_v31, %v829_v31  ;;  %v1032_v10 = vsel %vm845_vm2, %v974_v4, 0.0  ;;  %v933_v12 = vsel %vm845_vm2, %v829_v31, 0.0  ;;  %v1074_v4 = vld [vmem:[%s2421_s4 + $0x18] sm:$0xff] }
 0x141   :  { %868 = vst.msk [vmem:[%s2421_s4 + $0xb0] sm:$0xff] %vm845_vm2, %v805_v29  ;;  %v969_v44 = vmul.f32 %v805_v29, %v805_v29  ;;  %877 = vst.msk [vmem:[%s2421_s4 + $0xf8] sm:$0xff] %vm845_vm2, %v2039_v33  ;;  %v921_v11 = vsel %vm845_vm2, %v805_v29, 0.0  ;;  %v1414_v47 = vadd.f32 %v1413_v35, %v1412_v38  ;;  %v832_v51 = vadd.f32 %v1845_v32, %v831_v39 }
 0x142   :  { %v1021_v55 = vadd.f32 %v1020_v27, %v1019_v37  ;;  %v922_v17 = vadd.f32 %v921_v11, %v920_v49  ;;  %v977_v14 = vmul.f32 %v2022_v13, %v2022_v13  ;;  %v1034_v15 = vsel %vm845_vm2, %v975_v50, 0.0  ;;  %v1081_v50 = vld [vmem:[%s2421_s4 + $0x50] sm:$0xff] }
 0x143   :  { %v1022_v52 = vsel %vm845_vm2, %v969_v44, 0.0  ;;  %v808_v53 = vadd.f32 %v1963_v24, %v1414_v47  ;;  %875 = vst.msk [vmem:[%s2421_s4 + $0xe8] sm:$0xff] %vm845_vm2, %v832_v51  ;;  %v976_v48 = vmul.f32 %v832_v51, %v832_v51  ;;  %v935_v16 = vsel %vm845_vm2, %v832_v51, 0.0  ;;  %v1048_v51 = vld [vmem:[#allocation2] sm:$0x3] }
 0x144   :  { %v1023_v42 = vadd.f32 %v1022_v52, %v1021_v55  ;;  %v937_v60 = vsel %vm845_vm2, %v2022_v13, 0.0  ;;  %v978_v20 = vmul.f32 %v2039_v33, %v2039_v33  ;;  %v1038_v38 = vsel %vm845_vm2, %v977_v14, 0.0 }
 0x145   :  { %869 = vst.msk [vmem:[%s2421_s4 + $0xb8] sm:$0xff] %vm845_vm2, %v808_v53  ;;  %v923_v32 = vsel %vm845_vm2, %v808_v53, 0.0  ;;  %v970_v57 = vmul.f32 %v808_v53, %v808_v53  ;;  %v1036_v21 = vsel %vm845_vm2, %v976_v48, 0.0  ;;  %v939_v40 = vsel %vm845_vm2, %v2039_v33, 0.0  ;;  %v1080_v48 = vld [vmem:[%s2421_s4 + $0x48] sm:$0xff] }
 0x146   :  { %v924_v24 = vadd.f32 %v923_v32, %v922_v17  ;;  %v1040_v31 = vsel %vm845_vm2, %v978_v20, 0.0  ;;  %v1087_v20 = vld [vmem:[%s2421_s4 + $0x80] sm:$0xff] }
 0x147   :  { %v1024_v59 = vsel %vm845_vm2, %v970_v57, 0.0 }
 0x148   :  { %v926_v61 = vadd.f32 %v925_v46, %v924_v24  ;;  %v1025_v63 = vadd.f32 %v1024_v59, %v1023_v42  ;;  %v1103_v46 = vlaneseq  ;;  %v1066_v59 = vld [vmem:[%s2422_s2] sm:$0x1] }
 0x14a   :  { %v928_v2 = vadd.f32 %v927_v1, %v926_v61  ;;  %v1027_v22 = vadd.f32 %v1026_v7, %v1025_v63  ;;  %v2106_v58 = vshrl.u32 %v1103_v46, 7  ;;  %v2115_v7 = vld [vmem:[%s2423_s3] sm:$0x1] }
 0x14b   :  { %v1099_v46 = vld [vmem:[%s2421_s4 + $0xe0] sm:$0xff] }
 0x14c   :  { %v1029_v5 = vadd.f32 %v1028_v62, %v1027_v22  ;;  %v930_v6 = vadd.f32 %v929_v45, %v928_v2  ;;  %v1105_v61 = vsub.s32 0, %v2106_v58  ;;  %v1073_v22 = vld [vmem:[%s2421_s4 + $0x10] sm:$0xff]  ;;  %v1071_v45 = vld [vmem:[%s2421_s4] sm:$0xff]  ;;  %v1072_v62 = vld [vmem:[%s2421_s4 + $0x8] sm:$0xff] }
 0x14e   :  { %v932_v54 = vadd.f32 %v931_v9, %v930_v6  ;;  %v1031_v3 = vadd.f32 %v1030_v8, %v1029_v5  ;;  %v1077_v5 = vld [vmem:[%s2421_s4 + $0x30] sm:$0xff]  ;;  %v1075_v6 = vld [vmem:[%s2421_s4 + $0x20] sm:$0xff]  ;;  %v1078_v8 = vld [vmem:[%s2421_s4 + $0x38] sm:$0xff] }
 0x14f   :  { %v1076_v9 = vld [vmem:[%s2421_s4 + $0x28] sm:$0xff] }
 0x150   :  { %v934_v34 = vadd.f32 %v933_v12, %v932_v54  ;;  %v1033_v36 = vadd.f32 %v1032_v10, %v1031_v3  ;;  %v1079_v54 = vld [vmem:[%s2421_s4 + $0x40] sm:$0xff]  ;;  %v1082_v3 = vld [vmem:[%s2421_s4 + $0x58] sm:$0xff] }
 0x152   :  { %v936_v18 = vadd.f32 %v935_v16, %v934_v34  ;;  %v1035_v19 = vadd.f32 %v1034_v15, %v1033_v36  ;;  %v1085_v34 = vld [vmem:[%s2421_s4 + $0x70] sm:$0xff]  ;;  %v1083_v36 = vld [vmem:[%s2421_s4 + $0x60] sm:$0xff] }
 0x154   :  { %v938_v23 = vadd.f32 %v937_v60, %v936_v18  ;;  %v1037_v25 = vadd.f32 %v1036_v21, %v1035_v19  ;;  %v1086_v19 = vld [vmem:[%s2421_s4 + $0x78] sm:$0xff]  ;;  %v1084_v60 = vld [vmem:[%s2421_s4 + $0x68] sm:$0xff] }
 0x156   :  { %v940_v26 = vadd.f32 %v939_v40, %v938_v23  ;;  %v1039_v29 = vadd.f32 %v1038_v38, %v1037_v25  ;;  %v1088_v40 = vld [vmem:[%s2421_s4 + $0x88] sm:$0xff] }
 0x158   :  { %v941_v28 = vrot.slane %v940_v26, 4  ;;  %v1041_v30 = vadd.f32 %v1040_v31, %v1039_v29  ;;  %v1090_v29 = vld [vmem:[%s2421_s4 + $0x98] sm:$0xff] }
 0x15a   :  { %v942_v35 = vadd.f32 %v941_v28, %v940_v26  ;;  %v1042_v13 = vrot.slane %v1041_v30, 4  ;;  %v1089_v26 = vld [vmem:[%s2421_s4 + $0x90] sm:$0xff] }
 0x15c   :  { %v943_v39 = vrot.slane %v942_v35, 2  ;;  %v1043_v41 = vadd.f32 %v1042_v13, %v1041_v30  ;;  %v1097_v13 = vld [vmem:[%s2421_s4 + $0xd0] sm:$0xff] }
 0x15e   :  { %v944_v43 = vadd.f32 %v943_v39, %v942_v35  ;;  %v1044_v44 = vrot.slane %v1043_v41, 2  ;;  %v1091_v39 = vld [vmem:[%s2421_s4 + $0xa0] sm:$0xff] }
 0x160   :  { %v945_v27 = vrot.slane %v944_v43, 1  ;;  %v1045_v11 = vadd.f32 %v1044_v44, %v1043_v41  ;;  %v1095_v41 = vld [vmem:[%s2421_s4 + $0xc0] sm:$0xff] }
 0x162   :  { %v1046_v47 = vrot.slane %v1045_v11, 1  ;;  %v946_v37 = vadd.f32 %v945_v27, %v944_v43 }
 0x164   :  { %v1047_v49 = vadd.f32 %v1046_v47, %v1045_v11  ;;  %v1092_v47 = vld [vmem:[%s2421_s4 + $0xa8] sm:$0xff] }
 0x166   :  { %v1050_v33 = vsel %vm1049_vm3, %v946_v37, %v1047_v49  ;;  %v1093_v37 = vld [vmem:[%s2421_s4 + $0xb0] sm:$0xff]  ;;  %v1094_v49 = vld [vmem:[%s2421_s4 + $0xb8] sm:$0xff] }
 0x167   :  { %v1051_v52 = vadd.f32 %v1050_v33, %v1048_v51 }
 0x169   :  { %1053 = vst.msk [vmem:[#allocation2] sm:$0x3] %vm22_vm1, %v1051_v52 }
 0x170   :  { %v1057_v53 = vld [vmem:[#allocation2] sm:$0x1]  ;;  %v1059_v55 = vld [vmem:[#allocation2 + $0x1] sm:$0x1] }
 0x171   :  { %v1058_v17 = vmul.f32 0.00390625, %v1057_v53  ;;  %v1060_v56 = vmul.f32 0.00390625, %v1059_v55  ;;  %v1098_v55 = vld [vmem:[%s2421_s4 + $0xd8] sm:$0xff] }
 0x173   :  { %v1061_v32 = vmul.f32 %v1058_v17, %v1058_v17 }
 0x175   :  { %v1062_v57 = vsub.f32 %v1060_v56, %v1061_v32  ;;  %v1101_v56 = vld [vmem:[%s2421_s4 + $0xf0] sm:$0xff] }
 0x177   :  { %v1063_v42 = vmax.f32 %v1062_v57, 0.0 }
 0x179   :  { %v1064_v24 = vadd.f32 1e-05, %v1063_v42 }
 0x17b   :  { %1592 = vrsqrt.f32 %v1064_v24 }
 0x188   :  { %v1593_v63 = vpop.eup %1592 }
 0x189   :  { %v1067_v0 = vmul.f32 %v1593_v63, %v1066_v59  ;;  %v1102_v59 = vld [vmem:[%s2421_s4 + $0xf8] sm:$0xff]  ;;  %v1100_v63 = vld [vmem:[%s2421_s4 + $0xe8] sm:$0xff] }
 0x18b   :  { %v2117_v1 = vmul.f32 %v1067_v0, %v1058_v17  ;;  %v2121_v2 = vrot.slane %v1067_v0, %v1105_v61  ;;  %v1096_v17 = vld [vmem:[%s2421_s4 + $0xc8] sm:$0xff] }
 0x18d   :  { %v1070_v10 = vsub.f32 %v2115_v7, %v2117_v1  ;;  %v1107_v12 = vmul.f32 %v2121_v2, %v1071_v45  ;;  %v1108_v14 = vmul.f32 %v2121_v2, %v1072_v62  ;;  %v1109_v15 = vmul.f32 %v2121_v2, %v1073_v22 }
 0x18e   :  { %v1110_v16 = vmul.f32 %v2121_v2, %v1074_v4  ;;  %v1111_v18 = vmul.f32 %v2121_v2, %v1075_v6  ;;  %v1112_v21 = vmul.f32 %v2121_v2, %v1076_v9  ;;  %v1113_v23 = vmul.f32 %v2121_v2, %v1077_v5 }
 0x18f   :  { %v1114_v25 = vmul.f32 %v2121_v2, %v1078_v8  ;;  %v1115_v38 = vmul.f32 %v2121_v2, %v1079_v54  ;;  %v1116_v31 = vmul.f32 %v2121_v2, %v1080_v48  ;;  %v1117_v28 = vmul.f32 %v2121_v2, %v1081_v50 }
 0x190   :  { %v1118_v30 = vmul.f32 %v2121_v2, %v1082_v3  ;;  %v1119_v35 = vmul.f32 %v2121_v2, %v1083_v36  ;;  %v1120_v43 = vmul.f32 %v2121_v2, %v1084_v60  ;;  %v1121_v44 = vmul.f32 %v2121_v2, %v1085_v34 }
 0x191   :  { %v1122_v27 = vmul.f32 %v2121_v2, %v1086_v19  ;;  %v1123_v11 = vmul.f32 %v2121_v2, %v1087_v20  ;;  %v1124_v51 = vmul.f32 %v2121_v2, %v1088_v40  ;;  %v1125_v33 = vmul.f32 %v2121_v2, %v1089_v26 }
 0x192   :  { %v1126_v52 = vmul.f32 %v2121_v2, %v1090_v29  ;;  %v1127_v53 = vmul.f32 %v2121_v2, %v1091_v39  ;;  %v1128_v32 = vmul.f32 %v2121_v2, %v1092_v47  ;;  %v1129_v57 = vmul.f32 %v2121_v2, %v1093_v37 }
 0x193   :  { %v1130_v42 = vmul.f32 %v2121_v2, %v1094_v49  ;;  %v1131_v24 = vmul.f32 %v2121_v2, %v1095_v41  ;;  %v1132_v0 = vmul.f32 %v2121_v2, %v1096_v17  ;;  %v1133_v7 = vmul.f32 %v2121_v2, %v1097_v13 }
 0x194   :  { %v1134_v1 = vmul.f32 %v2121_v2, %v1098_v55  ;;  %v1143_v22 = vrot.slane %v1070_v10, %v1105_v61  ;;  %v1135_v45 = vmul.f32 %v2121_v2, %v1099_v46  ;;  %v1136_v4 = vmul.f32 %v2121_v2, %v1100_v63 }
 0x195   :  { %v1137_v62 = vmul.f32 %v2121_v2, %v1101_v56  ;;  %v1138_v5 = vmul.f32 %v2121_v2, %v1102_v59 }
 0x196   :  { %v1145_v6 = vadd.f32 %v1143_v22, %v1107_v12  ;;  %v1146_v8 = vadd.f32 %v1143_v22, %v1108_v14  ;;  %v1147_v9 = vadd.f32 %v1143_v22, %v1109_v15  ;;  %v1148_v50 = vadd.f32 %v1143_v22, %v1110_v16 }
 0x197   :  { %v1149_v54 = vadd.f32 %v1143_v22, %v1111_v18  ;;  %v1150_v3 = vadd.f32 %v1143_v22, %v1112_v21  ;;  %v1151_v48 = vadd.f32 %v1143_v22, %v1113_v23  ;;  %v1152_v34 = vadd.f32 %v1143_v22, %v1114_v25 }
 0x198   :  { %v1153_v36 = vadd.f32 %v1143_v22, %v1115_v38  ;;  %v1154_v19 = vadd.f32 %v1143_v22, %v1116_v31  ;;  %v1155_v58 = vadd.f32 %v1143_v22, %v1117_v28  ;;  %v1156_v61 = vadd.f32 %v1143_v22, %v1118_v30 }
 0x199   :  { %v1157_v10 = vadd.f32 %v1143_v22, %v1119_v35  ;;  %v1158_v60 = vadd.f32 %v1143_v22, %v1120_v43  ;;  %v1159_v20 = vadd.f32 %v1143_v22, %v1121_v44  ;;  %v1160_v40 = vadd.f32 %v1143_v22, %v1122_v27 }
 0x19a   :  { %v1161_v26 = vadd.f32 %v1143_v22, %v1123_v11  ;;  %v1162_v29 = vadd.f32 %v1143_v22, %v1124_v51  ;;  %v1163_v13 = vadd.f32 %v1143_v22, %v1125_v33  ;;  %v1164_v2 = vadd.f32 %v1143_v22, %v1126_v52 }
 0x19b   :  { %v2255_v12 = vadd.f32 %v1143_v22, %v1127_v53  ;;  %v2257_v14 = vadd.f32 %v1143_v22, %v1128_v32  ;;  %v2259_v15 = vadd.f32 %v1143_v22, %v1129_v57  ;;  %v2261_v16 = vadd.f32 %v1143_v22, %v1130_v42 }
 0x19c   :  { %v2263_v18 = vadd.f32 %v1143_v22, %v1131_v24  ;;  %v2265_v21 = vadd.f32 %v1143_v22, %v1132_v0  ;;  %v2267_v23 = vadd.f32 %v1143_v22, %v1133_v7  ;;  %v2269_v25 = vadd.f32 %v1143_v22, %v1134_v1 }
 0x19d   :  { %v2271_v38 = vadd.f32 %v1143_v22, %v1135_v45  ;;  %v2273_v31 = vadd.f32 %v1143_v22, %v1136_v4  ;;  %v2275_v28 = vadd.f32 %v1143_v22, %v1137_v62  ;;  %v2277_v30 = vadd.f32 %v1143_v22, %v1138_v5 }
 0x19e   :  { %v1177_v35 = vmax.f32 %v1145_v6, 0.0  ;;  %v1178_v39 = vmax.f32 %v1146_v8, 0.0  ;;  %v1179_v41 = vmax.f32 %v1147_v9, 0.0  ;;  %v1180_v43 = vmax.f32 %v1148_v50, 0.0 }
 0x19f   :  { %v1181_v44 = vmax.f32 %v1149_v54, 0.0  ;;  %v1182_v27 = vmax.f32 %v1150_v3, 0.0  ;;  %v1183_v11 = vmax.f32 %v1151_v48, 0.0  ;;  %v1184_v47 = vmax.f32 %v1152_v34, 0.0 }
 0x1a0   :  { %v1185_v37 = vmax.f32 %v1153_v36, 0.0  ;;  %v1186_v49 = vmax.f32 %v1154_v19, 0.0  ;;  %v1187_v51 = vmax.f32 %v1155_v58, 0.0  ;;  %v1188_v33 = vmax.f32 %v1156_v61, 0.0  ;;  %1209 = vst.msk [vmem:[%s2421_s4] sm:$0xff] %vm845_vm2, %v1177_v35  ;;  %1210 = vst.msk [vmem:[%s2421_s4 + $0x8] sm:$0xff] %vm845_vm2, %v1178_v39 }
 0x1a1   :  { %1211 = vst.msk [vmem:[%s2421_s4 + $0x10] sm:$0xff] %vm845_vm2, %v1179_v41  ;;  %1212 = vst.msk [vmem:[%s2421_s4 + $0x18] sm:$0xff] %vm845_vm2, %v1180_v43  ;;  %v1189_v52 = vmax.f32 %v1157_v10, 0.0  ;;  %v1190_v53 = vmax.f32 %v1158_v60, 0.0  ;;  %v1191_v55 = vmax.f32 %v1159_v20, 0.0  ;;  %v1192_v17 = vmax.f32 %v1160_v40, 0.0 }
 0x1a2   :  { %1213 = vst.msk [vmem:[%s2421_s4 + $0x20] sm:$0xff] %vm845_vm2, %v1181_v44  ;;  %1214 = vst.msk [vmem:[%s2421_s4 + $0x28] sm:$0xff] %vm845_vm2, %v1182_v27  ;;  %v1193_v56 = vmax.f32 %v1161_v26, 0.0  ;;  %v1194_v32 = vmax.f32 %v1162_v29, 0.0  ;;  %v1195_v57 = vmax.f32 %v1163_v13, 0.0  ;;  %v1196_v42 = vmax.f32 %v1164_v2, 0.0 }
 0x1a3   :  { %1215 = vst.msk [vmem:[%s2421_s4 + $0x30] sm:$0xff] %vm845_vm2, %v1183_v11  ;;  %1216 = vst.msk [vmem:[%s2421_s4 + $0x38] sm:$0xff] %vm845_vm2, %v1184_v47  ;;  %v1197_v24 = vmax.f32 %v2255_v12, 0.0  ;;  %v1198_v46 = vmax.f32 %v2257_v14, 0.0  ;;  %v1199_v59 = vmax.f32 %v2259_v15, 0.0  ;;  %v1200_v63 = vmax.f32 %v2261_v16, 0.0 }
 0x1a4   :  { %1217 = vst.msk [vmem:[%s2421_s4 + $0x40] sm:$0xff] %vm845_vm2, %v1185_v37  ;;  %1218 = vst.msk [vmem:[%s2421_s4 + $0x48] sm:$0xff] %vm845_vm2, %v1186_v49  ;;  %v1201_v0 = vmax.f32 %v2263_v18, 0.0  ;;  %v1202_v7 = vmax.f32 %v2265_v21, 0.0  ;;  %v1203_v1 = vmax.f32 %v2267_v23, 0.0  ;;  %v1204_v22 = vmax.f32 %v2269_v25, 0.0 }
 0x1a5   :  { %1219 = vst.msk [vmem:[%s2421_s4 + $0x50] sm:$0xff] %vm845_vm2, %v1187_v51  ;;  %1220 = vst.msk [vmem:[%s2421_s4 + $0x58] sm:$0xff] %vm845_vm2, %v1188_v33  ;;  %v1205_v45 = vmax.f32 %v2271_v38, 0.0  ;;  %v1206_v4 = vmax.f32 %v2273_v31, 0.0  ;;  %v1207_v62 = vmax.f32 %v2275_v28, 0.0  ;;  %v1208_v5 = vmax.f32 %v2277_v30, 0.0 }
 0x1a6   :  { %1221 = vst.msk [vmem:[%s2421_s4 + $0x60] sm:$0xff] %vm845_vm2, %v1189_v52  ;;  %1222 = vst.msk [vmem:[%s2421_s4 + $0x68] sm:$0xff] %vm845_vm2, %v1190_v53 }
 0x1a7   :  { %1223 = vst.msk [vmem:[%s2421_s4 + $0x70] sm:$0xff] %vm845_vm2, %v1191_v55  ;;  %1224 = vst.msk [vmem:[%s2421_s4 + $0x78] sm:$0xff] %vm845_vm2, %v1192_v17 }
 0x1a8   :  { %1225 = vst.msk [vmem:[%s2421_s4 + $0x80] sm:$0xff] %vm845_vm2, %v1193_v56  ;;  %1226 = vst.msk [vmem:[%s2421_s4 + $0x88] sm:$0xff] %vm845_vm2, %v1194_v32 }
 0x1a9   :  { %1227 = vst.msk [vmem:[%s2421_s4 + $0x90] sm:$0xff] %vm845_vm2, %v1195_v57  ;;  %1228 = vst.msk [vmem:[%s2421_s4 + $0x98] sm:$0xff] %vm845_vm2, %v1196_v42 }
 0x1aa   :  { %1229 = vst.msk [vmem:[%s2421_s4 + $0xa0] sm:$0xff] %vm845_vm2, %v1197_v24  ;;  %1230 = vst.msk [vmem:[%s2421_s4 + $0xa8] sm:$0xff] %vm845_vm2, %v1198_v46 }
 0x1ab   :  { %1231 = vst.msk [vmem:[%s2421_s4 + $0xb0] sm:$0xff] %vm845_vm2, %v1199_v59  ;;  %1232 = vst.msk [vmem:[%s2421_s4 + $0xb8] sm:$0xff] %vm845_vm2, %v1200_v63 }
 0x1ac   :  { %1233 = vst.msk [vmem:[%s2421_s4 + $0xc0] sm:$0xff] %vm845_vm2, %v1201_v0  ;;  %1234 = vst.msk [vmem:[%s2421_s4 + $0xc8] sm:$0xff] %vm845_vm2, %v1202_v7 }
 0x1ad   :  { %1235 = vst.msk [vmem:[%s2421_s4 + $0xd0] sm:$0xff] %vm845_vm2, %v1203_v1  ;;  %1236 = vst.msk [vmem:[%s2421_s4 + $0xd8] sm:$0xff] %vm845_vm2, %v1204_v22 }
 0x1ae   :  { %1237 = vst.msk [vmem:[%s2421_s4 + $0xe0] sm:$0xff] %vm845_vm2, %v1205_v45  ;;  %1238 = vst.msk [vmem:[%s2421_s4 + $0xe8] sm:$0xff] %vm845_vm2, %v1206_v4 }
 0x1af   :  { %1239 = vst.msk [vmem:[%s2421_s4 + $0xf0] sm:$0xff] %vm845_vm2, %v1207_v62  ;;  %1240 = vst.msk [vmem:[%s2421_s4 + $0xf8] sm:$0xff] %vm845_vm2, %v1208_v5 }

// kernel: reference_encoder_forward.10
= control target key start
LH: loop header
LB: loop body
LE: loop exit
PB: predicated region body
PF: predicated region fallthrough
CT: control target
= control target key end

     0   :  { %vm436_vm0 = vcmask 523264   ;;  %vm22_vm1 = vcmask 517120   ;;  %v1020_v56 = vmov 0.0   ;;  %vm705_vm2 = vcmask 1040384   ;;  %s1330_s1 = inlined_call_operand.vmem [shape: bf16[576,64], index: 1, kind: input, shape index: {}]   ;;  %s1331_s0 = inlined_call_operand.vmem [shape: bf16[64,576], index: 0, kind: input, shape index: {}]   ;;  %s1332_s4 = inlined_call_operand.vmem [shape: f32[1,64,64], index: 4, kind: output, shape index: {}]   ;;  %s1333_s2 = inlined_call_operand.vmem [shape: f32[1,64], index: 2, kind: input, shape index: {}]   ;;  %s1334_s3 = inlined_call_operand.vmem [shape: f32[1,64], index: 3, kind: input, shape index: {}]  }
   0x1   :  { %v954_v0 = vld [vmem:[%s1330_s1 + $0x78] sm:$0xff]   ;;  %v958_v4 = vld [vmem:[%s1330_s1 + $0x70] sm:$0xff]   ;;  %v962_v8 = vld [vmem:[%s1330_s1 + $0x68] sm:$0xff]   ;;  %23 = vst.msk [vmem:[#allocation2] sm:$0x3] %vm22_vm1, %v1020_v56 }
   0x2   :  { %v955_v1 = vld [vmem:[%s1330_s1 + $0xf8] sm:$0xff]   ;;  %841 = vmatprep.subr.bf16.mxu0 %v954_v0  ;;  %v959_v5 = vld [vmem:[%s1330_s1 + $0xf0] sm:$0xff]   ;;  %v963_v9 = vld [vmem:[%s1330_s1 + $0xe8] sm:$0xff]  }
   0x3   :  { %v956_v2 = vld [vmem:[%s1330_s1 + $0x38] sm:$0xff]   ;;  %881 = vmatprep.subr.bf16.mxu1 %v955_v1  ;;  %v960_v6 = vld [vmem:[%s1330_s1 + $0x30] sm:$0xff]   ;;  %v964_v10 = vld [vmem:[%s1330_s1 + $0x28] sm:$0xff]  }
   0x4   :  { %v957_v3 = vld [vmem:[%s1330_s1 + $0xb8] sm:$0xff]   ;;  %842 = vmatpush3.bf16.msra.mxu0 %v956_v2  ;;  %v961_v7 = vld [vmem:[%s1330_s1 + $0xb0] sm:$0xff]   ;;  %v965_v11 = vld [vmem:[%s1330_s1 + $0xa8] sm:$0xff]  }
   0x5   :  { %882 = vmatpush3.bf16.msra.mxu1 %v957_v3  ;;  %843 = vmatprep.subr.bf16.mxu0 %v958_v4  ;;  %v966_v12 = vld [vmem:[%s1330_s1 + $0x60] sm:$0xff]   ;;  %v970_v16 = vld [vmem:[%s1330_s1 + $0x58] sm:$0xff]   ;;  %v974_v20 = vld [vmem:[%s1330_s1 + $0x50] sm:$0xff]  }
   0x6   :  { %883 = vmatprep.subr.bf16.mxu1 %v959_v5  ;;  %v967_v13 = vld [vmem:[%s1330_s1 + $0xe0] sm:$0xff]   ;;  %v971_v17 = vld [vmem:[%s1330_s1 + $0xd8] sm:$0xff]   ;;  %v975_v21 = vld [vmem:[%s1330_s1 + $0xd0] sm:$0xff]  }
   0x7   :  { %v968_v14 = vld [vmem:[%s1330_s1 + $0x20] sm:$0xff]   ;;  %v972_v18 = vld [vmem:[%s1330_s1 + $0x18] sm:$0xff]   ;;  %v976_v22 = vld [vmem:[%s1330_s1 + $0x10] sm:$0xff]  }
   0x8   :  { %844 = vmatpush3.bf16.msra.mxu0 %v960_v6  ;;  %v969_v15 = vld [vmem:[%s1330_s1 + $0xa0] sm:$0xff]   ;;  %v973_v19 = vld [vmem:[%s1330_s1 + $0x98] sm:$0xff]   ;;  %v977_v23 = vld [vmem:[%s1330_s1 + $0x90] sm:$0xff]  }
   0x9   :  { %884 = vmatpush3.bf16.msra.mxu1 %v961_v7  ;;  %845 = vmatprep.subr.bf16.mxu0 %v962_v8  ;;  %v978_v24 = vld [vmem:[%s1330_s1 + $0x48] sm:$0xff]   ;;  %v982_v28 = vld [vmem:[%s1330_s1 + $0x40] sm:$0xff]   ;;  %v992_v36 = vld [vmem:[%s1330_s1 + $0x118] sm:$0xff]  }
   0xa   :  { %885 = vmatprep.subr.bf16.mxu1 %v963_v9  ;;  %v979_v25 = vld [vmem:[%s1330_s1 + $0xc8] sm:$0xff]   ;;  %v983_v29 = vld [vmem:[%s1330_s1 + $0xc0] sm:$0xff]   ;;  %v999_v39 = vld [vmem:[%s1330_s1 + $0x110] sm:$0xff]  }
   0xb   :  { %v980_v26 = vld [vmem:[%s1330_s1 + $0x8] sm:$0xff]   ;;  %v984_v30 = vld [vmem:[%s1330_s1] sm:$0xff]   ;;  %v1002_v43 = vld [vmem:[%s1331_s0 + $0x5c] ss:$20 sps:$4 sm:$0xff]  }
   0xc   :  { %846 = vmatpush3.bf16.msra.mxu0 %v964_v10  ;;  %v981_v27 = vld [vmem:[%s1330_s1 + $0x88] sm:$0xff]   ;;  %v985_v31 = vld [vmem:[%s1330_s1 + $0x80] sm:$0xff]   ;;  %v1007_v48 = vld [vmem:[%s1331_s0 + $0x7c] ss:$20 sps:$4 sm:$0xff]  }
   0xd   :  { %886 = vmatpush3.bf16.msra.mxu1 %v965_v11  ;;  %847 = vmatprep.subr.bf16.mxu0 %v966_v12  ;;  %v986_v32 = vld [vmem:[%s1331_s0] ss:$20 sps:$4 sm:$0xff]   ;;  %v988_v33 = vld [vmem:[%s1331_s0 + $0x4] ss:$20 sps:$4 sm:$0xff]   ;;  %v989_v34 = vld [vmem:[%s1331_s0 + $0x8] ss:$20 sps:$4 sm:$0xff]  }
   0xe   :  { %887 = vmatprep.subr.bf16.mxu1 %v967_v13  ;;  %v991_v35 = vld [vmem:[%s1331_s0 + $0xc] ss:$20 sps:$4 sm:$0xff]   ;;  %481 = vmatprep.mubr.bf16.mxu0 %v988_v33  ;;  %v995_v38 = vld [vmem:[%s1331_s0 + $0x34] ss:$20 sps:$4 sm:$0xff]   ;;  %v998_v41 = vld [vmem:[%s1331_s0 + $0x30] ss:$20 sps:$4 sm:$0xff]  }
   0xf   :  { %546 = vmatprep.mubr.bf16.mxu1 %v991_v35  ;;  %v993_v37 = vld [vmem:[%s1331_s0 + $0x2c] ss:$20 sps:$4 sm:$0xff]   ;;  %v997_v40 = vld [vmem:[%s1331_s0 + $0x28] ss:$20 sps:$4 sm:$0xff]   ;;  %v1004_v46 = vld [vmem:[%s1331_s0 + $0x50] ss:$20 sps:$4 sm:$0xff]  }
  0x10   :  { %848 = vmatpush3.bf16.msra.mxu0 %v968_v14  ;;  %v1000_v42 = vld [vmem:[%s1331_s0 + $0x54] ss:$20 sps:$4 sm:$0xff]   ;;  %v1013_v45 = vld [vmem:[%s1330_s1 + $0x100] sm:$0xff]   ;;  %v1005_v47 = vld [vmem:[%s1331_s0 + $0x58] ss:$20 sps:$4 sm:$0xff]  }
  0x11   :  { %888 = vmatpush3.bf16.msra.mxu1 %v969_v15  ;;  %849 = vmatprep.subr.bf16.mxu0 %v970_v16  ;;  %v1006_v44 = vld [vmem:[%s1330_s1 + $0x108] sm:$0xff]   ;;  %v1009_v49 = vld [vmem:[%s1331_s0 + $0x84] ss:$20 sps:$4 sm:$0xff]   ;;  %v1012_v51 = vld [vmem:[%s1331_s0 + $0x80] ss:$20 sps:$4 sm:$0xff]  }
  0x12   :  { %889 = vmatprep.subr.bf16.mxu1 %v971_v17  ;;  %v1011_v50 = vld [vmem:[%s1331_s0 + $0x78] ss:$20 sps:$4 sm:$0xff]   ;;  %v1014_v52 = vld [vmem:[%s1331_s0 + $0x10] ss:$20 sps:$4 sm:$0xff]   ;;  %v1015_v53 = vld [vmem:[%s1331_s0 + $0x60] ss:$20 sps:$4 sm:$0xff]  }
  0x13   :  { %v1016_v54 = vld [vmem:[%s1331_s0 + $0x38] ss:$20 sps:$4 sm:$0xff]   ;;  %v1017_v55 = vld [vmem:[%s1331_s0 + $0x88] ss:$20 sps:$4 sm:$0xff]  }
  0x14   :  { %850 = vmatpush3.bf16.msra.mxu0 %v972_v18 }
  0x15   :  { %890 = vmatpush3.bf16.msra.mxu1 %v973_v19  ;;  %851 = vmatprep.subr.bf16.mxu0 %v974_v20 }
  0x16   :  { %891 = vmatprep.subr.bf16.mxu1 %v975_v21 }
  0x18   :  { %852 = vmatpush3.bf16.msra.mxu0 %v976_v22 }
  0x19   :  { %892 = vmatpush3.bf16.msra.mxu1 %v977_v23  ;;  %853 = vmatprep.subr.bf16.mxu0 %v978_v24 }
  0x1a   :  { %893 = vmatprep.subr.bf16.mxu1 %v979_v25 }
  0x1c   :  { %854 = vmatpush3.bf16.msra.mxu0 %v980_v26 }
  0x1d   :  { %894 = vmatpush3.bf16.msra.mxu1 %v981_v27  ;;  %855 = vmatprep.subr.bf16.mxu0 %v982_v28 }
  0x1e   :  { %895 = vmatprep.subr.bf16.mxu1 %v983_v29 }
  0x20   :  { %856 = vmatpush3.bf16.msra.mxu0 %v984_v30 }
  0x21   :  { %896 = vmatpush3.bf16.msra.mxu1 %v985_v31  ;;  %929 = vmatprep.subr.bf16.mxu0 %v992_v36 }
  0x22   :  { %945 = vmatprep.subr.bf16.mxu1 %v992_v36 }
  0x23   :  { %482 = vmatmul.mubr.bf16.vlgmr.msra.gmra.mxu0 %v986_v32 }
  0x24   :  { %547 = vmatmul.mubr.bf16.vlgmr.msra.gmra.mxu1 %v989_v34  ;;  %930 = vmatpush3.bf16.msra.mxu0 %v992_v36 }
  0x25   :  { %489 = vmatprep.mubr.bf16.mxu0 %v993_v37  ;;  %554 = vmatprep.mubr.bf16.mxu1 %v995_v38 }
  0x26   :  { %949 = vmatpush3.bf16.msra.mxu1 %v992_v36  ;;  %931 = vmatprep.subr.bf16.mxu0 %v999_v39 }
  0x27   :  { %946 = vmatprep.subr.bf16.mxu1 %v999_v39 }
  0x28   :  { %932 = vmatpush3.bf16.msra.mxu0 %v999_v39 }
  0x29   :  { %933 = vmatprep.subr.bf16.mxu0 %v1006_v44 }
  0x2a   :  { %950 = vmatpush3.bf16.msra.mxu1 %v999_v39 }
  0x2b   :  { %490 = vmatmul.mubr.bf16.gmra.mxu0 %v997_v40  ;;  %947 = vmatprep.subr.bf16.mxu1 %v1006_v44 }
  0x2c   :  { %555 = vmatmul.mubr.bf16.gmra.mxu1 %v998_v41  ;;  %497 = vmatprep.mubr.bf16.mxu0 %v1000_v42 }
  0x2d   :  { %562 = vmatprep.mubr.bf16.mxu1 %v1002_v43  ;;  %934 = vmatpush3.bf16.msra.mxu0 %v1006_v44 }
  0x2e   :  { %935 = vmatprep.subr.bf16.mxu0 %v1013_v45  ;;  %951 = vmatpush3.bf16.msra.mxu1 %v1006_v44 }
  0x2f   :  { %948 = vmatprep.subr.bf16.mxu1 %v1013_v45 }
  0x31   :  { %936 = vmatpush3.bf16.msra.mxu0 %v1013_v45 }
  0x32   :  { %952 = vmatpush3.bf16.msra.mxu1 %v1013_v45 }
  0x33   :  { %498 = vmatmul.mubr.bf16.gmra.mxu0 %v1004_v46 }
  0x34   :  { %563 = vmatmul.mubr.bf16.gmra.mxu1 %v1005_v47  ;;  %505 = vmatprep.mubr.bf16.mxu0 %v1007_v48 }
  0x35   :  { %570 = vmatprep.mubr.bf16.mxu1 %v1009_v49 }
  0x3b   :  { %506 = vmatmul.mubr.bf16.gmra.mxu0 %v1011_v50 }
  0x3c   :  { %571 = vmatmul.mubr.bf16.gmra.mxu1 %v1012_v51  ;;  %937 = vmatprep.mubr.msk.bf16.mxu0 %vm436_vm0, %v1014_v52 }
  0x3d   :  { %941 = vmatprep.mubr.msk.bf16.mxu1 %vm436_vm0, %v1015_v53 }
  0x43   :  { %938 = vmatmul.mubr.msk.bf16.vlgmr.msra.gmra.mxu0 %vm436_vm0, %v1016_v54 }
  0x44   :  { %942 = vmatmul.mubr.msk.bf16.vlgmr.msra.gmra.mxu1 %vm436_vm0, %v1017_v55 }
  0xe3   :  { %v857_v57 = vpop.f32.mrf.mxu0 }
  0xe4   :  { %v897_v58 = vpop.f32.mrf.mxu1 }
  0xe5   :  { %v858_v59 = vpop.f32.mrf.mxu0 }
  0xe6   :  { %v898_v60 = vpop.f32.mrf.mxu1  ;;  %v859_v26 = vadd.f32 %v858_v59, %v857_v57 }
  0xe7   :  { %v860_v61 = vpop.f32.mrf.mxu0  ;;  %v899_v27 = vadd.f32 %v898_v60, %v897_v58 }
  0xe8   :  { %v900_v62 = vpop.f32.mrf.mxu1 }
  0xe9   :  { %v861_v63 = vpop.f32.mrf.mxu0  ;;  %v549_v44 = vadd.f32 %v899_v27, %v859_v26 }
  0xea   :  { %v901_v0 = vpop.f32.mrf.mxu1  ;;  %v862_v40 = vadd.f32 %v861_v63, %v860_v61 }
  0xeb   :  { %v863_v1 = vpop.f32.mrf.mxu0  ;;  %v902_v41 = vadd.f32 %v901_v0, %v900_v62 }
  0xec   :  { %v903_v2 = vpop.f32.mrf.mxu1 }
  0xed   :  { %v864_v3 = vpop.f32.mrf.mxu0  ;;  %v552_v58 = vadd.f32 %v902_v41, %v862_v40 }
  0xee   :  { %v904_v4 = vpop.f32.mrf.mxu1  ;;  %v865_v20 = vadd.f32 %v864_v3, %v863_v1 }
  0xef   :  { %v866_v5 = vpop.f32.mrf.mxu0  ;;  %v905_v21 = vadd.f32 %v904_v4, %v903_v2 }
  0xf0   :  { %v906_v6 = vpop.f32.mrf.mxu1 }
  0xf1   :  { %v867_v7 = vpop.f32.mrf.mxu0  ;;  %v557_v35 = vadd.f32 %v905_v21, %v865_v20 }
  0xf2   :  { %v907_v8 = vpop.f32.mrf.mxu1  ;;  %v868_v32 = vadd.f32 %v867_v7, %v866_v5 }
  0xf3   :  { %v869_v9 = vpop.f32.mrf.mxu0  ;;  %v908_v33 = vadd.f32 %v907_v8, %v906_v6 }
  0xf4   :  { %v909_v10 = vpop.f32.mrf.mxu1 }
  0xf5   :  { %v870_v11 = vpop.f32.mrf.mxu0  ;;  %v560_v52 = vadd.f32 %v908_v33, %v868_v32 }
  0xf6   :  { %v910_v12 = vpop.f32.mrf.mxu1  ;;  %v871_v29 = vadd.f32 %v870_v11, %v869_v9 }
  0xf7   :  { %v872_v13 = vpop.f32.mrf.mxu0  ;;  %v911_v30 = vadd.f32 %v910_v12, %v909_v10 }
  0xf8   :  { %v912_v14 = vpop.f32.mrf.mxu1 }
  0xf9   :  { %v873_v15 = vpop.f32.mrf.mxu0  ;;  %v565_v49 = vadd.f32 %v911_v30, %v871_v29 }
  0xfa   :  { %v913_v16 = vpop.f32.mrf.mxu1  ;;  %v874_v45 = vadd.f32 %v873_v15, %v872_v13 }
  0xfb   :  { %v875_v17 = vpop.f32.mrf.mxu0  ;;  %v914_v46 = vadd.f32 %v913_v16, %v912_v14 }
  0xfc   :  { %v915_v18 = vpop.f32.mrf.mxu1 }
  0xfd   :  { %v876_v19 = vpop.f32.mrf.mxu0  ;;  %v568_v61 = vadd.f32 %v914_v46, %v874_v45 }
  0xfe   :  { %v916_v22 = vpop.f32.mrf.mxu1  ;;  %v877_v23 = vadd.f32 %v876_v19, %v875_v17 }
  0xff   :  { %v917_v24 = vadd.f32 %v916_v22, %v915_v18  ;;  %v878_v25 = vpop.f32.mrf.mxu0 }
 0x100   :  { %v918_v28 = vpop.f32.mrf.mxu1 }
 0x101   :  { %v879_v31 = vpop.f32.mrf.mxu0  ;;  %v573_v39 = vadd.f32 %v917_v24, %v877_v23 }
 0x102   :  { %v919_v34 = vpop.f32.mrf.mxu1  ;;  %v880_v36 = vadd.f32 %v879_v31, %v878_v25 }
 0x103   :  { %v920_v37 = vadd.f32 %v919_v34, %v918_v28  ;;  %v939_v38 = vpop.f32.mrf.mxu0 }
 0x104   :  { %v622_v42 = vadd.f32 %v939_v38, %v557_v35  ;;  %v943_v43 = vpop.f32.mrf.mxu1 }
 0x105   :  { %v638_v47 = vadd.f32 %v943_v43, %v573_v39  ;;  %v613_v48 = vpop.f32.mrf.mxu0  ;;  %v576_v55 = vadd.f32 %v920_v37, %v880_v36 }
 0x106   :  { %648 = vst.msk [vmem:[%s1332_s4 + $0x10] sm:$0xff] %vm436_vm0, %v622_v42  ;;  %v614_v50 = vadd.f32 %v613_v48, %v549_v44  ;;  %v629_v51 = vpop.f32.mrf.mxu1  ;;  %v677_v2 = vmul.f32 %v622_v42, %v622_v42  ;;  %v657_v7 = vsel %vm436_vm0, %v622_v42, 0.0 }
 0x107   :  { %652 = vst.msk [vmem:[%s1332_s4 + $0x30] sm:$0xff] %vm436_vm0, %v638_v47  ;;  %v630_v53 = vadd.f32 %v629_v51, %v565_v49  ;;  %v940_v54 = vpop.f32.mrf.mxu0  ;;  %v681_v23 = vmul.f32 %v638_v47, %v638_v47  ;;  %v665_v28 = vsel %vm436_vm0, %v638_v47, 0.0  ;;  %v704_v51 = vld [vmem:[#allocation2] sm:$0x3] }
 0x108   :  { %646 = vst.msk [vmem:[%s1332_s4] sm:$0xff] %vm436_vm0, %v614_v50  ;;  %v625_v56 = vadd.f32 %v940_v54, %v560_v52  ;;  %v944_v57 = vpop.f32.mrf.mxu1  ;;  %v675_v62 = vmul.f32 %v614_v50, %v614_v50  ;;  %v654_v3 = vsel %vm436_vm0, %v614_v50, 0.0  ;;  %v686_v13 = vsel %vm436_vm0, %v677_v2, 0.0 }
 0x109   :  { %650 = vst.msk [vmem:[%s1332_s4 + $0x20] sm:$0xff] %vm436_vm0, %v630_v53  ;;  %v641_v59 = vadd.f32 %v944_v57, %v576_v55  ;;  %v616_v60 = vpop.f32.mrf.mxu0  ;;  %v679_v14 = vmul.f32 %v630_v53, %v630_v53  ;;  %v661_v18 = vsel %vm436_vm0, %v630_v53, 0.0  ;;  %v694_v33 = vsel %vm436_vm0, %v681_v23, 0.0 }
 0x10a   :  { %649 = vst.msk [vmem:[%s1332_s4 + $0x18] sm:$0xff] %vm436_vm0, %v625_v56  ;;  %v617_v63 = vadd.f32 %v616_v60, %v552_v58  ;;  %v632_v0 = vpop.f32.mrf.mxu1  ;;  %v683_v8 = vsel %vm436_vm0, %v675_v62, 0.0  ;;  %v678_v9 = vmul.f32 %v625_v56, %v625_v56  ;;  %v659_v15 = vsel %vm436_vm0, %v625_v56, 0.0 }
 0x10b   :  { %653 = vst.msk [vmem:[%s1332_s4 + $0x38] sm:$0xff] %vm436_vm0, %v641_v59  ;;  %v633_v1 = vadd.f32 %v632_v0, %v568_v61  ;;  %v690_v24 = vsel %vm436_vm0, %v679_v14, 0.0  ;;  %v682_v29 = vmul.f32 %v641_v59, %v641_v59  ;;  %v667_v34 = vsel %vm436_vm0, %v641_v59, 0.0  ;;  %v722_v0 = vld [vmem:[%s1333_s2] sm:$0x1] }
 0x10c   :  { %647 = vst.msk [vmem:[%s1332_s4 + $0x8] sm:$0xff] %vm436_vm0, %v617_v63  ;;  %v655_v4 = vsel %vm436_vm0, %v617_v63, 0.0  ;;  %v676_v5 = vmul.f32 %v617_v63, %v617_v63  ;;  %v688_v19 = vsel %vm436_vm0, %v678_v9, 0.0  ;;  %v735_v62 = vlaneseq }
 0x10d   :  { %v656_v6 = vadd.f32 %v655_v4, %v654_v3  ;;  %651 = vst.msk [vmem:[%s1332_s4 + $0x28] sm:$0xff] %vm436_vm0, %v633_v1  ;;  %v680_v20 = vmul.f32 %v633_v1, %v633_v1  ;;  %v663_v25 = vsel %vm436_vm0, %v633_v1, 0.0  ;;  %v696_v37 = vsel %vm436_vm0, %v682_v29, 0.0  ;;  %v724_v4 = vld [vmem:[%s1334_s3] sm:$0x1] }
 0x10e   :  { %v684_v10 = vsel %vm436_vm0, %v676_v5, 0.0  ;;  %v736_v63 = vshrl.u32 %v735_v62, 7 }
 0x10f   :  { %v658_v11 = vadd.f32 %v657_v7, %v656_v6  ;;  %v685_v12 = vadd.f32 %v684_v10, %v683_v8  ;;  %v692_v30 = vsel %vm436_vm0, %v680_v20, 0.0  ;;  %v729_v7 = vld [vmem:[%s1332_s4 + $0x10] sm:$0xff]  ;;  %v727_v8 = vld [vmem:[%s1332_s4] sm:$0xff] }
 0x110   :  { %v737_v1 = vsub.s32 0, %v736_v63  ;;  %v733_v10 = vld [vmem:[%s1332_s4 + $0x30] sm:$0xff]  ;;  %v731_v14 = vld [vmem:[%s1332_s4 + $0x20] sm:$0xff] }
 0x111   :  { %v687_v16 = vadd.f32 %v686_v13, %v685_v12  ;;  %v660_v17 = vadd.f32 %v659_v15, %v658_v11  ;;  %v730_v11 = vld [vmem:[%s1332_s4 + $0x18] sm:$0xff] }
 0x112   :  { %v734_v15 = vld [vmem:[%s1332_s4 + $0x38] sm:$0xff] }
 0x113   :  { %v662_v21 = vadd.f32 %v661_v18, %v660_v17  ;;  %v689_v22 = vadd.f32 %v688_v19, %v687_v16  ;;  %v728_v12 = vld [vmem:[%s1332_s4 + $0x8] sm:$0xff] }
 0x114   :  { %v732_v16 = vld [vmem:[%s1332_s4 + $0x28] sm:$0xff] }
 0x115   :  { %v664_v26 = vadd.f32 %v663_v25, %v662_v21  ;;  %v691_v27 = vadd.f32 %v690_v24, %v689_v22 }
 0x117   :  { %v666_v31 = vadd.f32 %v665_v28, %v664_v26  ;;  %v693_v32 = vadd.f32 %v692_v30, %v691_v27 }
 0x119   :  { %v668_v35 = vadd.f32 %v667_v34, %v666_v31  ;;  %v695_v36 = vadd.f32 %v694_v33, %v693_v32 }
 0x11b   :  { %v669_v38 = vrot.slane %v668_v35, 4  ;;  %v697_v39 = vadd.f32 %v696_v37, %v695_v36 }
 0x11d   :  { %v670_v40 = vadd.f32 %v669_v38, %v668_v35  ;;  %v698_v41 = vrot.slane %v697_v39, 4 }
 0x11f   :  { %v671_v42 = vrot.slane %v670_v40, 2  ;;  %v699_v43 = vadd.f32 %v698_v41, %v697_v39 }
 0x121   :  { %v672_v44 = vadd.f32 %v671_v42, %v670_v40  ;;  %v700_v45 = vrot.slane %v699_v43, 2 }
 0x123   :  { %v673_v46 = vrot.slane %v672_v44, 1  ;;  %v701_v47 = vadd.f32 %v700_v45, %v699_v43 }
 0x125   :  { %v702_v48 = vrot.slane %v701_v47, 1  ;;  %v674_v49 = vadd.f32 %v673_v46, %v672_v44 }
 0x127   :  { %v703_v50 = vadd.f32 %v702_v48, %v701_v47 }
 0x129   :  { %v706_v52 = vsel %vm705_vm2, %v674_v49, %v703_v50 }
 0x12a   :  { %v707_v53 = vadd.f32 %v706_v52, %v704_v51 }
 0x12c   :  { %709 = vst.msk [vmem:[#allocation2] sm:$0x3] %vm22_vm1, %v707_v53 }
 0x133   :  { %v713_v54 = vld [vmem:[#allocation2] sm:$0x1]  ;;  %v715_v55 = vld [vmem:[#allocation2 + $0x1] sm:$0x1] }
 0x134   :  { %v714_v56 = vmul.f32 0.015625, %v713_v54  ;;  %v716_v57 = vmul.f32 0.015625, %v715_v55 }
 0x136   :  { %v717_v58 = vmul.f32 %v714_v56, %v714_v56 }
 0x138   :  { %v718_v59 = vsub.f32 %v716_v57, %v717_v58 }
 0x13a   :  { %v719_v60 = vmax.f32 %v718_v59, 0.0 }
 0x13c   :  { %v720_v61 = vadd.f32 1e-05, %v719_v60 }
 0x13e   :  { %1018 = vrsqrt.f32 %v720_v61 }
 0x14b   :  { %v1019_v2 = vpop.eup %1018 }
 0x14c   :  { %v723_v3 = vmul.f32 %v1019_v2, %v722_v0 }
 0x14e   :  { %v725_v5 = vmul.f32 %v723_v3, %v714_v56  ;;  %v738_v6 = vrot.slane %v723_v3, %v737_v1 }
 0x150   :  { %v726_v9 = vsub.f32 %v724_v4, %v725_v5  ;;  %v739_v13 = vmul.f32 %v738_v6, %v727_v8  ;;  %v740_v17 = vmul.f32 %v738_v6, %v728_v12  ;;  %v741_v18 = vmul.f32 %v738_v6, %v729_v7 }
 0x151   :  { %v742_v19 = vmul.f32 %v738_v6, %v730_v11  ;;  %v743_v21 = vmul.f32 %v738_v6, %v731_v14  ;;  %v744_v22 = vmul.f32 %v738_v6, %v732_v16  ;;  %v745_v23 = vmul.f32 %v738_v6, %v733_v10 }
 0x152   :  { %v751_v20 = vrot.slane %v726_v9, %v737_v1  ;;  %v746_v24 = vmul.f32 %v738_v6, %v734_v15 }
 0x154   :  { %v753_v25 = vadd.f32 %v751_v20, %v739_v13  ;;  %v754_v26 = vadd.f32 %v751_v20, %v740_v17  ;;  %v755_v27 = vadd.f32 %v751_v20, %v741_v18  ;;  %v756_v28 = vadd.f32 %v751_v20, %v742_v19 }
 0x155   :  { %v757_v29 = vadd.f32 %v751_v20, %v743_v21  ;;  %v758_v30 = vadd.f32 %v751_v20, %v744_v22  ;;  %v759_v31 = vadd.f32 %v751_v20, %v745_v23  ;;  %v760_v32 = vadd.f32 %v751_v20, %v746_v24 }
 0x156   :  { %v761_v33 = vmax.f32 %v753_v25, 0.0  ;;  %v762_v34 = vmax.f32 %v754_v26, 0.0  ;;  %v763_v35 = vmax.f32 %v755_v27, 0.0  ;;  %v764_v36 = vmax.f32 %v756_v28, 0.0 }
 0x157   :  { %v765_v37 = vmax.f32 %v757_v29, 0.0  ;;  %v766_v38 = vmax.f32 %v758_v30, 0.0  ;;  %v767_v39 = vmax.f32 %v759_v31, 0.0  ;;  %v768_v40 = vmax.f32 %v760_v32, 0.0 }
 0x158   :  { %769 = vst.msk [vmem:[%s1332_s4] sm:$0xff] %vm436_vm0, %v761_v33  ;;  %770 = vst.msk [vmem:[%s1332_s4 + $0x8] sm:$0xff] %vm436_vm0, %v762_v34 }
 0x159   :  { %771 = vst.msk [vmem:[%s1332_s4 + $0x10] sm:$0xff] %vm436_vm0, %v763_v35  ;;  %772 = vst.msk [vmem:[%s1332_s4 + $0x18] sm:$0xff] %vm436_vm0, %v764_v36 }
 0x15a   :  { %773 = vst.msk [vmem:[%s1332_s4 + $0x20] sm:$0xff] %vm436_vm0, %v765_v37  ;;  %774 = vst.msk [vmem:[%s1332_s4 + $0x28] sm:$0xff] %vm436_vm0, %v766_v38 }
 0x15b   :  { %775 = vst.msk [vmem:[%s1332_s4 + $0x30] sm:$0xff] %vm436_vm0, %v767_v39  ;;  %776 = vst.msk [vmem:[%s1332_s4 + $0x38] sm:$0xff] %vm436_vm0, %v768_v40 }

// kernel: reference_encoder_forward.11
= control target key start
LH: loop header
LB: loop body
LE: loop exit
PB: predicated region body
PF: predicated region fallthrough
CT: control target
= control target key end

     0   :  { %v685_v1 = vmov 0.0   ;;  %vm686_vm0 = vmmov 0   ;;  %vm342_vm1 = vcmask 523264   ;;  %vm490_vm2 = vcmask 1040384   ;;  %s853_s1 = inlined_call_operand.vmem [shape: bf16[576,128], index: 1, kind: input, shape index: {}]   ;;  %s854_s0 = inlined_call_operand.vmem [shape: bf16[16,576], index: 0, kind: input, shape index: {}]   ;;  %s855_s2 = inlined_call_operand.vmem [shape: f32[1,128], index: 2, kind: input, shape index: {}]   ;;  %s856_s3 = inlined_call_operand.vmem [shape: f32[1,128], index: 3, kind: input, shape index: {}]   ;;  %s857_s4 = inlined_call_operand.vmem [shape: f32[1,16,128], index: 4, kind: output, shape index: {}]  }
   0x1   :  { %v640_v0 = vld [vmem:[%s853_s1 + $0x78] sm:$0xff]   ;;  %22 = vst [vmem:[#allocation2] sm:$0x3] %v685_v1  ;;  %v644_v5 = vld [vmem:[%s853_s1 + $0x70] sm:$0xff]   ;;  %v648_v9 = vld [vmem:[%s853_s1 + $0x68] sm:$0xff]  }
   0x2   :  { %v641_v2 = vld [vmem:[%s853_s1 + $0xf8] sm:$0xff]   ;;  %577 = vmatprep.subr.bf16.mxu0 %v640_v0  ;;  %v645_v6 = vld [vmem:[%s853_s1 + $0xf0] sm:$0xff]   ;;  %v649_v10 = vld [vmem:[%s853_s1 + $0xe8] sm:$0xff]  }
   0x3   :  { %v642_v3 = vld [vmem:[%s853_s1 + $0x38] sm:$0xff]   ;;  %599 = vmatprep.subr.bf16.mxu1 %v641_v2  ;;  %v646_v7 = vld [vmem:[%s853_s1 + $0x30] sm:$0xff]   ;;  %v650_v11 = vld [vmem:[%s853_s1 + $0x28] sm:$0xff]  }
   0x4   :  { %v643_v4 = vld [vmem:[%s853_s1 + $0xb8] sm:$0xff]   ;;  %578 = vmatpush3.bf16.msra.mxu0 %v642_v3  ;;  %v647_v8 = vld [vmem:[%s853_s1 + $0xb0] sm:$0xff]   ;;  %v651_v12 = vld [vmem:[%s853_s1 + $0xa8] sm:$0xff]  }
   0x5   :  { %600 = vmatpush3.bf16.msra.mxu1 %v643_v4  ;;  %579 = vmatprep.subr.bf16.mxu0 %v644_v5  ;;  %v652_v13 = vld [vmem:[%s853_s1 + $0x60] sm:$0xff]   ;;  %v656_v17 = vld [vmem:[%s853_s1 + $0x58] sm:$0xff]   ;;  %v660_v21 = vld [vmem:[%s853_s1 + $0x50] sm:$0xff]  }
   0x6   :  { %601 = vmatprep.subr.bf16.mxu1 %v645_v6  ;;  %v653_v14 = vld [vmem:[%s853_s1 + $0xe0] sm:$0xff]   ;;  %v657_v18 = vld [vmem:[%s853_s1 + $0xd8] sm:$0xff]   ;;  %v661_v22 = vld [vmem:[%s853_s1 + $0xd0] sm:$0xff]  }
   0x7   :  { %v654_v15 = vld [vmem:[%s853_s1 + $0x20] sm:$0xff]   ;;  %v658_v19 = vld [vmem:[%s853_s1 + $0x18] sm:$0xff]   ;;  %v662_v23 = vld [vmem:[%s853_s1 + $0x10] sm:$0xff]  }
   0x8   :  { %580 = vmatpush3.bf16.msra.mxu0 %v646_v7  ;;  %v655_v16 = vld [vmem:[%s853_s1 + $0xa0] sm:$0xff]   ;;  %v659_v20 = vld [vmem:[%s853_s1 + $0x98] sm:$0xff]   ;;  %v663_v24 = vld [vmem:[%s853_s1 + $0x90] sm:$0xff]  }
   0x9   :  { %602 = vmatpush3.bf16.msra.mxu1 %v647_v8  ;;  %581 = vmatprep.subr.bf16.mxu0 %v648_v9  ;;  %v664_v25 = vld [vmem:[%s853_s1 + $0x48] sm:$0xff]   ;;  %v668_v29 = vld [vmem:[%s853_s1 + $0x40] sm:$0xff]   ;;  %v678_v37 = vld [vmem:[%s853_s1 + $0x118] sm:$0xff]  }
   0xa   :  { %603 = vmatprep.subr.bf16.mxu1 %v649_v10  ;;  %v665_v26 = vld [vmem:[%s853_s1 + $0xc8] sm:$0xff]   ;;  %v669_v30 = vld [vmem:[%s853_s1 + $0xc0] sm:$0xff]   ;;  %v679_v38 = vld [vmem:[%s853_s1 + $0x110] sm:$0xff]  }
   0xb   :  { %v666_v27 = vld [vmem:[%s853_s1 + $0x8] sm:$0xff]   ;;  %v670_v31 = vld [vmem:[%s853_s1] sm:$0xff]  }
   0xc   :  { %582 = vmatpush3.bf16.msra.mxu0 %v650_v11  ;;  %v667_v28 = vld [vmem:[%s853_s1 + $0x88] sm:$0xff]   ;;  %v671_v32 = vld [vmem:[%s853_s1 + $0x80] sm:$0xff]  }
   0xd   :  { %604 = vmatpush3.bf16.msra.mxu1 %v651_v12  ;;  %583 = vmatprep.subr.bf16.mxu0 %v652_v13  ;;  %v672_v33 = vld [vmem:[%s854_s0] ss:$20 sps:$4 sm:$0xff]   ;;  %v674_v34 = vld [vmem:[%s854_s0 + $0x4] ss:$20 sps:$4 sm:$0xff]   ;;  %v675_v35 = vld [vmem:[%s854_s0 + $0x8] ss:$20 sps:$4 sm:$0xff]  }
   0xe   :  { %605 = vmatprep.subr.bf16.mxu1 %v653_v14  ;;  %v677_v36 = vld [vmem:[%s854_s0 + $0xc] ss:$20 sps:$4 sm:$0xff]   ;;  %378 = vmatprep.mubr.bf16.mxu0 %v674_v34  ;;  %v682_v41 = vld [vmem:[%s854_s0 + $0x10] ss:$20 sps:$4 sm:$0xff]  }
   0xf   :  { %419 = vmatprep.mubr.bf16.mxu1 %v677_v36  ;;  %v680_v39 = vld [vmem:[%s853_s1 + $0x108] sm:$0xff]   ;;  %v681_v40 = vld [vmem:[%s853_s1 + $0x100] sm:$0xff]  }
  0x10   :  { %584 = vmatpush3.bf16.msra.mxu0 %v654_v15  ;;  %v489_v14 = vld [vmem:[#allocation2] sm:$0x3] }
  0x11   :  { %606 = vmatpush3.bf16.msra.mxu1 %v655_v16  ;;  %585 = vmatprep.subr.bf16.mxu0 %v656_v17 }
  0x12   :  { %607 = vmatprep.subr.bf16.mxu1 %v657_v18 }
  0x14   :  { %586 = vmatpush3.bf16.msra.mxu0 %v658_v19 }
  0x15   :  { %608 = vmatpush3.bf16.msra.mxu1 %v659_v20  ;;  %587 = vmatprep.subr.bf16.mxu0 %v660_v21 }
  0x16   :  { %609 = vmatprep.subr.bf16.mxu1 %v661_v22 }
  0x18   :  { %588 = vmatpush3.bf16.msra.mxu0 %v662_v23 }
  0x19   :  { %610 = vmatpush3.bf16.msra.mxu1 %v663_v24  ;;  %589 = vmatprep.subr.bf16.mxu0 %v664_v25  ;;  %v513_v25 = vlaneseq }
  0x1a   :  { %611 = vmatprep.subr.bf16.mxu1 %v665_v26 }
  0x1b   :  { %v514_v26 = vshrl.u32 %v513_v25, 7 }
  0x1c   :  { %590 = vmatpush3.bf16.msra.mxu0 %v666_v27  ;;  %v506_v27 = vld [vmem:[%s855_s2] sm:$0x1] }
  0x1d   :  { %612 = vmatpush3.bf16.msra.mxu1 %v667_v28  ;;  %591 = vmatprep.subr.bf16.mxu0 %v668_v29  ;;  %v515_v28 = vsub.s32 0, %v514_v26 }
  0x1e   :  { %613 = vmatprep.subr.bf16.mxu1 %v669_v30 }
  0x20   :  { %592 = vmatpush3.bf16.msra.mxu0 %v670_v31  ;;  %v508_v31 = vld [vmem:[%s856_s3] sm:$0x1] }
  0x21   :  { %614 = vmatpush3.bf16.msra.mxu1 %v671_v32  ;;  %626 = vmatprep.subr.bf16.mxu0 %v685_v1 }
  0x23   :  { %379 = vmatmul.mubr.bf16.vlgmr.msra.gmra.mxu0 %v672_v33 }
  0x24   :  { %420 = vmatmul.mubr.bf16.vlgmr.msra.gmra.mxu1 %v675_v35  ;;  %627 = vmatpush3.bf16.msra.mxu0 %v678_v37 }
  0x25   :  { %628 = vmatprep.subr.bf16.mxu0 %v685_v1  ;;  %634 = vmatprep.mubr.msk.bf16.mxu0 %vm686_vm0, %v685_v1 }
  0x28   :  { %629 = vmatpush3.bf16.msra.mxu0 %v679_v38 }
  0x29   :  { %630 = vmatprep.subr.bf16.mxu0 %v685_v1 }
  0x2c   :  { %631 = vmatpush3.bf16.msra.mxu0 %v680_v39 }
  0x2d   :  { %632 = vmatprep.subr.bf16.mxu0 %v685_v1 }
  0x30   :  { %633 = vmatpush3.bf16.msra.mxu0 %v681_v40 }
  0x33   :  { %635 = vmatmul.mubr.msk.bf16.vlgmr.msra.gmra.mxu0 %vm342_vm1, %v682_v41 }
  0xe3   :  { %v593_v42 = vpop.f32.mrf.mxu0 }
  0xe4   :  { %v615_v43 = vpop.f32.mrf.mxu1 }
  0xe5   :  { %v594_v44 = vpop.f32.mrf.mxu0 }
  0xe6   :  { %v616_v45 = vpop.f32.mrf.mxu1  ;;  %v595_v50 = vadd.f32 %v594_v44, %v593_v42 }
  0xe7   :  { %v596_v46 = vpop.f32.mrf.mxu0  ;;  %v617_v51 = vadd.f32 %v616_v45, %v615_v43 }
  0xe8   :  { %v618_v47 = vpop.f32.mrf.mxu1 }
  0xe9   :  { %v597_v48 = vpop.f32.mrf.mxu0  ;;  %v422_v55 = vadd.f32 %v617_v51, %v595_v50 }
  0xea   :  { %v619_v49 = vpop.f32.mrf.mxu1  ;;  %v598_v52 = vadd.f32 %v597_v48, %v596_v46 }
  0xeb   :  { %v620_v53 = vadd.f32 %v619_v49, %v618_v47 }
  0xed   :  { %v425_v58 = vadd.f32 %v620_v53, %v598_v52 }
  0xf3   :  { %v462_v54 = vpop.f32.mrf.mxu0 }
  0xf4   :  { %v463_v57 = vadd.f32 %v462_v54, %v422_v55 }
  0xf5   :  { %v636_v56 = vpop.f32.mrf.mxu0 }
  0xf6   :  { %v480_v62 = vmul.f32 %v463_v57, %v463_v57 }
  0xf7   :  { %v465_v59 = vpop.f32.mrf.mxu0 }
  0xf8   :  { %v466_v60 = vadd.f32 %v465_v59, %v425_v58 }
  0xf9   :  { %v637_v61 = vpop.f32.mrf.mxu0 }
  0xfa   :  { %v473_v63 = vadd.f32 %v466_v60, %v463_v57  ;;  %v481_v0 = vmul.f32 %v466_v60, %v466_v60 }
  0xfc   :  { %v474_v1 = vrot.slane %v473_v63, 4  ;;  %v482_v2 = vadd.f32 %v481_v0, %v480_v62 }
  0xfe   :  { %v475_v3 = vadd.f32 %v474_v1, %v473_v63  ;;  %v483_v4 = vrot.slane %v482_v2, 4 }
 0x100   :  { %v476_v5 = vrot.slane %v475_v3, 2  ;;  %v484_v6 = vadd.f32 %v483_v4, %v482_v2 }
 0x102   :  { %v477_v7 = vadd.f32 %v476_v5, %v475_v3  ;;  %v485_v8 = vrot.slane %v484_v6, 2 }
 0x104   :  { %v478_v9 = vrot.slane %v477_v7, 1  ;;  %v486_v10 = vadd.f32 %v485_v8, %v484_v6 }
 0x106   :  { %v487_v11 = vrot.slane %v486_v10, 1  ;;  %v479_v12 = vadd.f32 %v478_v9, %v477_v7 }
 0x108   :  { %v488_v13 = vadd.f32 %v487_v11, %v486_v10 }
 0x10a   :  { %v491_v15 = vsel %vm490_vm2, %v479_v12, %v488_v13 }
 0x10b   :  { %v492_v16 = vadd.f32 %v491_v15, %v489_v14 }
 0x10d   :  { %493 = vst [vmem:[#allocation2] sm:$0x3] %v492_v16 }
 0x114   :  { %v497_v17 = vld [vmem:[#allocation2] sm:$0x1]  ;;  %v499_v18 = vld [vmem:[#allocation2 + $0x1] sm:$0x1] }
 0x115   :  { %v498_v19 = vmul.f32 0.0625, %v497_v17  ;;  %v500_v20 = vmul.f32 0.0625, %v499_v18 }
 0x117   :  { %v501_v21 = vmul.f32 %v498_v19, %v498_v19 }
 0x119   :  { %v502_v22 = vsub.f32 %v500_v20, %v501_v21 }
 0x11b   :  { %v503_v23 = vmax.f32 %v502_v22, 0.0 }
 0x11d   :  { %v504_v24 = vadd.f32 1e-05, %v503_v23 }
 0x11f   :  { %683 = vrsqrt.f32 %v504_v24 }
 0x12c   :  { %v684_v29 = vpop.eup %683 }
 0x12d   :  { %v507_v30 = vmul.f32 %v684_v29, %v506_v27 }
 0x12f   :  { %v509_v32 = vmul.f32 %v507_v30, %v498_v19  ;;  %v516_v33 = vrot.slane %v507_v30, %v515_v28 }
 0x131   :  { %v510_v34 = vsub.f32 %v508_v31, %v509_v32  ;;  %v517_v35 = vmul.f32 %v516_v33, %v463_v57  ;;  %v518_v36 = vmul.f32 %v516_v33, %v466_v60 }
 0x133   :  { %v523_v37 = vrot.slane %v510_v34, %v515_v28 }
 0x135   :  { %v525_v38 = vadd.f32 %v523_v37, %v517_v35  ;;  %v526_v39 = vadd.f32 %v523_v37, %v518_v36 }
 0x137   :  { %v527_v40 = vmax.f32 %v525_v38, 0.0  ;;  %v528_v41 = vmax.f32 %v526_v39, 0.0 }
 0x139   :  { %529 = vst [vmem:[%s857_s4] sm:$0xff] %v527_v40  ;;  %530 = vst [vmem:[%s857_s4 + $0x8] sm:$0xff] %v528_v41 }

// kernel: reference_encoder_forward.12
= control target key start
LH: loop header
LB: loop body
LE: loop exit
PB: predicated region body
PF: predicated region fallthrough
CT: control target
= control target key end

     0   :  { %v1184_v1 = vmov 0.0   ;;  %v1185_v23 = vmov 1983009808   ;;  %v177_v25 = vlaneseq  ;;  %vm1186_vm0 = vmmov 0   ;;  %s1472_s1 = inlined_call_operand.vmem [shape: bf16[1152,128], index: 1, kind: input, shape index: {}]   ;;  %s1473_s0 = inlined_call_operand.vmem [shape: bf16[4,1152], index: 0, kind: input, shape index: {}]   ;;  %s1474_s4 = inlined_call_operand.vmem [shape: f32[1,4,128], index: 4, kind: output, shape index: {}]   ;;  %s1475_s2 = inlined_call_operand.vmem [shape: f32[1,128], index: 2, kind: input, shape index: {}]   ;;  %s1476_s3 = inlined_call_operand.vmem [shape: f32[1,128], index: 3, kind: input, shape index: {}]  }
   0x1   :  { %v1108_v0 = vld [vmem:[%s1472_s1 + $0x78] sm:$0xff]   ;;  %22 = vst [vmem:[#allocation2] sm:$0x3] %v1184_v1  ;;  %v1112_v5 = vld [vmem:[%s1472_s1 + $0x70] sm:$0xff]   ;;  %v1116_v9 = vld [vmem:[%s1472_s1 + $0x68] sm:$0xff]   ;;  %v175_v24 = vunpack.c.l.s4 %v1185_v23  ;;  %vm858_vm1 = vcmask 1043456  }
   0x2   :  { %v1109_v2 = vld [vmem:[%s1472_s1 + $0xf8] sm:$0xff]   ;;  %988 = vmatprep.subr.bf16.mxu0 %v1108_v0  ;;  %v1113_v6 = vld [vmem:[%s1472_s1 + $0xf0] sm:$0xff]   ;;  %v1117_v10 = vld [vmem:[%s1472_s1 + $0xe8] sm:$0xff]   ;;  %v1291_v31 = vshrl.u32 %v177_v25, 7  ;;  %vm875_vm2 = vcmask 1040384  }
   0x3   :  { %v1110_v3 = vld [vmem:[%s1472_s1 + $0x38] sm:$0xff]   ;;  %1010 = vmatprep.subr.bf16.mxu1 %v1109_v2  ;;  %v1114_v7 = vld [vmem:[%s1472_s1 + $0x30] sm:$0xff]   ;;  %v1118_v11 = vld [vmem:[%s1472_s1 + $0x28] sm:$0xff]   ;;  %v176_v30 = vunpack.c.0.s8 %v175_v24 }
   0x4   :  { %v1111_v4 = vld [vmem:[%s1472_s1 + $0xb8] sm:$0xff]   ;;  %989 = vmatpush3.bf16.msra.mxu0 %v1110_v3  ;;  %v1115_v8 = vld [vmem:[%s1472_s1 + $0xb0] sm:$0xff]   ;;  %v1119_v12 = vld [vmem:[%s1472_s1 + $0xa8] sm:$0xff]  }
   0x5   :  { %1011 = vmatpush3.bf16.msra.mxu1 %v1111_v4  ;;  %990 = vmatprep.subr.bf16.mxu0 %v1112_v5  ;;  %v1120_v13 = vld [vmem:[%s1472_s1 + $0x60] sm:$0xff]   ;;  %v1124_v17 = vld [vmem:[%s1472_s1 + $0x58] sm:$0xff]   ;;  %v1128_v21 = vld [vmem:[%s1472_s1 + $0x50] sm:$0xff]   ;;  %v1306_v36 = vsub.s32 %v176_v30, %v1291_v31 }
   0x6   :  { %1012 = vmatprep.subr.bf16.mxu1 %v1113_v6  ;;  %v1121_v14 = vld [vmem:[%s1472_s1 + $0xe0] sm:$0xff]   ;;  %v1125_v18 = vld [vmem:[%s1472_s1 + $0xd8] sm:$0xff]   ;;  %v1129_v22 = vld [vmem:[%s1472_s1 + $0xd0] sm:$0xff]  }
   0x7   :  { %v1122_v15 = vld [vmem:[%s1472_s1 + $0x20] sm:$0xff]   ;;  %v1126_v19 = vld [vmem:[%s1472_s1 + $0x18] sm:$0xff]   ;;  %v1130_v26 = vld [vmem:[%s1472_s1 + $0x10] sm:$0xff]  }
   0x8   :  { %991 = vmatpush3.bf16.msra.mxu0 %v1114_v7  ;;  %v1123_v16 = vld [vmem:[%s1472_s1 + $0xa0] sm:$0xff]   ;;  %v1127_v20 = vld [vmem:[%s1472_s1 + $0x98] sm:$0xff]   ;;  %v1131_v27 = vld [vmem:[%s1472_s1 + $0x90] sm:$0xff]  }
   0x9   :  { %1013 = vmatpush3.bf16.msra.mxu1 %v1115_v8  ;;  %992 = vmatprep.subr.bf16.mxu0 %v1116_v9  ;;  %v1132_v28 = vld [vmem:[%s1472_s1 + $0x48] sm:$0xff]   ;;  %v1136_v34 = vld [vmem:[%s1472_s1 + $0x40] sm:$0xff]   ;;  %v1141_v42 = vld [vmem:[%s1472_s1 + $0x178] sm:$0xff]  }
   0xa   :  { %1014 = vmatprep.subr.bf16.mxu1 %v1117_v10  ;;  %v1133_v29 = vld [vmem:[%s1472_s1 + $0xc8] sm:$0xff]   ;;  %v1137_v35 = vld [vmem:[%s1472_s1 + $0xc0] sm:$0xff]   ;;  %v1142_v43 = vld [vmem:[%s1472_s1 + $0x138] sm:$0xff]  }
   0xb   :  { %v1134_v32 = vld [vmem:[%s1472_s1 + $0x8] sm:$0xff]   ;;  %v1138_v37 = vld [vmem:[%s1472_s1] sm:$0xff]   ;;  %v1143_v46 = vld [vmem:[%s1472_s1 + $0x1f8] sm:$0xff]  }
   0xc   :  { %993 = vmatpush3.bf16.msra.mxu0 %v1118_v11  ;;  %v1135_v33 = vld [vmem:[%s1472_s1 + $0x88] sm:$0xff]   ;;  %v1139_v38 = vld [vmem:[%s1472_s1 + $0x80] sm:$0xff]   ;;  %v1144_v47 = vld [vmem:[%s1472_s1 + $0x1b8] sm:$0xff]  }
   0xd   :  { %1015 = vmatpush3.bf16.msra.mxu1 %v1119_v12  ;;  %994 = vmatprep.subr.bf16.mxu0 %v1120_v13  ;;  %v23_v39 = vld [vmem:[%s1473_s0] sm:$0xff]  ;;  %v1145_v49 = vld [vmem:[%s1472_s1 + $0x170] sm:$0xff]   ;;  %v1149_v53 = vld [vmem:[%s1472_s1 + $0x168] sm:$0xff]  }
   0xe   :  { %1016 = vmatprep.subr.bf16.mxu1 %v1121_v14  ;;  %v180_v40 = vrot.slane %v23_v39, %v1306_v36  ;;  %v173_v41 = vcombine.high %v23_v39, %v23_v39  ;;  %v1146_v50 = vld [vmem:[%s1472_s1 + $0x130] sm:$0xff]   ;;  %v1150_v54 = vld [vmem:[%s1472_s1 + $0x128] sm:$0xff]   ;;  %v1153_v57 = vld [vmem:[%s1472_s1 + $0x160] sm:$0xff]  }
   0xf   :  { %v1147_v51 = vld [vmem:[%s1472_s1 + $0x1f0] sm:$0xff]   ;;  %v1151_v55 = vld [vmem:[%s1472_s1 + $0x1e8] sm:$0xff]   ;;  %v1154_v58 = vld [vmem:[%s1472_s1 + $0x120] sm:$0xff]  }
  0x10   :  { %995 = vmatpush3.bf16.msra.mxu0 %v1122_v15  ;;  %v188_v44 = vcombine.high %v180_v40, %v180_v40  ;;  %v187_v45 = vrot.slane %v173_v41, %v1306_v36  ;;  %v1148_v52 = vld [vmem:[%s1472_s1 + $0x1b0] sm:$0xff]   ;;  %v1152_v56 = vld [vmem:[%s1472_s1 + $0x1a8] sm:$0xff]   ;;  %v1155_v59 = vld [vmem:[%s1472_s1 + $0x1e0] sm:$0xff]  }
  0x11   :  { %1017 = vmatpush3.bf16.msra.mxu1 %v1123_v16  ;;  %996 = vmatprep.subr.bf16.mxu0 %v1124_v17  ;;  %v1156_v60 = vld [vmem:[%s1472_s1 + $0x1a0] sm:$0xff]   ;;  %v1157_v61 = vld [vmem:[%s1472_s1 + $0x158] sm:$0xff]   ;;  %v1161_v2 = vld [vmem:[%s1472_s1 + $0x150] sm:$0xff]  }
  0x12   :  { %1018 = vmatprep.subr.bf16.mxu1 %v1125_v18  ;;  %687 = vmatprep.mubr.bf16.mxu0 %v188_v44  ;;  %v189_v48 = vcombine.high %v187_v45, %v187_v45  ;;  %v1158_v62 = vld [vmem:[%s1472_s1 + $0x118] sm:$0xff]   ;;  %v1162_v3 = vld [vmem:[%s1472_s1 + $0x110] sm:$0xff]   ;;  %v1165_v6 = vld [vmem:[%s1472_s1 + $0x148] sm:$0xff]  }
  0x13   :  { %v1159_v63 = vld [vmem:[%s1472_s1 + $0x1d8] sm:$0xff]   ;;  %v1163_v4 = vld [vmem:[%s1472_s1 + $0x1d0] sm:$0xff]   ;;  %v1166_v7 = vld [vmem:[%s1472_s1 + $0x108] sm:$0xff]  }
  0x14   :  { %997 = vmatpush3.bf16.msra.mxu0 %v1126_v19  ;;  %727 = vmatprep.mubr.bf16.mxu1 %v189_v48  ;;  %v1160_v0 = vld [vmem:[%s1472_s1 + $0x198] sm:$0xff]   ;;  %v1164_v5 = vld [vmem:[%s1472_s1 + $0x190] sm:$0xff]   ;;  %v1167_v8 = vld [vmem:[%s1472_s1 + $0x1c8] sm:$0xff]  }
  0x15   :  { %1019 = vmatpush3.bf16.msra.mxu1 %v1127_v20  ;;  %998 = vmatprep.subr.bf16.mxu0 %v1128_v21  ;;  %v1168_v9 = vld [vmem:[%s1472_s1 + $0x188] sm:$0xff]   ;;  %v1169_v10 = vld [vmem:[%s1472_s1 + $0x140] sm:$0xff]   ;;  %v1174_v19 = vld [vmem:[%s1472_s1 + $0x238] sm:$0xff]  }
  0x16   :  { %1020 = vmatprep.subr.bf16.mxu1 %v1129_v22  ;;  %v1170_v11 = vld [vmem:[%s1472_s1 + $0x100] sm:$0xff]   ;;  %v24_v13 = vld [vmem:[%s1473_s0 + $0x8] sm:$0xff]  ;;  %v1175_v21 = vld [vmem:[%s1472_s1 + $0x230] sm:$0xff]  }
  0x17   :  { %v1171_v12 = vld [vmem:[%s1472_s1 + $0x1c0] sm:$0xff]   ;;  %v197_v14 = vrot.slane %v24_v13, %v1306_v36  ;;  %v190_v15 = vcombine.high %v24_v13, %v24_v13  ;;  %v1176_v22 = vld [vmem:[%s1472_s1 + $0x228] sm:$0xff]   ;;  %v1178_v24 = vld [vmem:[%s1472_s1 + $0x218] sm:$0xff]  }
  0x18   :  { %999 = vmatpush3.bf16.msra.mxu0 %v1130_v26  ;;  %v1172_v16 = vld [vmem:[%s1472_s1 + $0x180] sm:$0xff]   ;;  %v1179_v25 = vld [vmem:[%s1472_s1 + $0x210] sm:$0xff]   ;;  %v1180_v26 = vld [vmem:[%s1472_s1 + $0x208] sm:$0xff]  }
  0x19   :  { %1021 = vmatpush3.bf16.msra.mxu1 %v1131_v27  ;;  %1000 = vmatprep.subr.bf16.mxu0 %v1132_v28  ;;  %v205_v17 = vcombine.high %v197_v14, %v197_v14  ;;  %v204_v18 = vrot.slane %v190_v15, %v1306_v36  ;;  %v1177_v23 = vld [vmem:[%s1472_s1 + $0x220] sm:$0xff]   ;;  %v915_v28 = vld.sshfl [vmem:[%s1473_s0 + $0x10] sm:$0x3 pattern:$0x76325410] }
  0x1a   :  { %1022 = vmatprep.subr.bf16.mxu1 %v1133_v29  ;;  %v1181_v27 = vld [vmem:[%s1472_s1 + $0x200] sm:$0xff]  }
  0x1b   :  { %v206_v20 = vcombine.high %v204_v18, %v204_v18 }
  0x1c   :  { %1001 = vmatpush3.bf16.msra.mxu0 %v1134_v32 }
  0x1d   :  { %1023 = vmatpush3.bf16.msra.mxu1 %v1135_v33  ;;  %1002 = vmatprep.subr.bf16.mxu0 %v1136_v34 }
  0x1e   :  { %1024 = vmatprep.subr.bf16.mxu1 %v1137_v35 }
  0x20   :  { %1003 = vmatpush3.bf16.msra.mxu0 %v1138_v37 }
  0x21   :  { %1025 = vmatpush3.bf16.msra.mxu1 %v1139_v38  ;;  %1032 = vmatprep.subr.bf16.mxu0 %v1141_v42 }
  0x22   :  { %1054 = vmatprep.subr.bf16.mxu1 %v1143_v46 }
  0x23   :  { %688 = vmatmul.mubr.bf16.vlgmr.msra.gmra.mxu0 %v180_v40 }
  0x24   :  { %1033 = vmatpush3.bf16.msra.mxu0 %v1142_v43  ;;  %728 = vmatmul.mubr.bf16.vlgmr.msra.gmra.mxu1 %v187_v45 }
  0x25   :  { %1034 = vmatprep.subr.bf16.mxu0 %v1145_v49  ;;  %1055 = vmatpush3.bf16.msra.mxu1 %v1144_v47 }
  0x26   :  { %1056 = vmatprep.subr.bf16.mxu1 %v1147_v51  ;;  %767 = vmatprep.mubr.bf16.mxu0 %v205_v17 }
  0x27   :  { %807 = vmatprep.mubr.bf16.mxu1 %v206_v20  ;;  %v891_v20 = vld [vmem:[%s1475_s2] sm:$0x1] }
  0x28   :  { %1035 = vmatpush3.bf16.msra.mxu0 %v1146_v50 }
  0x29   :  { %1036 = vmatprep.subr.bf16.mxu0 %v1149_v53  ;;  %1057 = vmatpush3.bf16.msra.mxu1 %v1148_v52 }
  0x2a   :  { %1058 = vmatprep.subr.bf16.mxu1 %v1151_v55 }
  0x2c   :  { %1037 = vmatpush3.bf16.msra.mxu0 %v1150_v54 }
  0x2d   :  { %1038 = vmatprep.subr.bf16.mxu0 %v1153_v57  ;;  %1059 = vmatpush3.bf16.msra.mxu1 %v1152_v56 }
  0x2e   :  { %1060 = vmatprep.subr.bf16.mxu1 %v1155_v59 }
  0x30   :  { %1039 = vmatpush3.bf16.msra.mxu0 %v1154_v58 }
  0x31   :  { %1040 = vmatprep.subr.bf16.mxu0 %v1157_v61  ;;  %1061 = vmatpush3.bf16.msra.mxu1 %v1156_v60 }
  0x32   :  { %1062 = vmatprep.subr.bf16.mxu1 %v1159_v63 }
  0x34   :  { %1041 = vmatpush3.bf16.msra.mxu0 %v1158_v62 }
  0x35   :  { %1042 = vmatprep.subr.bf16.mxu0 %v1161_v2  ;;  %1063 = vmatpush3.bf16.msra.mxu1 %v1160_v0 }
  0x36   :  { %1064 = vmatprep.subr.bf16.mxu1 %v1163_v4 }
  0x38   :  { %1043 = vmatpush3.bf16.msra.mxu0 %v1162_v3 }
  0x39   :  { %1044 = vmatprep.subr.bf16.mxu0 %v1165_v6  ;;  %1065 = vmatpush3.bf16.msra.mxu1 %v1164_v5 }
  0x3a   :  { %1066 = vmatprep.subr.bf16.mxu1 %v1167_v8 }
  0x3c   :  { %1045 = vmatpush3.bf16.msra.mxu0 %v1166_v7 }
  0x3d   :  { %1046 = vmatprep.subr.bf16.mxu0 %v1169_v10  ;;  %1067 = vmatpush3.bf16.msra.mxu1 %v1168_v9  ;;  %v874_v9 = vld [vmem:[#allocation2] sm:$0x3] }
  0x3e   :  { %1068 = vmatprep.subr.bf16.mxu1 %v1171_v12 }
  0x40   :  { %1047 = vmatpush3.bf16.msra.mxu0 %v1170_v11 }
  0x41   :  { %1085 = vmatprep.subr.bf16.mxu0 %v1184_v1  ;;  %1069 = vmatpush3.bf16.msra.mxu1 %v1172_v16 }
  0x43   :  { %768 = vmatmul.mubr.bf16.vlgmr.msra.gmra.mxu0 %v197_v14 }
  0x44   :  { %1086 = vmatpush3.bf16.msra.mxu0 %v1174_v19  ;;  %1101 = vmatprep.mubr.msk.bf16.mxu0 %vm1186_vm0, %v1184_v1 }
  0x45   :  { %808 = vmatmul.mubr.bf16.vlgmr.msra.gmra.mxu1 %v204_v18  ;;  %1087 = vmatprep.subr.bf16.mxu0 %v1184_v1 }
  0x48   :  { %1088 = vmatpush3.bf16.msra.mxu0 %v1175_v21  ;;  %v899_v21 = vsub.s32 0, %v1291_v31 }
  0x49   :  { %1089 = vmatprep.subr.bf16.mxu0 %v1184_v1 }
  0x4c   :  { %1090 = vmatpush3.bf16.msra.mxu0 %v1176_v22 }
  0x4d   :  { %1091 = vmatprep.subr.bf16.mxu0 %v1184_v1 }
  0x50   :  { %1092 = vmatpush3.bf16.msra.mxu0 %v1177_v23 }
  0x51   :  { %1093 = vmatprep.subr.bf16.mxu0 %v1184_v1 }
  0x54   :  { %1094 = vmatpush3.bf16.msra.mxu0 %v1178_v24  ;;  %v893_v24 = vld [vmem:[%s1476_s3] sm:$0x1] }
  0x55   :  { %1095 = vmatprep.subr.bf16.mxu0 %v1184_v1 }
  0x58   :  { %1096 = vmatpush3.bf16.msra.mxu0 %v1179_v25 }
  0x59   :  { %1097 = vmatprep.subr.bf16.mxu0 %v1184_v1 }
  0x5c   :  { %1098 = vmatpush3.bf16.msra.mxu0 %v1180_v26 }
  0x5d   :  { %1099 = vmatprep.subr.bf16.mxu0 %v1184_v1 }
  0x60   :  { %1100 = vmatpush3.bf16.msra.mxu0 %v1181_v27 }
  0x63   :  { %1102 = vmatmul.mubr.bf16.vlgmr.msra.gmra.mxu0 %v915_v28 }
  0xe3   :  { %v1004_v29 = vpop.f32.mrf.mxu0 }
  0xe4   :  { %v1026_v30 = vpop.f32.mrf.mxu1 }
  0xe5   :  { %v1005_v32 = vpop.f32.mrf.mxu0 }
  0xe6   :  { %v1027_v33 = vpop.f32.mrf.mxu1  ;;  %v1006_v45 = vadd.f32 %v1005_v32, %v1004_v29 }
  0xe7   :  { %v1007_v34 = vpop.f32.mrf.mxu0  ;;  %v1028_v46 = vadd.f32 %v1027_v33, %v1026_v30 }
  0xe8   :  { %v1029_v36 = vpop.f32.mrf.mxu1 }
  0xe9   :  { %v1008_v35 = vpop.f32.mrf.mxu0  ;;  %v730_v48 = vadd.f32 %v1028_v46, %v1006_v45 }
  0xea   :  { %v1030_v37 = vpop.f32.mrf.mxu1 }
 0x103   :  { %v1048_v38 = vpop.f32.mrf.mxu0 }
 0x105   :  { %v1049_v39 = vpop.f32.mrf.mxu0  ;;  %v1070_v40 = vpop.f32.mrf.mxu1 }
 0x106   :  { %v1050_v47 = vadd.f32 %v1049_v39, %v1048_v38 }
 0x107   :  { %v1051_v41 = vpop.f32.mrf.mxu0  ;;  %v1071_v42 = vpop.f32.mrf.mxu1 }
 0x108   :  { %v770_v49 = vadd.f32 %v1050_v47, %v730_v48  ;;  %v1072_v50 = vadd.f32 %v1071_v42, %v1070_v40 }
 0x109   :  { %v1052_v1 = vpop.f32.mrf.mxu0  ;;  %v1073_v43 = vpop.f32.mrf.mxu1 }
 0x10a   :  { %v810_v51 = vadd.f32 %v1072_v50, %v770_v49 }
 0x10b   :  { %v1074_v44 = vpop.f32.mrf.mxu1 }
 0x123   :  { %v849_v52 = vpop.f32.mrf.mxu0 }
 0x124   :  { %v850_v53 = vadd.f32 %v849_v52, %v810_v51 }
 0x125   :  { %v1103_v54 = vpop.f32.mrf.mxu0 }
 0x126   :  { %857 = vst [vmem:[%s1474_s4] sm:$0xf] %v850_v53  ;;  %v859_v55 = vsel %vm858_vm1, %v850_v53, 0.0  ;;  %v866_v56 = vmul.f32 %v850_v53, %v850_v53 }
 0x127   :  { %v860_v57 = vrot.slane %v859_v55, 4  ;;  %v852_v58 = vpop.f32.mrf.mxu0 }
 0x128   :  { %v867_v59 = vsel %vm858_vm1, %v866_v56, 0.0 }
 0x129   :  { %v861_v60 = vadd.f32 %v860_v57, %v859_v55  ;;  %v868_v61 = vrot.slane %v867_v59, 4  ;;  %v1104_v62 = vpop.f32.mrf.mxu0 }
 0x12b   :  { %v862_v63 = vrot.slane %v861_v60, 2  ;;  %v869_v0 = vadd.f32 %v868_v61, %v867_v59 }
 0x12d   :  { %v863_v2 = vadd.f32 %v862_v63, %v861_v60  ;;  %v870_v3 = vrot.slane %v869_v0, 2  ;;  %v896_v28 = vld [vmem:[%s1474_s4] sm:$0xf] }
 0x12f   :  { %v864_v4 = vrot.slane %v863_v2, 1  ;;  %v871_v5 = vadd.f32 %v870_v3, %v869_v0 }
 0x131   :  { %v872_v6 = vrot.slane %v871_v5, 1  ;;  %v865_v7 = vadd.f32 %v864_v4, %v863_v2 }
 0x133   :  { %v873_v8 = vadd.f32 %v872_v6, %v871_v5 }
 0x135   :  { %v876_v10 = vsel %vm875_vm2, %v865_v7, %v873_v8 }
 0x136   :  { %v877_v11 = vadd.f32 %v876_v10, %v874_v9 }
 0x138   :  { %878 = vst [vmem:[#allocation2] sm:$0x3] %v877_v11 }
 0x13f   :  { %v882_v12 = vld [vmem:[#allocation2] sm:$0x1]  ;;  %v884_v13 = vld [vmem:[#allocation2 + $0x1] sm:$0x1] }
 0x140   :  { %v883_v14 = vmul.f32 0.25, %v882_v12  ;;  %v885_v15 = vmul.f32 0.25, %v884_v13 }
 0x142   :  { %v886_v16 = vmul.f32 %v883_v14, %v883_v14 }
 0x144   :  { %v887_v17 = vsub.f32 %v885_v15, %v886_v16 }
 0x146   :  { %v888_v18 = vmax.f32 %v887_v17, 0.0 }
 0x148   :  { %v889_v19 = vadd.f32 1e-05, %v888_v18 }
 0x14a   :  { %1182 = vrsqrt.f32 %v889_v19 }
 0x157   :  { %v1183_v22 = vpop.eup %1182 }
 0x158   :  { %v892_v23 = vmul.f32 %v1183_v22, %v891_v20 }
 0x15a   :  { %v894_v25 = vmul.f32 %v892_v23, %v883_v14  ;;  %v900_v26 = vrot.slane %v892_v23, %v899_v21 }
 0x15c   :  { %v895_v27 = vsub.f32 %v893_v24, %v894_v25  ;;  %v901_v29 = vmul.f32 %v900_v26, %v896_v28 }
 0x15e   :  { %v906_v30 = vrot.slane %v895_v27, %v899_v21 }
 0x160   :  { %v908_v32 = vadd.f32 %v906_v30, %v901_v29 }
 0x162   :  { %v909_v33 = vmax.f32 %v908_v32, 0.0 }
 0x164   :  { %910 = vst [vmem:[%s1474_s4] sm:$0xf] %v909_v33 }

// kernel: reference_encoder_forward.13
= control target key start
LH: loop header
LB: loop body
LE: loop exit
PB: predicated region body
PF: predicated region fallthrough
CT: control target
= control target key end

     0   :  { %10 = vsyncpa [#allocation4], 0  ;;  %vm26_vm0 = vcmask 254976   ;;  %v447_v0 = vmov 0.0   ;;  %vm448_vm1 = vmmov 0   ;;  %v59_v8 = vlaneseq  ;;  %s543_s0 = inlined_call_operand.vmem [shape: bf16[2,2,128], index: 0, kind: input, shape index: {}]   ;;  %s544_s1 = inlined_call_operand.vmem [shape: bf16[128,96], index: 1, kind: input, shape index: {}]   ;;  %s545_s2 = inlined_call_operand.vmem [shape: f32[1,96], index: 2, kind: input, shape index: {}]   ;;  %s546_s3 = inlined_call_operand.vmem [shape: bf16[32,96], index: 3, kind: input, shape index: {}]   ;;  %s547_s4 = inlined_call_operand.vmem [shape: f32[1,96], index: 4, kind: input, shape index: {}]   ;;  %s548_s5 = inlined_call_operand.hbm [shape: f32[2,32], index: 5, kind: output, shape index: {}]  }
   0x1   :  { %27 = vst.msk [vmem:[#allocation3] sm:$0x3] %vm26_vm0, %v447_v0  ;;  %339 = vmatprep.subr.bf16.mxu0 %v447_v0  ;;  %v393_v1 = vld [vmem:[%s544_s1 + $0x38] sm:$0xff]   ;;  %355 = vmatprep.mubr.msk.bf16.mxu0 %vm448_vm1, %v447_v0  ;;  %v394_v2 = vld [vmem:[%s544_s1 + $0x30] sm:$0xff]   ;;  %v395_v3 = vld [vmem:[%s544_s1 + $0x28] sm:$0xff]   ;;  %vm170_vm2 = vcmask 779264  }
   0x2   :  { %340 = vmatpush3.bf16.msra.mxu0 %v393_v1  ;;  %v396_v5 = vld [vmem:[%s544_s1 + $0x20] sm:$0xff]   ;;  %v449_v6 = vmov 1966171168   ;;  %v397_v9 = vld [vmem:[%s544_s1 + $0x18] sm:$0xff]   ;;  %v60_v11 = vshrl.u32 %v59_v8, 7  ;;  %v398_v12 = vld [vmem:[%s544_s1 + $0x10] sm:$0xff]  }
   0x3   :  { %341 = vmatprep.subr.bf16.mxu0 %v447_v0  ;;  %v57_v7 = vunpack.c.l.s4 %v449_v6  ;;  %v28_v13 = vld [vmem:[%s543_s0] sm:$0x1]  ;;  %v29_v14 = vld [vmem:[%s543_s0 + $0x1] sm:$0x1]  ;;  %v399_v17 = vld [vmem:[%s544_s1 + $0x8] sm:$0xff]  }
   0x4   :  { %v55_v15 = vcombine.low %v28_v13, %v29_v14  ;;  %v400_v19 = vld [vmem:[%s544_s1] sm:$0xff]   ;;  %v450_v21 = vmov 1983009808   ;;  %s521_s1 = smov 0  }
   0x5   :  { %v58_v10 = vunpack.c.0.s8 %v57_v7  ;;  %v161_v22 = vunpack.c.l.s4 %v450_v21  ;;  %v312_v24 = vld [vmem:[%s545_s2] ss:$0 sm:$0xff] }
   0x6   :  { %342 = vmatpush3.bf16.msra.mxu0 %v394_v2 }
   0x7   :  { %343 = vmatprep.subr.bf16.mxu0 %v447_v0  ;;  %v61_v16 = vsub.s32 %v58_v10, %v60_v11  ;;  %v162_v23 = vunpack.c.0.s8 %v161_v22 }
   0x8   :  { %v173_v4 = vld [vmem:[#allocation3] sm:$0x3]  }
   0x9   :  { %v62_v18 = vrot.slane %v55_v15, %v61_v16  ;;  %v165_v25 = vsub.s32 %v162_v23, %v60_v11  ;;  %v439_v33 = vmov %v173_v4  }
   0xa   :  { %344 = vmatpush3.bf16.msra.mxu0 %v395_v3 }
   0xb   :  { %345 = vmatprep.subr.bf16.mxu0 %v447_v0  ;;  %v69_v20 = vrot.slane %v62_v18, %v61_v16 }
   0xe   :  { %346 = vmatpush3.bf16.msra.mxu0 %v396_v5 }
   0xf   :  { %347 = vmatprep.subr.bf16.mxu0 %v447_v0 }
  0x12   :  { %348 = vmatpush3.bf16.msra.mxu0 %v397_v9 }
  0x13   :  { %349 = vmatprep.subr.bf16.mxu0 %v447_v0 }
  0x16   :  { %350 = vmatpush3.bf16.msra.mxu0 %v398_v12 }
  0x17   :  { %351 = vmatprep.subr.bf16.mxu0 %v447_v0 }
  0x1a   :  { %352 = vmatpush3.bf16.msra.mxu0 %v399_v17 }
  0x1b   :  { %353 = vmatprep.subr.bf16.mxu0 %v447_v0 }
  0x1e   :  { %354 = vmatpush3.bf16.msra.mxu0 %v400_v19 }
  0x21   :  { %356 = vmatmul.mubr.bf16.vlgmr.msra.gmra.mxu0 %v69_v20 }
  0xe1   :  { %v153_v26 = vpop.f32.mrf.mxu0 }
  0xe2   :  { %v154_v27 = vadd.f32 %v312_v24, %v153_v26 }
  0xe3   :  { %v357_v28 = vpop.f32.mrf.mxu0 }
  0xe4   :  { %v166_v29 = vrot.slane %v154_v27, %v165_v25 }
  0xe5   :  { %v156_v30 = vpop.f32.mrf.mxu0 }
  0xe6   :  { %v167_v31 = vcombine.high %v166_v29, %v166_v29  ;;  %171 = vst.msk [vmem:[#allocation2] sm:$0x3] %vm170_vm2, %v166_v29 }
  0xe7   :  { %v358_v32 = vpop.f32.mrf.mxu0 }
  0xe8   :  { %172 = vst.msk [vmem:[#allocation2 + $0x2] sm:$0x3] %vm170_vm2, %v167_v31 }
  0xe9 LB: > { %v401_v34 = vld [vmem:[%s546_s3 + $0x8] sm:$0xff]   ;;  %v451_v35 = vmov 0.0   ;;  %v402_v36 = vld [vmem:[%s546_s3] sm:$0xff]   ;;  %vm452_vm3 = vmmov 0   ;;  %v184_v37 = vpack.c.bf16 %v441_v33, %v441_v33  ;;  %vm208_vm4 = vcmask 261120   ;;  %s453_s19 = smov 64   ;;  %s445_s1 = sphi %s521_s1, %s179_s1   ;;  %v441_v33 = vphi %v439_v33, %v440_v33  }
  0xea   : > { %359 = vmatprep.subr.bf16.mxu0 %v451_v35  ;;  %363 = vmatprep.mubr.msk.bf16.mxu0 %vm452_vm3, %v451_v35  ;;  %v322_v38 = vld [vmem:[%s547_s4] ss:$0 sm:$0xff]  ;;  %s321_s20 = sshll.u32 %s445_s1, 1  ;;  %s454_s22 = smov 96  }
  0xeb   : > { %360 = vmatpush3.bf16.msra.mxu0 %v401_v34  ;;  %s182_s21 = scalar_lea.vmem [#allocation2], %s321_s20  ;;  %s455_s23 = smov 32  }
  0xec   : > { %361 = vmatprep.subr.bf16.mxu0 %v451_v35  ;;  %s179_s1 = sadd.s32 1, %s445_s1  }
  0xed   : > { %p176_p0 = scmp.ge.s32.totalorder %s179_s1, 2  }
  0xee   :  { %s456_s24 = smov (%p176_p0), [#allocation3]  }
  0xef   : > { %362 = vmatpush3.bf16.msra.mxu0 %v402_v36  ;;  %v183_v44 = vld [vmem:[%s182_s21] sm:$0x3]  ;;  %s294_s25 = sshll.u32 (%p176_p0), %s456_s24, 4  ;;  %s295_s25 = int_to_ptr.vmem [resolvable:$true] %s294_s25 }
  0xf0   :  { %s409_s26 = scalar_lea.vmem (%p176_p0), %s295_s25, 32  ;;  %p414_p2 = scmp.lt.s32.totalorder (%p176_p0), %s295_s25, %s295_s25 }
  0xf1   :  { %p410_p1 = scmp.ne.s32.totalorder (%p176_p0), %s295_s25, %s409_s26  ;;  %p415_p3 = scmp.lt.s32.totalorder (%p176_p0), %s409_s26, %s409_s26 }
  0xf2   : > { %364 = vmatmul.mubr.msk.bf16.vlgmr.msra.gmra.mxu0 %vm208_vm4, %v184_v37 }
  0xf3   :  { %p416_p4 = por (%p176_p0), %p415_p3, %p414_p2 }
  0xf5   :  { %p417_p5 = pnand (%p176_p0), %p416_p4, %p410_p1 }
 0x1b2   : > { %v246_v39 = vpop.f32.mrf.mxu0 }
 0x1b3   : > { %v247_v40 = vadd.f32 %v322_v38, %v246_v39 }
 0x1b4   : > { %v365_v41 = vpop.f32.mrf.mxu0 }
 0x1b5   : > { %260 = vrot.lane.b32.xlu0 %v247_v40, %s453_s19  ;;  %v252_v45 = vadd.f32 %v247_v40, %v183_v44 }
 0x1b6   : > { %v249_v42 = vpop.f32.mrf.mxu0 }
 0x1b7   : > { %v326_v46 = vmul.f32 -1.442695, %v252_v45 }
 0x1b8   : > { %v366_v43 = vpop.f32.mrf.mxu0 }
 0x1b9   : > { %403 = vpow2.f32 %v326_v46 }
 0x1c6   : > { %v404_v47 = vpop.eup %403 }
 0x1c7   : > { %v256_v48 = vadd.f32 1.0, %v404_v47 }
 0x1c9   : > { %405 = vrcp.f32 %v256_v48 }
 0x1d6   : > { %v406_v49 = vpop.eup %405 }
 0x1d7   : > { %v270_v56 = vsub.f32 1.0, %v406_v49 }
 0x227   : > { %v261_v50 = vpop.permute.xlu0 %260 }
 0x228   : > { %v263_v51 = vmul.f32 %v406_v49, %v261_v50 }
 0x22a   : > { %265 = vrot.lane.b32.xlu0 %v263_v51, %s453_s19 }
 0x29c   : > { %v266_v52 = vpop.permute.xlu0 %265 }
 0x29d   : > { %v268_v53 = vadd.f32 %v266_v52, %v183_v44 }
 0x29f   : > { %407 = vtanh.f32 %v268_v53 }
 0x2ac   : > { %v408_v54 = vpop.eup %407 }
 0x2ad   : > { %272 = vrot.lane.b32.xlu1 %v408_v54, %s454_s22 }
 0x2b1   : > { %277 = vrot.lane.b32.xlu1 %v441_v33, %s455_s23 }
 0x31f   : > { %v273_v55 = vpop.permute.xlu1 %272 }
 0x320   : > { %v275_v58 = vmul.f32 %v273_v55, %v270_v56 }
 0x323   : > { %v278_v57 = vpop.permute.xlu1 %277 }
 0x324   : > { %v280_v59 = vmul.f32 %v406_v49, %v278_v57 }
 0x326   : > { %v281_v60 = vadd.f32 %v280_v59, %v275_v58 }
 0x328   : > { %283 = vrot.lane.b32.xlu0 %v281_v60, %s454_s22 }
 0x397   :  { %178 = sbr.rel (!%p176_p0) target bundleno = 233 (0xe9), region = 52 }
 0x39a   : > { %v284_v61 = vpop.permute.xlu0 %283  }
 0x39b   : > { %v440_v33 = vmov %v284_v61   ;;  %287 = vst.msk [vmem:[#allocation3] sm:$0x3] (%p176_p0), %vm26_vm0, %v284_v61 }
 0x39c   :  { %420 = shalt.err (!%p417_p5)
}
 0x39d   :  { %297 = dma.vmem_to_hbm [thread:$0]  %s295_s25, 32, %s548_s5, [#allocation4]  }
 0x39e   :  { %437 = dma.done.wait [#allocation4], 32  }
 0x39f   :  { %438 = vsyncadd [#allocation4], 4294967264 }
 0x3a0   :  { %301 = vsyncpa [#allocation4], 1 }

</bundles_post_ra>
